<compile_context>
chip_gen: v7x
topology: tpu7x:2x2x1
jax: 0.10.0
libtpu: 0.0.40
codegen_flags: <defaults>
</compile_context>

<pallas_src>
import jax
import jax.numpy as jnp
import numpy as np
from jax.experimental import pallas as pl
from jax.experimental.pallas import tpu as pltpu


# ----------------------------- Pallas kernel ------------------------------- #

def _make_bilstm_kernel(T, H, with_decoder):
    """Fused bidirectional-LSTM layer kernel (optionally + final Linear)."""
    unroll = T <= 32  # short fixed trip count -> unroll for LLO visibility

    def kernel(*refs):
        if with_decoder:
            (xg_f_ref, xg_b_ref, whh_f_ref, whh_b_ref, dec_w_ref, dec_b_ref,
             out_ref, logits_ref, h_f, c_f, h_b, c_b) = refs
        else:
            (xg_f_ref, xg_b_ref, whh_f_ref, whh_b_ref,
             out_ref, h_f, c_f, h_b, c_b) = refs

        # zero-initialize recurrent state (kept in f32 VMEM scratch)
        h_f[...] = jnp.zeros_like(h_f)
        c_f[...] = jnp.zeros_like(c_f)
        h_b[...] = jnp.zeros_like(h_b)
        c_b[...] = jnp.zeros_like(c_b)

        # loop-invariant recurrent weights (bf16), hoisted out of the loop
        whh_f = whh_f_ref[...]
        whh_b = whh_b_ref[...]

        def cell(gates, c_prev):
            # gate order i, f, g, o (PyTorch).  Note: H=32 < 128 lanes makes
            # these slices sub-lane; unavoidable at this toy size.
            i = jax.nn.sigmoid(gates[:, 0:H])
            f = jax.nn.sigmoid(gates[:, H:2 * H])
            g = jnp.tanh(gates[:, 2 * H:3 * H])
            o = jax.nn.sigmoid(gates[:, 3 * H:4 * H])
            c_new = f * c_prev + i * g
            h_new = o * jnp.tanh(c_new)
            return h_new, c_new

        def step(t, carry):
            # ---- forward direction, time t ----
            g_f = xg_f_ref[t] + jnp.dot(h_f[...].astype(jnp.bfloat16), whh_f,
                                        preferred_element_type=jnp.float32)
            hf, cf = cell(g_f, c_f[...])
            h_f[...] = hf
            c_f[...] = cf
            out_ref[t, :, 0:H] = hf.astype(out_ref.dtype)

            # ---- backward direction, time T-1-t (index reversal, no copies) ----
            tb = T - 1 - t
            g_b = xg_b_ref[tb] + jnp.dot(h_b[...].astype(jnp.bfloat16), whh_b,
                                         preferred_element_type=jnp.float32)
            hb, cb = cell(g_b, c_b[...])
            h_b[...] = hb
            c_b[...] = cb
            out_ref[tb, :, H:2 * H] = hb.astype(out_ref.dtype)
            return carry

        jax.lax.fori_loop(0, T, step, 0, unroll=unroll)

        if with_decoder:
            # encoding = concat(outputs[0], outputs[-1]); logits = enc @ Wd + bd
            enc = jnp.concatenate([out_ref[0], out_ref[T - 1]], axis=-1)  # (B, 4H) bf16
            logits_ref[...] = (
                jnp.dot(enc, dec_w_ref[...], preferred_element_type=jnp.float32)
                + dec_b_ref[...]).astype(logits_ref.dtype)

    return kernel


def _bilstm_layer(x, layer, decoder=None):
    """x: (T, B, D_in) bf16 -> out (T, B, 2H) bf16 [, logits (B, 2) f32]."""
    T, B, d_in = x.shape
    H = layer["whh_f"].shape[0]
    with_dec = decoder is not None

    # Hoisted input projection: one (T*B, D_in) @ (D_in, 4H) bf16 matmul per
    # direction (f32 accumulation), bias folded in here -> (T, B, 4H) f32.
    x2d = x.reshape(T * B, d_in)
    xg_f = (jnp.dot(x2d, layer["wih_f"], preferred_element_type=jnp.float32)
            + layer["b_f"]).reshape(T, B, 4 * H)
    xg_b = (jnp.dot(x2d, layer["wih_b"], preferred_element_type=jnp.float32)
            + layer["b_b"]).reshape(T, B, 4 * H)

    inputs = [xg_f, xg_b, layer["whh_f"], layer["whh_b"]]
    out_shapes = [jax.ShapeDtypeStruct((T, B, 2 * H), jnp.bfloat16)]
    if with_dec:
        dec_w_t, dec_b = decoder
        inputs += [dec_w_t, dec_b]
        out_shapes.append(jax.ShapeDtypeStruct((B, dec_w_t.shape[1]), jnp.float32))

    def vmem():
        return pl.BlockSpec(memory_space=pltpu.MemorySpace.VMEM)

    return pl.pallas_call(
        _make_bilstm_kernel(T, H, with_dec),
        out_shape=tuple(out_shapes) if with_dec else out_shapes[0],
        in_specs=[vmem() for _ in inputs],
        out_specs=tuple(vmem() for _ in out_shapes) if with_dec else vmem(),
        scratch_shapes=[pltpu.VMEM((B, H), jnp.float32) for _ in range(4)],
    )(*inputs)


# ------------------------------ BiRNN forward ------------------------------ #

def birnn_forward(params, inputs):
    """inputs: (batch, seq_len) int32 -> logits (batch, 2)."""
    # TODO(synk): nn.Embedding gather has no clean Pallas equivalent at this
    # size; done with jnp.take (time-major, like PyTorch's permute(1, 0)).
    emb = jnp.take(params["embedding"], inputs.T, axis=0)       # (T, B, E) f32
    x = emb.astype(jnp.bfloat16)
    n_layers = len(params["lstm"])
    logits = None
    for li, layer in enumerate(params["lstm"]):
        if li == n_layers - 1:
            x, logits = _bilstm_layer(
                x, layer, decoder=(params["dec_w_t"], params["dec_b"]))
        else:
            x = _bilstm_layer(x, layer)
    return logits


# -------------------------- pure-JAX reference ------------------------------ #
# Mirrors the kernel's precision policy (bf16 matmul operands, f32 accumulation,
# f32 state/nonlinearities, bf16 layer outputs).

def _lstm_dir_ref(x_bf16, wih_t, whh_t, b):
    T, B, _ = x_bf16.shape
    H = whh_t.shape[0]

    def step(carry, xt):
        h, c = carry
        g = (jnp.dot(xt, wih_t, preferred_element_type=jnp.float32)
             + jnp.dot(h.astype(jnp.bfloat16), whh_t,
                       preferred_element_type=jnp.float32)
             + b)
        i = jax.nn.sigmoid(g[:, :H])
        f = jax.nn.sigmoid(g[:, H:2 * H])
        gg = jnp.tanh(g[:, 2 * H:3 * H])
        o = jax.nn.sigmoid(g[:, 3 * H:])
        c = f * c + i * gg
        h = o * jnp.tanh(c)
        return (h, c), h.astype(jnp.bfloat16)

    init = (jnp.zeros((B, H), jnp.float32), jnp.zeros((B, H), jnp.float32))
    _, hs = jax.lax.scan(step, init, x_bf16)
    return hs


def birnn_forward_ref(params, inputs):
    x = jnp.take(params["embedding"], inputs.T, axis=0).astype(jnp.bfloat16)
    for layer in params["lstm"]:
        fwd = _lstm_dir_ref(x, layer["wih_f"], layer["whh_f"], layer["b_f"])
        bwd = _lstm_dir_ref(x[::-1], layer["wih_b"], layer["whh_b"],
                            layer["b_b"])[::-1]
        x = jnp.concatenate([fwd, bwd], axis=-1)
    enc = jnp.concatenate([x[0], x[-1]], axis=-1)
    return (jnp.dot(enc, params["dec_w_t"], preferred_element_type=jnp.float32)
            + params["dec_b"])


# --------------------------------- setup ----------------------------------- #

def init_params(key, vocab_size, embed_size, num_hiddens, num_layers):
    ks = jax.random.split(key, 1 + 8 * num_layers + 2)
    k_iter = iter(ks)
    scale = 1.0 / np.sqrt(num_hiddens)
    params = {
        "embedding": jax.random.normal(next(k_iter),
                                       (vocab_size, embed_size), jnp.float32) * 0.1,
        "lstm": [],
    }
    d_in = embed_size
    for _ in range(num_layers):
        layer = {}
        for d in ("f", "b"):
            w_ih = jax.random.uniform(next(k_iter), (4 * num_hiddens, d_in),
                                      jnp.float32, -scale, scale)
            w_hh = jax.random.uniform(next(k_iter), (4 * num_hiddens, num_hiddens),
                                      jnp.float32, -scale, scale)
            b_ih = jax.random.uniform(next(k_iter), (4 * num_hiddens,),
                                      jnp.float32, -scale, scale)
            b_hh = jax.random.uniform(next(k_iter), (4 * num_hiddens,),
                                      jnp.float32, -scale, scale)
            layer["wih_" + d] = w_ih.T.astype(jnp.bfloat16)   # (d_in, 4H) bf16
            layer["whh_" + d] = w_hh.T.astype(jnp.bfloat16)   # (H, 4H) bf16
            layer["b_" + d] = (b_ih + b_hh)[None, :]          # (1, 4H) f32
        params["lstm"].append(layer)
        d_in = 2 * num_hiddens
    dec_w = jax.random.uniform(next(k_iter), (2, 4 * num_hiddens),
                               jnp.float32, -scale, scale)
    dec_b = jax.random.uniform(next(k_iter), (2,), jnp.float32, -scale, scale)
    params["dec_w_t"] = dec_w.T.astype(jnp.bfloat16)          # (4H, 2) bf16
    params["dec_b"] = dec_b[None, :]                          # (1, 2) f32
    return params


if __name__ == "__main__":
    vocab_size, embed_size, num_hiddens, num_layers = 50, 32, 32, 2
    batch, seq_len = 2, 8

    key = jax.random.PRNGKey(0)
    k_param, k_inp = jax.random.split(key)
    params = init_params(k_param, vocab_size, embed_size, num_hiddens, num_layers)
    inputs = jax.random.randint(k_inp, (batch, seq_len), 0, vocab_size, jnp.int32)

    out = jax.jit(birnn_forward)(params, inputs)
    out = jax.block_until_ready(out)
    assert out.shape == (batch, 2), out.shape

    ref = jax.block_until_ready(birnn_forward_ref(params, inputs))
    np.testing.assert_allclose(np.asarray(out), np.asarray(ref),
                               rtol=2e-2, atol=2e-2)
    print("KERNEL_OK")
</pallas_src>

<mosaic_0001>
module attributes {stable_mosaic.version = 11 : i64} {
  func.func @kernel(%arg0: memref<8x2x128xf32, #tpu.memory_space<vmem>>, %arg1: memref<8x2x128xf32, #tpu.memory_space<vmem>>, %arg2: memref<32x128xbf16, #tpu.memory_space<vmem>>, %arg3: memref<32x128xbf16, #tpu.memory_space<vmem>>, %arg4: memref<8x2x64xbf16, #tpu.memory_space<vmem>>, %arg5: memref<2x32xf32, #tpu.memory_space<vmem>>, %arg6: memref<2x32xf32, #tpu.memory_space<vmem>>, %arg7: memref<2x32xf32, #tpu.memory_space<vmem>>, %arg8: memref<2x32xf32, #tpu.memory_space<vmem>>) attributes {dimension_semantics = [], scalar_prefetch = 0 : i64, scratch_operands = 4 : i64, tpu.core_type = #tpu.core_type<tc>} {
    %cst = arith.constant 0.000000e+00 : f32
    %0 = vector.broadcast %cst : f32 to vector<2x32xf32>
    %c0 = arith.constant 0 : index
    %c0_0 = arith.constant 0 : index
    %1 = vector.load %arg5[%c0, %c0_0] : memref<2x32xf32, #tpu.memory_space<vmem>>, vector<2x32xf32>
    tpu.vector_store %arg5[%c0, %c0_0], %0 {strides = array<i32>} : memref<2x32xf32, #tpu.memory_space<vmem>>, vector<2x32xf32>,
    %cst_1 = arith.constant 0.000000e+00 : f32
    %2 = vector.broadcast %cst_1 : f32 to vector<2x32xf32>
    %c0_2 = arith.constant 0 : index
    %c0_3 = arith.constant 0 : index
    %3 = vector.load %arg6[%c0_2, %c0_3] : memref<2x32xf32, #tpu.memory_space<vmem>>, vector<2x32xf32>
    tpu.vector_store %arg6[%c0_2, %c0_3], %2 {strides = array<i32>} : memref<2x32xf32, #tpu.memory_space<vmem>>, vector<2x32xf32>,
    %cst_4 = arith.constant 0.000000e+00 : f32
    %4 = vector.broadcast %cst_4 : f32 to vector<2x32xf32>
    %c0_5 = arith.constant 0 : index
    %c0_6 = arith.constant 0 : index
    %5 = vector.load %arg7[%c0_5, %c0_6] : memref<2x32xf32, #tpu.memory_space<vmem>>, vector<2x32xf32>
    tpu.vector_store %arg7[%c0_5, %c0_6], %4 {strides = array<i32>} : memref<2x32xf32, #tpu.memory_space<vmem>>, vector<2x32xf32>,
    %cst_7 = arith.constant 0.000000e+00 : f32
    %6 = vector.broadcast %cst_7 : f32 to vector<2x32xf32>
    %c0_8 = arith.constant 0 : index
    %c0_9 = arith.constant 0 : index
    %7 = vector.load %arg8[%c0_8, %c0_9] : memref<2x32xf32, #tpu.memory_space<vmem>>, vector<2x32xf32>
    tpu.vector_store %arg8[%c0_8, %c0_9], %6 {strides = array<i32>} : memref<2x32xf32, #tpu.memory_space<vmem>>, vector<2x32xf32>,
    %c0_10 = arith.constant 0 : index
    %c0_11 = arith.constant 0 : index
    %8 = vector.load %arg2[%c0_10, %c0_11] : memref<32x128xbf16, #tpu.memory_space<vmem>>, vector<32x128xbf16>
    %c0_12 = arith.constant 0 : index
    %c0_13 = arith.constant 0 : index
    %9 = vector.load %arg3[%c0_12, %c0_13] : memref<32x128xbf16, #tpu.memory_space<vmem>>, vector<32x128xbf16>
    %c0_i32 = arith.constant 0 : i32
    %10 = arith.index_cast %c0_i32 : i32 to index
    %c0_14 = arith.constant 0 : index
    %c0_15 = arith.constant 0 : index
    %11 = vector.load %arg0[%10, %c0_14, %c0_15] : memref<8x2x128xf32, #tpu.memory_space<vmem>>, vector<1x2x128xf32>
    %12 = vector.shape_cast %11 : vector<1x2x128xf32> to vector<2x128xf32>
    %c0_16 = arith.constant 0 : index
    %c0_17 = arith.constant 0 : index
    %13 = vector.load %arg5[%c0_16, %c0_17] : memref<2x32xf32, #tpu.memory_space<vmem>>, vector<2x32xf32>
    %14 = arith.truncf %13 : vector<2x32xf32> to vector<2x32xbf16>
    %cst_18 = arith.constant dense<0.000000e+00> : vector<2x128xf32>
    %15 = tpu.matmul %14, %8, %cst_18 {dimension_numbers = #tpu.dot_dimension_numbers<[1], [0], [0], [1], [0, 0, 1, 1], [], []>} : vector<2x32xbf16>, vector<32x128xbf16>, vector<2x128xf32> -> vector<2x128xf32>
    %16 = arith.addf %12, %15 : vector<2x128xf32>
    %c0_19 = arith.constant 0 : index
    %c0_20 = arith.constant 0 : index
    %17 = vector.load %arg6[%c0_19, %c0_20] : memref<2x32xf32, #tpu.memory_space<vmem>>, vector<2x32xf32>
    %18 = vector.extract_strided_slice %16 {offsets = [0, 0], sizes = [2, 32], strides = [1, 1]} : vector<2x128xf32> to vector<2x32xf32>
    %19 = arith.negf %18 : vector<2x32xf32>
    %20 = math.exp %19 : vector<2x32xf32>
    %cst_21 = arith.constant 1.000000e+00 : f32
    %21 = vector.broadcast %cst_21 : f32 to vector<2x32xf32>
    %22 = arith.addf %21, %20 : vector<2x32xf32>
    %23 = arith.divf %21, %22 : vector<2x32xf32>
    %24 = vector.extract_strided_slice %16 {offsets = [0, 32], sizes = [2, 32], strides = [1, 1]} : vector<2x128xf32> to vector<2x32xf32>
    %25 = arith.negf %24 : vector<2x32xf32>
    %26 = math.exp %25 : vector<2x32xf32>
    %cst_22 = arith.constant 1.000000e+00 : f32
    %27 = vector.broadcast %cst_22 : f32 to vector<2x32xf32>
    %28 = arith.addf %27, %26 : vector<2x32xf32>
    %29 = arith.divf %27, %28 : vector<2x32xf32>
    %30 = vector.extract_strided_slice %16 {offsets = [0, 64], sizes = [2, 32], strides = [1, 1]} : vector<2x128xf32> to vector<2x32xf32>
    %31 = math.tanh %30 : vector<2x32xf32>
    %32 = vector.extract_strided_slice %16 {offsets = [0, 96], sizes = [2, 32], strides = [1, 1]} : vector<2x128xf32> to vector<2x32xf32>
    %33 = arith.negf %32 : vector<2x32xf32>
    %34 = math.exp %33 : vector<2x32xf32>
    %cst_23 = arith.constant 1.000000e+00 : f32
    %35 = vector.broadcast %cst_23 : f32 to vector<2x32xf32>
    %36 = arith.addf %35, %34 : vector<2x32xf32>
    %37 = arith.divf %35, %36 : vector<2x32xf32>
    %38 = arith.mulf %29, %17 : vector<2x32xf32>
    %39 = arith.mulf %23, %31 : vector<2x32xf32>
    %40 = arith.addf %38, %39 : vector<2x32xf32>
    %41 = math.tanh %40 : vector<2x32xf32>
    %42 = arith.mulf %37, %41 : vector<2x32xf32>
    %c0_24 = arith.constant 0 : index
    %c0_25 = arith.constant 0 : index
    %43 = vector.load %arg5[%c0_24, %c0_25] : memref<2x32xf32, #tpu.memory_space<vmem>>, vector<2x32xf32>
    tpu.vector_store %arg5[%c0_24, %c0_25], %42 {strides = array<i32>} : memref<2x32xf32, #tpu.memory_space<vmem>>, vector<2x32xf32>,
    %c0_26 = arith.constant 0 : index
    %c0_27 = arith.constant 0 : index
    %44 = vector.load %arg6[%c0_26, %c0_27] : memref<2x32xf32, #tpu.memory_space<vmem>>, vector<2x32xf32>
    tpu.vector_store %arg6[%c0_26, %c0_27], %40 {strides = array<i32>} : memref<2x32xf32, #tpu.memory_space<vmem>>, vector<2x32xf32>,
    %45 = arith.truncf %42 : vector<2x32xf32> to vector<2x32xbf16>
    %46 = arith.index_cast %c0_i32 : i32 to index
    %c0_28 = arith.constant 0 : index
    %c0_29 = arith.constant 0 : index
    %47 = vector.load %arg4[%46, %c0_28, %c0_29] : memref<8x2x64xbf16, #tpu.memory_space<vmem>>, vector<1x2x32xbf16>
    %48 = vector.shape_cast %47 : vector<1x2x32xbf16> to vector<2x32xbf16>
    %49 = vector.shape_cast %45 : vector<2x32xbf16> to vector<1x2x32xbf16>
    tpu.vector_store %arg4[%46, %c0_28, %c0_29], %49 {strides = array<i32>} : memref<8x2x64xbf16, #tpu.memory_space<vmem>>, vector<1x2x32xbf16>,
    %c7_i32 = arith.constant 7 : i32
    %50 = arith.subi %c7_i32, %c0_i32 : i32
    %51 = arith.index_cast %50 : i32 to index
    %c0_30 = arith.constant 0 : index
    %c0_31 = arith.constant 0 : index
    %52 = vector.load %arg1[%51, %c0_30, %c0_31] : memref<8x2x128xf32, #tpu.memory_space<vmem>>, vector<1x2x128xf32>
    %53 = vector.shape_cast %52 : vector<1x2x128xf32> to vector<2x128xf32>
    %c0_32 = arith.constant 0 : index
    %c0_33 = arith.constant 0 : index
    %54 = vector.load %arg7[%c0_32, %c0_33] : memref<2x32xf32, #tpu.memory_space<vmem>>, vector<2x32xf32>
    %55 = arith.truncf %54 : vector<2x32xf32> to vector<2x32xbf16>
    %cst_34 = arith.constant dense<0.000000e+00> : vector<2x128xf32>
    %56 = tpu.matmul %55, %9, %cst_34 {dimension_numbers = #tpu.dot_dimension_numbers<[1], [0], [0], [1], [0, 0, 1, 1], [], []>} : vector<2x32xbf16>, vector<32x128xbf16>, vector<2x128xf32> -> vector<2x128xf32>
    %57 = arith.addf %53, %56 : vector<2x128xf32>
    %c0_35 = arith.constant 0 : index
    %c0_36 = arith.constant 0 : index
    %58 = vector.load %arg8[%c0_35, %c0_36] : memref<2x32xf32, #tpu.memory_space<vmem>>, vector<2x32xf32>
    %59 = vector.extract_strided_slice %57 {offsets = [0, 0], sizes = [2, 32], strides = [1, 1]} : vector<2x128xf32> to vector<2x32xf32>
    %60 = arith.negf %59 : vector<2x32xf32>
    %61 = math.exp %60 : vector<2x32xf32>
    %cst_37 = arith.constant 1.000000e+00 : f32
    %62 = vector.broadcast %cst_37 : f32 to vector<2x32xf32>
    %63 = arith.addf %62, %61 : vector<2x32xf32>
    %64 = arith.divf %62, %63 : vector<2x32xf32>
    %65 = vector.extract_strided_slice %57 {offsets = [0, 32], sizes = [2, 32], strides = [1, 1]} : vector<2x128xf32> to vector<2x32xf32>
    %66 = arith.negf %65 : vector<2x32xf32>
    %67 = math.exp %66 : vector<2x32xf32>
    %cst_38 = arith.constant 1.000000e+00 : f32
    %68 = vector.broadcast %cst_38 : f32 to vector<2x32xf32>
    %69 = arith.addf %68, %67 : vector<2x32xf32>
    %70 = arith.divf %68, %69 : vector<2x32xf32>
    %71 = vector.extract_strided_slice %57 {offsets = [0, 64], sizes = [2, 32], strides = [1, 1]} : vector<2x128xf32> to vector<2x32xf32>
    %72 = math.tanh %71 : vector<2x32xf32>
    %73 = vector.extract_strided_slice %57 {offsets = [0, 96], sizes = [2, 32], strides = [1, 1]} : vector<2x128xf32> to vector<2x32xf32>
    %74 = arith.negf %73 : vector<2x32xf32>
    %75 = math.exp %74 : vector<2x32xf32>
    %cst_39 = arith.constant 1.000000e+00 : f32
    %76 = vector.broadcast %cst_39 : f32 to vector<2x32xf32>
    %77 = arith.addf %76, %75 : vector<2x32xf32>
    %78 = arith.divf %76, %77 : vector<2x32xf32>
    %79 = arith.mulf %70, %58 : vector<2x32xf32>
    %80 = arith.mulf %64, %72 : vector<2x32xf32>
    %81 = arith.addf %79, %80 : vector<2x32xf32>
    %82 = math.tanh %81 : vector<2x32xf32>
    %83 = arith.mulf %78, %82 : vector<2x32xf32>
    %c0_40 = arith.constant 0 : index
    %c0_41 = arith.constant 0 : index
    %84 = vector.load %arg7[%c0_40, %c0_41] : memref<2x32xf32, #tpu.memory_space<vmem>>, vector<2x32xf32>
    tpu.vector_store %arg7[%c0_40, %c0_41], %83 {strides = array<i32>} : memref<2x32xf32, #tpu.memory_space<vmem>>, vector<2x32xf32>,
    %c0_42 = arith.constant 0 : index
    %c0_43 = arith.constant 0 : index
    %85 = vector.load %arg8[%c0_42, %c0_43] : memref<2x32xf32, #tpu.memory_space<vmem>>, vector<2x32xf32>
    tpu.vector_store %arg8[%c0_42, %c0_43], %81 {strides = array<i32>} : memref<2x32xf32, #tpu.memory_space<vmem>>, vector<2x32xf32>,
    %86 = arith.truncf %83 : vector<2x32xf32> to vector<2x32xbf16>
    %87 = arith.index_cast %50 : i32 to index
    %c0_44 = arith.constant 0 : index
    %c32 = arith.constant 32 : index
    %88 = vector.load %arg4[%87, %c0_44, %c32] : memref<8x2x64xbf16, #tpu.memory_space<vmem>>, vector<1x2x32xbf16>
    %89 = vector.shape_cast %88 : vector<1x2x32xbf16> to vector<2x32xbf16>
    %90 = vector.shape_cast %86 : vector<2x32xbf16> to vector<1x2x32xbf16>
    tpu.vector_store %arg4[%87, %c0_44, %c32], %90 {strides = array<i32>} : memref<8x2x64xbf16, #tpu.memory_space<vmem>>, vector<1x2x32xbf16>,
    %c1_i32 = arith.constant 1 : i32
    %91 = arith.index_cast %c1_i32 : i32 to index
    %c0_45 = arith.constant 0 : index
    %c0_46 = arith.constant 0 : index
    %92 = vector.load %arg0[%91, %c0_45, %c0_46] : memref<8x2x128xf32, #tpu.memory_space<vmem>>, vector<1x2x128xf32>
    %93 = vector.shape_cast %92 : vector<1x2x128xf32> to vector<2x128xf32>
    %c0_47 = arith.constant 0 : index
    %c0_48 = arith.constant 0 : index
    %94 = vector.load %arg5[%c0_47, %c0_48] : memref<2x32xf32, #tpu.memory_space<vmem>>, vector<2x32xf32>
    %95 = arith.truncf %94 : vector<2x32xf32> to vector<2x32xbf16>
    %cst_49 = arith.constant dense<0.000000e+00> : vector<2x128xf32>
    %96 = tpu.matmul %95, %8, %cst_49 {dimension_numbers = #tpu.dot_dimension_numbers<[1], [0], [0], [1], [0, 0, 1, 1], [], []>} : vector<2x32xbf16>, vector<32x128xbf16>, vector<2x128xf32> -> vector<2x128xf32>
    %97 = arith.addf %93, %96 : vector<2x128xf32>
    %c0_50 = arith.constant 0 : index
    %c0_51 = arith.constant 0 : index
    %98 = vector.load %arg6[%c0_50, %c0_51] : memref<2x32xf32, #tpu.memory_space<vmem>>, vector<2x32xf32>
    %99 = vector.extract_strided_slice %97 {offsets = [0, 0], sizes = [2, 32], strides = [1, 1]} : vector<2x128xf32> to vector<2x32xf32>
    %100 = arith.negf %99 : vector<2x32xf32>
    %101 = math.exp %100 : vector<2x32xf32>
    %cst_52 = arith.constant 1.000000e+00 : f32
    %102 = vector.broadcast %cst_52 : f32 to vector<2x32xf32>
    %103 = arith.addf %102, %101 : vector<2x32xf32>
    %104 = arith.divf %102, %103 : vector<2x32xf32>
    %105 = vector.extract_strided_slice %97 {offsets = [0, 32], sizes = [2, 32], strides = [1, 1]} : vector<2x128xf32> to vector<2x32xf32>
    %106 = arith.negf %105 : vector<2x32xf32>
    %107 = math.exp %106 : vector<2x32xf32>
    %cst_53 = arith.constant 1.000000e+00 : f32
    %108 = vector.broadcast %cst_53 : f32 to vector<2x32xf32>
    %109 = arith.addf %108, %107 : vector<2x32xf32>
    %110 = arith.divf %108, %109 : vector<2x32xf32>
    %111 = vector.extract_strided_slice %97 {offsets = [0, 64], sizes = [2, 32], strides = [1, 1]} : vector<2x128xf32> to vector<2x32xf32>
    %112 = math.tanh %111 : vector<2x32xf32>
    %113 = vector.extract_strided_slice %97 {offsets = [0, 96], sizes = [2, 32], strides = [1, 1]} : vector<2x128xf32> to vector<2x32xf32>
    %114 = arith.negf %113 : vector<2x32xf32>
    %115 = math.exp %114 : vector<2x32xf32>
    %cst_54 = arith.constant 1.000000e+00 : f32
    %116 = vector.broadcast %cst_54 : f32 to vector<2x32xf32>
    %117 = arith.addf %116, %115 : vector<2x32xf32>
    %118 = arith.divf %116, %117 : vector<2x32xf32>
    %119 = arith.mulf %110, %98 : vector<2x32xf32>
    %120 = arith.mulf %104, %112 : vector<2x32xf32>
    %121 = arith.addf %119, %120 : vector<2x32xf32>
    %122 = math.tanh %121 : vector<2x32xf32>
    %123 = arith.mulf %118, %122 : vector<2x32xf32>
    %c0_55 = arith.constant 0 : index
    %c0_56 = arith.constant 0 : index
    %124 = vector.load %arg5[%c0_55, %c0_56] : memref<2x32xf32, #tpu.memory_space<vmem>>, vector<2x32xf32>
    tpu.vector_store %arg5[%c0_55, %c0_56], %123 {strides = array<i32>} : memref<2x32xf32, #tpu.memory_space<vmem>>, vector<2x32xf32>,
    %c0_57 = arith.constant 0 : index
    %c0_58 = arith.constant 0 : index
    %125 = vector.load %arg6[%c0_57, %c0_58] : memref<2x32xf32, #tpu.memory_space<vmem>>, vector<2x32xf32>
    tpu.vector_store %arg6[%c0_57, %c0_58], %121 {strides = array<i32>} : memref<2x32xf32, #tpu.memory_space<vmem>>, vector<2x32xf32>,
    %126 = arith.truncf %123 : vector<2x32xf32> to vector<2x32xbf16>
    %127 = arith.index_cast %c1_i32 : i32 to index
    %c0_59 = arith.constant 0 : index
    %c0_60 = arith.constant 0 : index
    %128 = vector.load %arg4[%127, %c0_59, %c0_60] : memref<8x2x64xbf16, #tpu.memory_space<vmem>>, vector<1x2x32xbf16>
    %129 = vector.shape_cast %128 : vector<1x2x32xbf16> to vector<2x32xbf16>
    %130 = vector.shape_cast %126 : vector<2x32xbf16> to vector<1x2x32xbf16>
    tpu.vector_store %arg4[%127, %c0_59, %c0_60], %130 {strides = array<i32>} : memref<8x2x64xbf16, #tpu.memory_space<vmem>>, vector<1x2x32xbf16>,
    %c7_i32_61 = arith.constant 7 : i32
    %131 = arith.subi %c7_i32_61, %c1_i32 : i32
    %132 = arith.index_cast %131 : i32 to index
    %c0_62 = arith.constant 0 : index
    %c0_63 = arith.constant 0 : index
    %133 = vector.load %arg1[%132, %c0_62, %c0_63] : memref<8x2x128xf32, #tpu.memory_space<vmem>>, vector<1x2x128xf32>
    %134 = vector.shape_cast %133 : vector<1x2x128xf32> to vector<2x128xf32>
    %c0_64 = arith.constant 0 : index
    %c0_65 = arith.constant 0 : index
    %135 = vector.load %arg7[%c0_64, %c0_65] : memref<2x32xf32, #tpu.memory_space<vmem>>, vector<2x32xf32>
    %136 = arith.truncf %135 : vector<2x32xf32> to vector<2x32xbf16>
    %cst_66 = arith.constant dense<0.000000e+00> : vector<2x128xf32>
    %137 = tpu.matmul %136, %9, %cst_66 {dimension_numbers = #tpu.dot_dimension_numbers<[1], [0], [0], [1], [0, 0, 1, 1], [], []>} : vector<2x32xbf16>, vector<32x128xbf16>, vector<2x128xf32> -> vector<2x128xf32>
    %138 = arith.addf %134, %137 : vector<2x128xf32>
    %c0_67 = arith.constant 0 : index
    %c0_68 = arith.constant 0 : index
    %139 = vector.load %arg8[%c0_67, %c0_68] : memref<2x32xf32, #tpu.memory_space<vmem>>, vector<2x32xf32>
    %140 = vector.extract_strided_slice %138 {offsets = [0, 0], sizes = [2, 32], strides = [1, 1]} : vector<2x128xf32> to vector<2x32xf32>
    %141 = arith.negf %140 : vector<2x32xf32>
    %142 = math.exp %141 : vector<2x32xf32>
    %cst_69 = arith.constant 1.000000e+00 : f32
    %143 = vector.broadcast %cst_69 : f32 to vector<2x32xf32>
    %144 = arith.addf %143, %142 : vector<2x32xf32>
    %145 = arith.divf %143, %144 : vector<2x32xf32>
    %146 = vector.extract_strided_slice %138 {offsets = [0, 32], sizes = [2, 32], strides = [1, 1]} : vector<2x128xf32> to vector<2x32xf32>
    %147 = arith.negf %146 : vector<2x32xf32>
    %148 = math.exp %147 : vector<2x32xf32>
    %cst_70 = arith.constant 1.000000e+00 : f32
    %149 = vector.broadcast %cst_70 : f32 to vector<2x32xf32>
    %150 = arith.addf %149, %148 : vector<2x32xf32>
    %151 = arith.divf %149, %150 : vector<2x32xf32>
    %152 = vector.extract_strided_slice %138 {offsets = [0, 64], sizes = [2, 32], strides = [1, 1]} : vector<2x128xf32> to vector<2x32xf32>
    %153 = math.tanh %152 : vector<2x32xf32>
    %154 = vector.extract_strided_slice %138 {offsets = [0, 96], sizes = [2, 32], strides = [1, 1]} : vector<2x128xf32> to vector<2x32xf32>
    %155 = arith.negf %154 : vector<2x32xf32>
    %156 = math.exp %155 : vector<2x32xf32>
    %cst_71 = arith.constant 1.000000e+00 : f32
    %157 = vector.broadcast %cst_71 : f32 to vector<2x32xf32>
    %158 = arith.addf %157, %156 : vector<2x32xf32>
    %159 = arith.divf %157, %158 : vector<2x32xf32>
    %160 = arith.mulf %151, %139 : vector<2x32xf32>
    %161 = arith.mulf %145, %153 : vector<2x32xf32>
    %162 = arith.addf %160, %161 : vector<2x32xf32>
    %163 = math.tanh %162 : vector<2x32xf32>
    %164 = arith.mulf %159, %163 : vector<2x32xf32>
    %c0_72 = arith.constant 0 : index
    %c0_73 = arith.constant 0 : index
    %165 = vector.load %arg7[%c0_72, %c0_73] : memref<2x32xf32, #tpu.memory_space<vmem>>, vector<2x32xf32>
    tpu.vector_store %arg7[%c0_72, %c0_73], %164 {strides = array<i32>} : memref<2x32xf32, #tpu.memory_space<vmem>>, vector<2x32xf32>,
    %c0_74 = arith.constant 0 : index
    %c0_75 = arith.constant 0 : index
    %166 = vector.load %arg8[%c0_74, %c0_75] : memref<2x32xf32, #tpu.memory_space<vmem>>, vector<2x32xf32>
    tpu.vector_store %arg8[%c0_74, %c0_75], %162 {strides = array<i32>} : memref<2x32xf32, #tpu.memory_space<vmem>>, vector<2x32xf32>,
    %167 = arith.truncf %164 : vector<2x32xf32> to vector<2x32xbf16>
    %168 = arith.index_cast %131 : i32 to index
    %c0_76 = arith.constant 0 : index
    %c32_77 = arith.constant 32 : index
    %169 = vector.load %arg4[%168, %c0_76, %c32_77] : memref<8x2x64xbf16, #tpu.memory_space<vmem>>, vector<1x2x32xbf16>
    %170 = vector.shape_cast %169 : vector<1x2x32xbf16> to vector<2x32xbf16>
    %171 = vector.shape_cast %167 : vector<2x32xbf16> to vector<1x2x32xbf16>
    tpu.vector_store %arg4[%168, %c0_76, %c32_77], %171 {strides = array<i32>} : memref<8x2x64xbf16, #tpu.memory_space<vmem>>, vector<1x2x32xbf16>,
    %c2_i32 = arith.constant 2 : i32
    %172 = arith.index_cast %c2_i32 : i32 to index
    %c0_78 = arith.constant 0 : index
    %c0_79 = arith.constant 0 : index
    %173 = vector.load %arg0[%172, %c0_78, %c0_79] : memref<8x2x128xf32, #tpu.memory_space<vmem>>, vector<1x2x128xf32>
    %174 = vector.shape_cast %173 : vector<1x2x128xf32> to vector<2x128xf32>
    %c0_80 = arith.constant 0 : index
    %c0_81 = arith.constant 0 : index
    %175 = vector.load %arg5[%c0_80, %c0_81] : memref<2x32xf32, #tpu.memory_space<vmem>>, vector<2x32xf32>
    %176 = arith.truncf %175 : vector<2x32xf32> to vector<2x32xbf16>
    %cst_82 = arith.constant dense<0.000000e+00> : vector<2x128xf32>
    %177 = tpu.matmul %176, %8, %cst_82 {dimension_numbers = #tpu.dot_dimension_numbers<[1], [0], [0], [1], [0, 0, 1, 1], [], []>} : vector<2x32xbf16>, vector<32x128xbf16>, vector<2x128xf32> -> vector<2x128xf32>
    %178 = arith.addf %174, %177 : vector<2x128xf32>
    %c0_83 = arith.constant 0 : index
    %c0_84 = arith.constant 0 : index
    %179 = vector.load %arg6[%c0_83, %c0_84] : memref<2x32xf32, #tpu.memory_space<vmem>>, vector<2x32xf32>
    %180 = vector.extract_strided_slice %178 {offsets = [0, 0], sizes = [2, 32], strides = [1, 1]} : vector<2x128xf32> to vector<2x32xf32>
    %181 = arith.negf %180 : vector<2x32xf32>
    %182 = math.exp %181 : vector<2x32xf32>
    %cst_85 = arith.constant 1.000000e+00 : f32
    %183 = vector.broadcast %cst_85 : f32 to vector<2x32xf32>
    %184 = arith.addf %183, %182 : vector<2x32xf32>
    %185 = arith.divf %183, %184 : vector<2x32xf32>
    %186 = vector.extract_strided_slice %178 {offsets = [0, 32], sizes = [2, 32], strides = [1, 1]} : vector<2x128xf32> to vector<2x32xf32>
    %187 = arith.negf %186 : vector<2x32xf32>
    %188 = math.exp %187 : vector<2x32xf32>
    %cst_86 = arith.constant 1.000000e+00 : f32
    %189 = vector.broadcast %cst_86 : f32 to vector<2x32xf32>
    %190 = arith.addf %189, %188 : vector<2x32xf32>
    %191 = arith.divf %189, %190 : vector<2x32xf32>
    %192 = vector.extract_strided_slice %178 {offsets = [0, 64], sizes = [2, 32], strides = [1, 1]} : vector<2x128xf32> to vector<2x32xf32>
    %193 = math.tanh %192 : vector<2x32xf32>
    %194 = vector.extract_strided_slice %178 {offsets = [0, 96], sizes = [2, 32], strides = [1, 1]} : vector<2x128xf32> to vector<2x32xf32>
    %195 = arith.negf %194 : vector<2x32xf32>
    %196 = math.exp %195 : vector<2x32xf32>
    %cst_87 = arith.constant 1.000000e+00 : f32
    %197 = vector.broadcast %cst_87 : f32 to vector<2x32xf32>
    %198 = arith.addf %197, %196 : vector<2x32xf32>
    %199 = arith.divf %197, %198 : vector<2x32xf32>
    %200 = arith.mulf %191, %179 : vector<2x32xf32>
    %201 = arith.mulf %185, %193 : vector<2x32xf32>
    %202 = arith.addf %200, %201 : vector<2x32xf32>
    %203 = math.tanh %202 : vector<2x32xf32>
    %204 = arith.mulf %199, %203 : vector<2x32xf32>
    %c0_88 = arith.constant 0 : index
    %c0_89 = arith.constant 0 : index
    %205 = vector.load %arg5[%c0_88, %c0_89] : memref<2x32xf32, #tpu.memory_space<vmem>>, vector<2x32xf32>
    tpu.vector_store %arg5[%c0_88, %c0_89], %204 {strides = array<i32>} : memref<2x32xf32, #tpu.memory_space<vmem>>, vector<2x32xf32>,
    %c0_90 = arith.constant 0 : index
    %c0_91 = arith.constant 0 : index
    %206 = vector.load %arg6[%c0_90, %c0_91] : memref<2x32xf32, #tpu.memory_space<vmem>>, vector<2x32xf32>
    tpu.vector_store %arg6[%c0_90, %c0_91], %202 {strides = array<i32>} : memref<2x32xf32, #tpu.memory_space<vmem>>, vector<2x32xf32>,
    %207 = arith.truncf %204 : vector<2x32xf32> to vector<2x32xbf16>
    %208 = arith.index_cast %c2_i32 : i32 to index
    %c0_92 = arith.constant 0 : index
    %c0_93 = arith.constant 0 : index
    %209 = vector.load %arg4[%208, %c0_92, %c0_93] : memref<8x2x64xbf16, #tpu.memory_space<vmem>>, vector<1x2x32xbf16>
    %210 = vector.shape_cast %209 : vector<1x2x32xbf16> to vector<2x32xbf16>
    %211 = vector.shape_cast %207 : vector<2x32xbf16> to vector<1x2x32xbf16>
    tpu.vector_store %arg4[%208, %c0_92, %c0_93], %211 {strides = array<i32>} : memref<8x2x64xbf16, #tpu.memory_space<vmem>>, vector<1x2x32xbf16>,
    %c7_i32_94 = arith.constant 7 : i32
    %212 = arith.subi %c7_i32_94, %c2_i32 : i32
    %213 = arith.index_cast %212 : i32 to index
    %c0_95 = arith.constant 0 : index
    %c0_96 = arith.constant 0 : index
    %214 = vector.load %arg1[%213, %c0_95, %c0_96] : memref<8x2x128xf32, #tpu.memory_space<vmem>>, vector<1x2x128xf32>
    %215 = vector.shape_cast %214 : vector<1x2x128xf32> to vector<2x128xf32>
    %c0_97 = arith.constant 0 : index
    %c0_98 = arith.constant 0 : index
    %216 = vector.load %arg7[%c0_97, %c0_98] : memref<2x32xf32, #tpu.memory_space<vmem>>, vector<2x32xf32>
    %217 = arith.truncf %216 : vector<2x32xf32> to vector<2x32xbf16>
    %cst_99 = arith.constant dense<0.000000e+00> : vector<2x128xf32>
    %218 = tpu.matmul %217, %9, %cst_99 {dimension_numbers = #tpu.dot_dimension_numbers<[1], [0], [0], [1], [0, 0, 1, 1], [], []>} : vector<2x32xbf16>, vector<32x128xbf16>, vector<2x128xf32> -> vector<2x128xf32>
    %219 = arith.addf %215, %218 : vector<2x128xf32>
    %c0_100 = arith.constant 0 : index
    %c0_101 = arith.constant 0 : index
    %220 = vector.load %arg8[%c0_100, %c0_101] : memref<2x32xf32, #tpu.memory_space<vmem>>, vector<2x32xf32>
    %221 = vector.extract_strided_slice %219 {offsets = [0, 0], sizes = [2, 32], strides = [1, 1]} : vector<2x128xf32> to vector<2x32xf32>
    %222 = arith.negf %221 : vector<2x32xf32>
    %223 = math.exp %222 : vector<2x32xf32>
    %cst_102 = arith.constant 1.000000e+00 : f32
    %224 = vector.broadcast %cst_102 : f32 to vector<2x32xf32>
    %225 = arith.addf %224, %223 : vector<2x32xf32>
    %226 = arith.divf %224, %225 : vector<2x32xf32>
    %227 = vector.extract_strided_slice %219 {offsets = [0, 32], sizes = [2, 32], strides = [1, 1]} : vector<2x128xf32> to vector<2x32xf32>
    %228 = arith.negf %227 : vector<2x32xf32>
    %229 = math.exp %228 : vector<2x32xf32>
    %cst_103 = arith.constant 1.000000e+00 : f32
    %230 = vector.broadcast %cst_103 : f32 to vector<2x32xf32>
    %231 = arith.addf %230, %229 : vector<2x32xf32>
    %232 = arith.divf %230, %231 : vector<2x32xf32>
    %233 = vector.extract_strided_slice %219 {offsets = [0, 64], sizes = [2, 32], strides = [1, 1]} : vector<2x128xf32> to vector<2x32xf32>
    %234 = math.tanh %233 : vector<2x32xf32>
    %235 = vector.extract_strided_slice %219 {offsets = [0, 96], sizes = [2, 32], strides = [1, 1]} : vector<2x128xf32> to vector<2x32xf32>
    %236 = arith.negf %235 : vector<2x32xf32>
    %237 = math.exp %236 : vector<2x32xf32>
    %cst_104 = arith.constant 1.000000e+00 : f32
    %238 = vector.broadcast %cst_104 : f32 to vector<2x32xf32>
    %239 = arith.addf %238, %237 : vector<2x32xf32>
    %240 = arith.divf %238, %239 : vector<2x32xf32>
    %241 = arith.mulf %232, %220 : vector<2x32xf32>
    %242 = arith.mulf %226, %234 : vector<2x32xf32>
    %243 = arith.addf %241, %242 : vector<2x32xf32>
    %244 = math.tanh %243 : vector<2x32xf32>
    %245 = arith.mulf %240, %244 : vector<2x32xf32>
    %c0_105 = arith.constant 0 : index
    %c0_106 = arith.constant 0 : index
    %246 = vector.load %arg7[%c0_105, %c0_106] : memref<2x32xf32, #tpu.memory_space<vmem>>, vector<2x32xf32>
    tpu.vector_store %arg7[%c0_105, %c0_106], %245 {strides = array<i32>} : memref<2x32xf32, #tpu.memory_space<vmem>>, vector<2x32xf32>,
    %c0_107 = arith.constant 0 : index
    %c0_108 = arith.constant 0 : index
    %247 = vector.load %arg8[%c0_107, %c0_108] : memref<2x32xf32, #tpu.memory_space<vmem>>, vector<2x32xf32>
    tpu.vector_store %arg8[%c0_107, %c0_108], %243 {strides = array<i32>} : memref<2x32xf32, #tpu.memory_space<vmem>>, vector<2x32xf32>,
    %248 = arith.truncf %245 : vector<2x32xf32> to vector<2x32xbf16>
    %249 = arith.index_cast %212 : i32 to index
    %c0_109 = arith.constant 0 : index
    %c32_110 = arith.constant 32 : index
    %250 = vector.load %arg4[%249, %c0_109, %c32_110] : memref<8x2x64xbf16, #tpu.memory_space<vmem>>, vector<1x2x32xbf16>
    %251 = vector.shape_cast %250 : vector<1x2x32xbf16> to vector<2x32xbf16>
    %252 = vector.shape_cast %248 : vector<2x32xbf16> to vector<1x2x32xbf16>
    tpu.vector_store %arg4[%249, %c0_109, %c32_110], %252 {strides = array<i32>} : memref<8x2x64xbf16, #tpu.memory_space<vmem>>, vector<1x2x32xbf16>,
    %c3_i32 = arith.constant 3 : i32
    %253 = arith.index_cast %c3_i32 : i32 to index
    %c0_111 = arith.constant 0 : index
    %c0_112 = arith.constant 0 : index
    %254 = vector.load %arg0[%253, %c0_111, %c0_112] : memref<8x2x128xf32, #tpu.memory_space<vmem>>, vector<1x2x128xf32>
    %255 = vector.shape_cast %254 : vector<1x2x128xf32> to vector<2x128xf32>
    %c0_113 = arith.constant 0 : index
    %c0_114 = arith.constant 0 : index
    %256 = vector.load %arg5[%c0_113, %c0_114] : memref<2x32xf32, #tpu.memory_space<vmem>>, vector<2x32xf32>
    %257 = arith.truncf %256 : vector<2x32xf32> to vector<2x32xbf16>
    %cst_115 = arith.constant dense<0.000000e+00> : vector<2x128xf32>
    %258 = tpu.matmul %257, %8, %cst_115 {dimension_numbers = #tpu.dot_dimension_numbers<[1], [0], [0], [1], [0, 0, 1, 1], [], []>} : vector<2x32xbf16>, vector<32x128xbf16>, vector<2x128xf32> -> vector<2x128xf32>
    %259 = arith.addf %255, %258 : vector<2x128xf32>
    %c0_116 = arith.constant 0 : index
    %c0_117 = arith.constant 0 : index
    %260 = vector.load %arg6[%c0_116, %c0_117] : memref<2x32xf32, #tpu.memory_space<vmem>>, vector<2x32xf32>
    %261 = vector.extract_strided_slice %259 {offsets = [0, 0], sizes = [2, 32], strides = [1, 1]} : vector<2x128xf32> to vector<2x32xf32>
    %262 = arith.negf %261 : vector<2x32xf32>
    %263 = math.exp %262 : vector<2x32xf32>
    %cst_118 = arith.constant 1.000000e+00 : f32
    %264 = vector.broadcast %cst_118 : f32 to vector<2x32xf32>
    %265 = arith.addf %264, %263 : vector<2x32xf32>
    %266 = arith.divf %264, %265 : vector<2x32xf32>
    %267 = vector.extract_strided_slice %259 {offsets = [0, 32], sizes = [2, 32], strides = [1, 1]} : vector<2x128xf32> to vector<2x32xf32>
    %268 = arith.negf %267 : vector<2x32xf32>
    %269 = math.exp %268 : vector<2x32xf32>
    %cst_119 = arith.constant 1.000000e+00 : f32
    %270 = vector.broadcast %cst_119 : f32 to vector<2x32xf32>
    %271 = arith.addf %270, %269 : vector<2x32xf32>
    %272 = arith.divf %270, %271 : vector<2x32xf32>
    %273 = vector.extract_strided_slice %259 {offsets = [0, 64], sizes = [2, 32], strides = [1, 1]} : vector<2x128xf32> to vector<2x32xf32>
    %274 = math.tanh %273 : vector<2x32xf32>
    %275 = vector.extract_strided_slice %259 {offsets = [0, 96], sizes = [2, 32], strides = [1, 1]} : vector<2x128xf32> to vector<2x32xf32>
    %276 = arith.negf %275 : vector<2x32xf32>
    %277 = math.exp %276 : vector<2x32xf32>
    %cst_120 = arith.constant 1.000000e+00 : f32
    %278 = vector.broadcast %cst_120 : f32 to vector<2x32xf32>
    %279 = arith.addf %278, %277 : vector<2x32xf32>
    %280 = arith.divf %278, %279 : vector<2x32xf32>
    %281 = arith.mulf %272, %260 : vector<2x32xf32>
    %282 = arith.mulf %266, %274 : vector<2x32xf32>
    %283 = arith.addf %281, %282 : vector<2x32xf32>
    %284 = math.tanh %283 : vector<2x32xf32>
    %285 = arith.mulf %280, %284 : vector<2x32xf32>
    %c0_121 = arith.constant 0 : index
    %c0_122 = arith.constant 0 : index
    %286 = vector.load %arg5[%c0_121, %c0_122] : memref<2x32xf32, #tpu.memory_space<vmem>>, vector<2x32xf32>
    tpu.vector_store %arg5[%c0_121, %c0_122], %285 {strides = array<i32>} : memref<2x32xf32, #tpu.memory_space<vmem>>, vector<2x32xf32>,
    %c0_123 = arith.constant 0 : index
    %c0_124 = arith.constant 0 : index
    %287 = vector.load %arg6[%c0_123, %c0_124] : memref<2x32xf32, #tpu.memory_space<vmem>>, vector<2x32xf32>
    tpu.vector_store %arg6[%c0_123, %c0_124], %283 {strides = array<i32>} : memref<2x32xf32, #tpu.memory_space<vmem>>, vector<2x32xf32>,
    %288 = arith.truncf %285 : vector<2x32xf32> to vector<2x32xbf16>
    %289 = arith.index_cast %c3_i32 : i32 to index
    %c0_125 = arith.constant 0 : index
    %c0_126 = arith.constant 0 : index
    %290 = vector.load %arg4[%289, %c0_125, %c0_126] : memref<8x2x64xbf16, #tpu.memory_space<vmem>>, vector<1x2x32xbf16>
    %291 = vector.shape_cast %290 : vector<1x2x32xbf16> to vector<2x32xbf16>
    %292 = vector.shape_cast %288 : vector<2x32xbf16> to vector<1x2x32xbf16>
    tpu.vector_store %arg4[%289, %c0_125, %c0_126], %292 {strides = array<i32>} : memref<8x2x64xbf16, #tpu.memory_space<vmem>>, vector<1x2x32xbf16>,
    %c7_i32_127 = arith.constant 7 : i32
    %293 = arith.subi %c7_i32_127, %c3_i32 : i32
    %294 = arith.index_cast %293 : i32 to index
    %c0_128 = arith.constant 0 : index
    %c0_129 = arith.constant 0 : index
    %295 = vector.load %arg1[%294, %c0_128, %c0_129] : memref<8x2x128xf32, #tpu.memory_space<vmem>>, vector<1x2x128xf32>
    %296 = vector.shape_cast %295 : vector<1x2x128xf32> to vector<2x128xf32>
    %c0_130 = arith.constant 0 : index
    %c0_131 = arith.constant 0 : index
    %297 = vector.load %arg7[%c0_130, %c0_131] : memref<2x32xf32, #tpu.memory_space<vmem>>, vector<2x32xf32>
    %298 = arith.truncf %297 : vector<2x32xf32> to vector<2x32xbf16>
    %cst_132 = arith.constant dense<0.000000e+00> : vector<2x128xf32>
    %299 = tpu.matmul %298, %9, %cst_132 {dimension_numbers = #tpu.dot_dimension_numbers<[1], [0], [0], [1], [0, 0, 1, 1], [], []>} : vector<2x32xbf16>, vector<32x128xbf16>, vector<2x128xf32> -> vector<2x128xf32>
    %300 = arith.addf %296, %299 : vector<2x128xf32>
    %c0_133 = arith.constant 0 : index
    %c0_134 = arith.constant 0 : index
    %301 = vector.load %arg8[%c0_133, %c0_134] : memref<2x32xf32, #tpu.memory_space<vmem>>, vector<2x32xf32>
    %302 = vector.extract_strided_slice %300 {offsets = [0, 0], sizes = [2, 32], strides = [1, 1]} : vector<2x128xf32> to vector<2x32xf32>
    %303 = arith.negf %302 : vector<2x32xf32>
    %304 = math.exp %303 : vector<2x32xf32>
    %cst_135 = arith.constant 1.000000e+00 : f32
    %305 = vector.broadcast %cst_135 : f32 to vector<2x32xf32>
    %306 = arith.addf %305, %304 : vector<2x32xf32>
    %307 = arith.divf %305, %306 : vector<2x32xf32>
    %308 = vector.extract_strided_slice %300 {offsets = [0, 32], sizes = [2, 32], strides = [1, 1]} : vector<2x128xf32> to vector<2x32xf32>
    %309 = arith.negf %308 : vector<2x32xf32>
    %310 = math.exp %309 : vector<2x32xf32>
    %cst_136 = arith.constant 1.000000e+00 : f32
    %311 = vector.broadcast %cst_136 : f32 to vector<2x32xf32>
    %312 = arith.addf %311, %310 : vector<2x32xf32>
    %313 = arith.divf %311, %312 : vector<2x32xf32>
    %314 = vector.extract_strided_slice %300 {offsets = [0, 64], sizes = [2, 32], strides = [1, 1]} : vector<2x128xf32> to vector<2x32xf32>
    %315 = math.tanh %314 : vector<2x32xf32>
    %316 = vector.extract_strided_slice %300 {offsets = [0, 96], sizes = [2, 32], strides = [1, 1]} : vector<2x128xf32> to vector<2x32xf32>
    %317 = arith.negf %316 : vector<2x32xf32>
    %318 = math.exp %317 : vector<2x32xf32>
    %cst_137 = arith.constant 1.000000e+00 : f32
    %319 = vector.broadcast %cst_137 : f32 to vector<2x32xf32>
    %320 = arith.addf %319, %318 : vector<2x32xf32>
    %321 = arith.divf %319, %320 : vector<2x32xf32>
    %322 = arith.mulf %313, %301 : vector<2x32xf32>
    %323 = arith.mulf %307, %315 : vector<2x32xf32>
    %324 = arith.addf %322, %323 : vector<2x32xf32>
    %325 = math.tanh %324 : vector<2x32xf32>
    %326 = arith.mulf %321, %325 : vector<2x32xf32>
    %c0_138 = arith.constant 0 : index
    %c0_139 = arith.constant 0 : index
    %327 = vector.load %arg7[%c0_138, %c0_139] : memref<2x32xf32, #tpu.memory_space<vmem>>, vector<2x32xf32>
    tpu.vector_store %arg7[%c0_138, %c0_139], %326 {strides = array<i32>} : memref<2x32xf32, #tpu.memory_space<vmem>>, vector<2x32xf32>,
    %c0_140 = arith.constant 0 : index
    %c0_141 = arith.constant 0 : index
    %328 = vector.load %arg8[%c0_140, %c0_141] : memref<2x32xf32, #tpu.memory_space<vmem>>, vector<2x32xf32>
    tpu.vector_store %arg8[%c0_140, %c0_141], %324 {strides = array<i32>} : memref<2x32xf32, #tpu.memory_space<vmem>>, vector<2x32xf32>,
    %329 = arith.truncf %326 : vector<2x32xf32> to vector<2x32xbf16>
    %330 = arith.index_cast %293 : i32 to index
    %c0_142 = arith.constant 0 : index
    %c32_143 = arith.constant 32 : index
    %331 = vector.load %arg4[%330, %c0_142, %c32_143] : memref<8x2x64xbf16, #tpu.memory_space<vmem>>, vector<1x2x32xbf16>
    %332 = vector.shape_cast %331 : vector<1x2x32xbf16> to vector<2x32xbf16>
    %333 = vector.shape_cast %329 : vector<2x32xbf16> to vector<1x2x32xbf16>
    tpu.vector_store %arg4[%330, %c0_142, %c32_143], %333 {strides = array<i32>} : memref<8x2x64xbf16, #tpu.memory_space<vmem>>, vector<1x2x32xbf16>,
    %c4_i32 = arith.constant 4 : i32
    %334 = arith.index_cast %c4_i32 : i32 to index
    %c0_144 = arith.constant 0 : index
    %c0_145 = arith.constant 0 : index
    %335 = vector.load %arg0[%334, %c0_144, %c0_145] : memref<8x2x128xf32, #tpu.memory_space<vmem>>, vector<1x2x128xf32>
    %336 = vector.shape_cast %335 : vector<1x2x128xf32> to vector<2x128xf32>
    %c0_146 = arith.constant 0 : index
    %c0_147 = arith.constant 0 : index
    %337 = vector.load %arg5[%c0_146, %c0_147] : memref<2x32xf32, #tpu.memory_space<vmem>>, vector<2x32xf32>
    %338 = arith.truncf %337 : vector<2x32xf32> to vector<2x32xbf16>
    %cst_148 = arith.constant dense<0.000000e+00> : vector<2x128xf32>
    %339 = tpu.matmul %338, %8, %cst_148 {dimension_numbers = #tpu.dot_dimension_numbers<[1], [0], [0], [1], [0, 0, 1, 1], [], []>} : vector<2x32xbf16>, vector<32x128xbf16>, vector<2x128xf32> -> vector<2x128xf32>
    %340 = arith.addf %336, %339 : vector<2x128xf32>
    %c0_149 = arith.constant 0 : index
    %c0_150 = arith.constant 0 : index
    %341 = vector.load %arg6[%c0_149, %c0_150] : memref<2x32xf32, #tpu.memory_space<vmem>>, vector<2x32xf32>
    %342 = vector.extract_strided_slice %340 {offsets = [0, 0], sizes = [2, 32], strides = [1, 1]} : vector<2x128xf32> to vector<2x32xf32>
    %343 = arith.negf %342 : vector<2x32xf32>
    %344 = math.exp %343 : vector<2x32xf32>
    %cst_151 = arith.constant 1.000000e+00 : f32
    %345 = vector.broadcast %cst_151 : f32 to vector<2x32xf32>
    %346 = arith.addf %345, %344 : vector<2x32xf32>
    %347 = arith.divf %345, %346 : vector<2x32xf32>
    %348 = vector.extract_strided_slice %340 {offsets = [0, 32], sizes = [2, 32], strides = [1, 1]} : vector<2x128xf32> to vector<2x32xf32>
    %349 = arith.negf %348 : vector<2x32xf32>
    %350 = math.exp %349 : vector<2x32xf32>
    %cst_152 = arith.constant 1.000000e+00 : f32
    %351 = vector.broadcast %cst_152 : f32 to vector<2x32xf32>
    %352 = arith.addf %351, %350 : vector<2x32xf32>
    %353 = arith.divf %351, %352 : vector<2x32xf32>
    %354 = vector.extract_strided_slice %340 {offsets = [0, 64], sizes = [2, 32], strides = [1, 1]} : vector<2x128xf32> to vector<2x32xf32>
    %355 = math.tanh %354 : vector<2x32xf32>
    %356 = vector.extract_strided_slice %340 {offsets = [0, 96], sizes = [2, 32], strides = [1, 1]} : vector<2x128xf32> to vector<2x32xf32>
    %357 = arith.negf %356 : vector<2x32xf32>
    %358 = math.exp %357 : vector<2x32xf32>
    %cst_153 = arith.constant 1.000000e+00 : f32
    %359 = vector.broadcast %cst_153 : f32 to vector<2x32xf32>
    %360 = arith.addf %359, %358 : vector<2x32xf32>
    %361 = arith.divf %359, %360 : vector<2x32xf32>
    %362 = arith.mulf %353, %341 : vector<2x32xf32>
    %363 = arith.mulf %347, %355 : vector<2x32xf32>
    %364 = arith.addf %362, %363 : vector<2x32xf32>
    %365 = math.tanh %364 : vector<2x32xf32>
    %366 = arith.mulf %361, %365 : vector<2x32xf32>
    %c0_154 = arith.constant 0 : index
    %c0_155 = arith.constant 0 : index
    %367 = vector.load %arg5[%c0_154, %c0_155] : memref<2x32xf32, #tpu.memory_space<vmem>>, vector<2x32xf32>
    tpu.vector_store %arg5[%c0_154, %c0_155], %366 {strides = array<i32>} : memref<2x32xf32, #tpu.memory_space<vmem>>, vector<2x32xf32>,
    %c0_156 = arith.constant 0 : index
    %c0_157 = arith.constant 0 : index
    %368 = vector.load %arg6[%c0_156, %c0_157] : memref<2x32xf32, #tpu.memory_space<vmem>>, vector<2x32xf32>
    tpu.vector_store %arg6[%c0_156, %c0_157], %364 {strides = array<i32>} : memref<2x32xf32, #tpu.memory_space<vmem>>, vector<2x32xf32>,
    %369 = arith.truncf %366 : vector<2x32xf32> to vector<2x32xbf16>
    %370 = arith.index_cast %c4_i32 : i32 to index
    %c0_158 = arith.constant 0 : index
    %c0_159 = arith.constant 0 : index
    %371 = vector.load %arg4[%370, %c0_158, %c0_159] : memref<8x2x64xbf16, #tpu.memory_space<vmem>>, vector<1x2x32xbf16>
    %372 = vector.shape_cast %371 : vector<1x2x32xbf16> to vector<2x32xbf16>
    %373 = vector.shape_cast %369 : vector<2x32xbf16> to vector<1x2x32xbf16>
    tpu.vector_store %arg4[%370, %c0_158, %c0_159], %373 {strides = array<i32>} : memref<8x2x64xbf16, #tpu.memory_space<vmem>>, vector<1x2x32xbf16>,
    %c7_i32_160 = arith.constant 7 : i32
    %374 = arith.subi %c7_i32_160, %c4_i32 : i32
    %375 = arith.index_cast %374 : i32 to index
    %c0_161 = arith.constant 0 : index
    %c0_162 = arith.constant 0 : index
    %376 = vector.load %arg1[%375, %c0_161, %c0_162] : memref<8x2x128xf32, #tpu.memory_space<vmem>>, vector<1x2x128xf32>
    %377 = vector.shape_cast %376 : vector<1x2x128xf32> to vector<2x128xf32>
    %c0_163 = arith.constant 0 : index
    %c0_164 = arith.constant 0 : index
    %378 = vector.load %arg7[%c0_163, %c0_164] : memref<2x32xf32, #tpu.memory_space<vmem>>, vector<2x32xf32>
    %379 = arith.truncf %378 : vector<2x32xf32> to vector<2x32xbf16>
    %cst_165 = arith.constant dense<0.000000e+00> : vector<2x128xf32>
    %380 = tpu.matmul %379, %9, %cst_165 {dimension_numbers = #tpu.dot_dimension_numbers<[1], [0], [0], [1], [0, 0, 1, 1], [], []>} : vector<2x32xbf16>, vector<32x128xbf16>, vector<2x128xf32> -> vector<2x128xf32>
    %381 = arith.addf %377, %380 : vector<2x128xf32>
    %c0_166 = arith.constant 0 : index
    %c0_167 = arith.constant 0 : index
    %382 = vector.load %arg8[%c0_166, %c0_167] : memref<2x32xf32, #tpu.memory_space<vmem>>, vector<2x32xf32>
    %383 = vector.extract_strided_slice %381 {offsets = [0, 0], sizes = [2, 32], strides = [1, 1]} : vector<2x128xf32> to vector<2x32xf32>
    %384 = arith.negf %383 : vector<2x32xf32>
    %385 = math.exp %384 : vector<2x32xf32>
    %cst_168 = arith.constant 1.000000e+00 : f32
    %386 = vector.broadcast %cst_168 : f32 to vector<2x32xf32>
    %387 = arith.addf %386, %385 : vector<2x32xf32>
    %388 = arith.divf %386, %387 : vector<2x32xf32>
    %389 = vector.extract_strided_slice %381 {offsets = [0, 32], sizes = [2, 32], strides = [1, 1]} : vector<2x128xf32> to vector<2x32xf32>
    %390 = arith.negf %389 : vector<2x32xf32>
    %391 = math.exp %390 : vector<2x32xf32>
    %cst_169 = arith.constant 1.000000e+00 : f32
    %392 = vector.broadcast %cst_169 : f32 to vector<2x32xf32>
    %393 = arith.addf %392, %391 : vector<2x32xf32>
    %394 = arith.divf %392, %393 : vector<2x32xf32>
    %395 = vector.extract_strided_slice %381 {offsets = [0, 64], sizes = [2, 32], strides = [1, 1]} : vector<2x128xf32> to vector<2x32xf32>
    %396 = math.tanh %395 : vector<2x32xf32>
    %397 = vector.extract_strided_slice %381 {offsets = [0, 96], sizes = [2, 32], strides = [1, 1]} : vector<2x128xf32> to vector<2x32xf32>
    %398 = arith.negf %397 : vector<2x32xf32>
    %399 = math.exp %398 : vector<2x32xf32>
    %cst_170 = arith.constant 1.000000e+00 : f32
    %400 = vector.broadcast %cst_170 : f32 to vector<2x32xf32>
    %401 = arith.addf %400, %399 : vector<2x32xf32>
    %402 = arith.divf %400, %401 : vector<2x32xf32>
    %403 = arith.mulf %394, %382 : vector<2x32xf32>
    %404 = arith.mulf %388, %396 : vector<2x32xf32>
    %405 = arith.addf %403, %404 : vector<2x32xf32>
    %406 = math.tanh %405 : vector<2x32xf32>
    %407 = arith.mulf %402, %406 : vector<2x32xf32>
    %c0_171 = arith.constant 0 : index
    %c0_172 = arith.constant 0 : index
    %408 = vector.load %arg7[%c0_171, %c0_172] : memref<2x32xf32, #tpu.memory_space<vmem>>, vector<2x32xf32>
    tpu.vector_store %arg7[%c0_171, %c0_172], %407 {strides = array<i32>} : memref<2x32xf32, #tpu.memory_space<vmem>>, vector<2x32xf32>,
    %c0_173 = arith.constant 0 : index
    %c0_174 = arith.constant 0 : index
    %409 = vector.load %arg8[%c0_173, %c0_174] : memref<2x32xf32, #tpu.memory_space<vmem>>, vector<2x32xf32>
    tpu.vector_store %arg8[%c0_173, %c0_174], %405 {strides = array<i32>} : memref<2x32xf32, #tpu.memory_space<vmem>>, vector<2x32xf32>,
    %410 = arith.truncf %407 : vector<2x32xf32> to vector<2x32xbf16>
    %411 = arith.index_cast %374 : i32 to index
    %c0_175 = arith.constant 0 : index
    %c32_176 = arith.constant 32 : index
    %412 = vector.load %arg4[%411, %c0_175, %c32_176] : memref<8x2x64xbf16, #tpu.memory_space<vmem>>, vector<1x2x32xbf16>
    %413 = vector.shape_cast %412 : vector<1x2x32xbf16> to vector<2x32xbf16>
    %414 = vector.shape_cast %410 : vector<2x32xbf16> to vector<1x2x32xbf16>
    tpu.vector_store %arg4[%411, %c0_175, %c32_176], %414 {strides = array<i32>} : memref<8x2x64xbf16, #tpu.memory_space<vmem>>, vector<1x2x32xbf16>,
    %c5_i32 = arith.constant 5 : i32
    %415 = arith.index_cast %c5_i32 : i32 to index
    %c0_177 = arith.constant 0 : index
    %c0_178 = arith.constant 0 : index
    %416 = vector.load %arg0[%415, %c0_177, %c0_178] : memref<8x2x128xf32, #tpu.memory_space<vmem>>, vector<1x2x128xf32>
    %417 = vector.shape_cast %416 : vector<1x2x128xf32> to vector<2x128xf32>
    %c0_179 = arith.constant 0 : index
    %c0_180 = arith.constant 0 : index
    %418 = vector.load %arg5[%c0_179, %c0_180] : memref<2x32xf32, #tpu.memory_space<vmem>>, vector<2x32xf32>
    %419 = arith.truncf %418 : vector<2x32xf32> to vector<2x32xbf16>
    %cst_181 = arith.constant dense<0.000000e+00> : vector<2x128xf32>
    %420 = tpu.matmul %419, %8, %cst_181 {dimension_numbers = #tpu.dot_dimension_numbers<[1], [0], [0], [1], [0, 0, 1, 1], [], []>} : vector<2x32xbf16>, vector<32x128xbf16>, vector<2x128xf32> -> vector<2x128xf32>
    %421 = arith.addf %417, %420 : vector<2x128xf32>
    %c0_182 = arith.constant 0 : index
    %c0_183 = arith.constant 0 : index
    %422 = vector.load %arg6[%c0_182, %c0_183] : memref<2x32xf32, #tpu.memory_space<vmem>>, vector<2x32xf32>
    %423 = vector.extract_strided_slice %421 {offsets = [0, 0], sizes = [2, 32], strides = [1, 1]} : vector<2x128xf32> to vector<2x32xf32>
    %424 = arith.negf %423 : vector<2x32xf32>
    %425 = math.exp %424 : vector<2x32xf32>
    %cst_184 = arith.constant 1.000000e+00 : f32
    %426 = vector.broadcast %cst_184 : f32 to vector<2x32xf32>
    %427 = arith.addf %426, %425 : vector<2x32xf32>
    %428 = arith.divf %426, %427 : vector<2x32xf32>
    %429 = vector.extract_strided_slice %421 {offsets = [0, 32], sizes = [2, 32], strides = [1, 1]} : vector<2x128xf32> to vector<2x32xf32>
    %430 = arith.negf %429 : vector<2x32xf32>
    %431 = math.exp %430 : vector<2x32xf32>
    %cst_185 = arith.constant 1.000000e+00 : f32
    %432 = vector.broadcast %cst_185 : f32 to vector<2x32xf32>
    %433 = arith.addf %432, %431 : vector<2x32xf32>
    %434 = arith.divf %432, %433 : vector<2x32xf32>
    %435 = vector.extract_strided_slice %421 {offsets = [0, 64], sizes = [2, 32], strides = [1, 1]} : vector<2x128xf32> to vector<2x32xf32>
    %436 = math.tanh %435 : vector<2x32xf32>
    %437 = vector.extract_strided_slice %421 {offsets = [0, 96], sizes = [2, 32], strides = [1, 1]} : vector<2x128xf32> to vector<2x32xf32>
    %438 = arith.negf %437 : vector<2x32xf32>
    %439 = math.exp %438 : vector<2x32xf32>
    %cst_186 = arith.constant 1.000000e+00 : f32
    %440 = vector.broadcast %cst_186 : f32 to vector<2x32xf32>
    %441 = arith.addf %440, %439 : vector<2x32xf32>
    %442 = arith.divf %440, %441 : vector<2x32xf32>
    %443 = arith.mulf %434, %422 : vector<2x32xf32>
    %444 = arith.mulf %428, %436 : vector<2x32xf32>
    %445 = arith.addf %443, %444 : vector<2x32xf32>
    %446 = math.tanh %445 : vector<2x32xf32>
    %447 = arith.mulf %442, %446 : vector<2x32xf32>
    %c0_187 = arith.constant 0 : index
    %c0_188 = arith.constant 0 : index
    %448 = vector.load %arg5[%c0_187, %c0_188] : memref<2x32xf32, #tpu.memory_space<vmem>>, vector<2x32xf32>
    tpu.vector_store %arg5[%c0_187, %c0_188], %447 {strides = array<i32>} : memref<2x32xf32, #tpu.memory_space<vmem>>, vector<2x32xf32>,
    %c0_189 = arith.constant 0 : index
    %c0_190 = arith.constant 0 : index
    %449 = vector.load %arg6[%c0_189, %c0_190] : memref<2x32xf32, #tpu.memory_space<vmem>>, vector<2x32xf32>
    tpu.vector_store %arg6[%c0_189, %c0_190], %445 {strides = array<i32>} : memref<2x32xf32, #tpu.memory_space<vmem>>, vector<2x32xf32>,
    %450 = arith.truncf %447 : vector<2x32xf32> to vector<2x32xbf16>
    %451 = arith.index_cast %c5_i32 : i32 to index
    %c0_191 = arith.constant 0 : index
    %c0_192 = arith.constant 0 : index
    %452 = vector.load %arg4[%451, %c0_191, %c0_192] : memref<8x2x64xbf16, #tpu.memory_space<vmem>>, vector<1x2x32xbf16>
    %453 = vector.shape_cast %452 : vector<1x2x32xbf16> to vector<2x32xbf16>
    %454 = vector.shape_cast %450 : vector<2x32xbf16> to vector<1x2x32xbf16>
    tpu.vector_store %arg4[%451, %c0_191, %c0_192], %454 {strides = array<i32>} : memref<8x2x64xbf16, #tpu.memory_space<vmem>>, vector<1x2x32xbf16>,
    %c7_i32_193 = arith.constant 7 : i32
    %455 = arith.subi %c7_i32_193, %c5_i32 : i32
    %456 = arith.index_cast %455 : i32 to index
    %c0_194 = arith.constant 0 : index
    %c0_195 = arith.constant 0 : index
    %457 = vector.load %arg1[%456, %c0_194, %c0_195] : memref<8x2x128xf32, #tpu.memory_space<vmem>>, vector<1x2x128xf32>
    %458 = vector.shape_cast %457 : vector<1x2x128xf32> to vector<2x128xf32>
    %c0_196 = arith.constant 0 : index
    %c0_197 = arith.constant 0 : index
    %459 = vector.load %arg7[%c0_196, %c0_197] : memref<2x32xf32, #tpu.memory_space<vmem>>, vector<2x32xf32>
    %460 = arith.truncf %459 : vector<2x32xf32> to vector<2x32xbf16>
    %cst_198 = arith.constant dense<0.000000e+00> : vector<2x128xf32>
    %461 = tpu.matmul %460, %9, %cst_198 {dimension_numbers = #tpu.dot_dimension_numbers<[1], [0], [0], [1], [0, 0, 1, 1], [], []>} : vector<2x32xbf16>, vector<32x128xbf16>, vector<2x128xf32> -> vector<2x128xf32>
    %462 = arith.addf %458, %461 : vector<2x128xf32>
    %c0_199 = arith.constant 0 : index
    %c0_200 = arith.constant 0 : index
    %463 = vector.load %arg8[%c0_199, %c0_200] : memref<2x32xf32, #tpu.memory_space<vmem>>, vector<2x32xf32>
    %464 = vector.extract_strided_slice %462 {offsets = [0, 0], sizes = [2, 32], strides = [1, 1]} : vector<2x128xf32> to vector<2x32xf32>
    %465 = arith.negf %464 : vector<2x32xf32>
    %466 = math.exp %465 : vector<2x32xf32>
    %cst_201 = arith.constant 1.000000e+00 : f32
    %467 = vector.broadcast %cst_201 : f32 to vector<2x32xf32>
    %468 = arith.addf %467, %466 : vector<2x32xf32>
    %469 = arith.divf %467, %468 : vector<2x32xf32>
    %470 = vector.extract_strided_slice %462 {offsets = [0, 32], sizes = [2, 32], strides = [1, 1]} : vector<2x128xf32> to vector<2x32xf32>
    %471 = arith.negf %470 : vector<2x32xf32>
    %472 = math.exp %471 : vector<2x32xf32>
    %cst_202 = arith.constant 1.000000e+00 : f32
    %473 = vector.broadcast %cst_202 : f32 to vector<2x32xf32>
    %474 = arith.addf %473, %472 : vector<2x32xf32>
    %475 = arith.divf %473, %474 : vector<2x32xf32>
    %476 = vector.extract_strided_slice %462 {offsets = [0, 64], sizes = [2, 32], strides = [1, 1]} : vector<2x128xf32> to vector<2x32xf32>
    %477 = math.tanh %476 : vector<2x32xf32>
    %478 = vector.extract_strided_slice %462 {offsets = [0, 96], sizes = [2, 32], strides = [1, 1]} : vector<2x128xf32> to vector<2x32xf32>
    %479 = arith.negf %478 : vector<2x32xf32>
    %480 = math.exp %479 : vector<2x32xf32>
    %cst_203 = arith.constant 1.000000e+00 : f32
    %481 = vector.broadcast %cst_203 : f32 to vector<2x32xf32>
    %482 = arith.addf %481, %480 : vector<2x32xf32>
    %483 = arith.divf %481, %482 : vector<2x32xf32>
    %484 = arith.mulf %475, %463 : vector<2x32xf32>
    %485 = arith.mulf %469, %477 : vector<2x32xf32>
    %486 = arith.addf %484, %485 : vector<2x32xf32>
    %487 = math.tanh %486 : vector<2x32xf32>
    %488 = arith.mulf %483, %487 : vector<2x32xf32>
    %c0_204 = arith.constant 0 : index
    %c0_205 = arith.constant 0 : index
    %489 = vector.load %arg7[%c0_204, %c0_205] : memref<2x32xf32, #tpu.memory_space<vmem>>, vector<2x32xf32>
    tpu.vector_store %arg7[%c0_204, %c0_205], %488 {strides = array<i32>} : memref<2x32xf32, #tpu.memory_space<vmem>>, vector<2x32xf32>,
    %c0_206 = arith.constant 0 : index
    %c0_207 = arith.constant 0 : index
    %490 = vector.load %arg8[%c0_206, %c0_207] : memref<2x32xf32, #tpu.memory_space<vmem>>, vector<2x32xf32>
    tpu.vector_store %arg8[%c0_206, %c0_207], %486 {strides = array<i32>} : memref<2x32xf32, #tpu.memory_space<vmem>>, vector<2x32xf32>,
    %491 = arith.truncf %488 : vector<2x32xf32> to vector<2x32xbf16>
    %492 = arith.index_cast %455 : i32 to index
    %c0_208 = arith.constant 0 : index
    %c32_209 = arith.constant 32 : index
    %493 = vector.load %arg4[%492, %c0_208, %c32_209] : memref<8x2x64xbf16, #tpu.memory_space<vmem>>, vector<1x2x32xbf16>
    %494 = vector.shape_cast %493 : vector<1x2x32xbf16> to vector<2x32xbf16>
    %495 = vector.shape_cast %491 : vector<2x32xbf16> to vector<1x2x32xbf16>
    tpu.vector_store %arg4[%492, %c0_208, %c32_209], %495 {strides = array<i32>} : memref<8x2x64xbf16, #tpu.memory_space<vmem>>, vector<1x2x32xbf16>,
    %c6_i32 = arith.constant 6 : i32
    %496 = arith.index_cast %c6_i32 : i32 to index
    %c0_210 = arith.constant 0 : index
    %c0_211 = arith.constant 0 : index
    %497 = vector.load %arg0[%496, %c0_210, %c0_211] : memref<8x2x128xf32, #tpu.memory_space<vmem>>, vector<1x2x128xf32>
    %498 = vector.shape_cast %497 : vector<1x2x128xf32> to vector<2x128xf32>
    %c0_212 = arith.constant 0 : index
    %c0_213 = arith.constant 0 : index
    %499 = vector.load %arg5[%c0_212, %c0_213] : memref<2x32xf32, #tpu.memory_space<vmem>>, vector<2x32xf32>
    %500 = arith.truncf %499 : vector<2x32xf32> to vector<2x32xbf16>
    %cst_214 = arith.constant dense<0.000000e+00> : vector<2x128xf32>
    %501 = tpu.matmul %500, %8, %cst_214 {dimension_numbers = #tpu.dot_dimension_numbers<[1], [0], [0], [1], [0, 0, 1, 1], [], []>} : vector<2x32xbf16>, vector<32x128xbf16>, vector<2x128xf32> -> vector<2x128xf32>
    %502 = arith.addf %498, %501 : vector<2x128xf32>
    %c0_215 = arith.constant 0 : index
    %c0_216 = arith.constant 0 : index
    %503 = vector.load %arg6[%c0_215, %c0_216] : memref<2x32xf32, #tpu.memory_space<vmem>>, vector<2x32xf32>
    %504 = vector.extract_strided_slice %502 {offsets = [0, 0], sizes = [2, 32], strides = [1, 1]} : vector<2x128xf32> to vector<2x32xf32>
    %505 = arith.negf %504 : vector<2x32xf32>
    %506 = math.exp %505 : vector<2x32xf32>
    %cst_217 = arith.constant 1.000000e+00 : f32
    %507 = vector.broadcast %cst_217 : f32 to vector<2x32xf32>
    %508 = arith.addf %507, %506 : vector<2x32xf32>
    %509 = arith.divf %507, %508 : vector<2x32xf32>
    %510 = vector.extract_strided_slice %502 {offsets = [0, 32], sizes = [2, 32], strides = [1, 1]} : vector<2x128xf32> to vector<2x32xf32>
    %511 = arith.negf %510 : vector<2x32xf32>
    %512 = math.exp %511 : vector<2x32xf32>
    %cst_218 = arith.constant 1.000000e+00 : f32
    %513 = vector.broadcast %cst_218 : f32 to vector<2x32xf32>
    %514 = arith.addf %513, %512 : vector<2x32xf32>
    %515 = arith.divf %513, %514 : vector<2x32xf32>
    %516 = vector.extract_strided_slice %502 {offsets = [0, 64], sizes = [2, 32], strides = [1, 1]} : vector<2x128xf32> to vector<2x32xf32>
    %517 = math.tanh %516 : vector<2x32xf32>
    %518 = vector.extract_strided_slice %502 {offsets = [0, 96], sizes = [2, 32], strides = [1, 1]} : vector<2x128xf32> to vector<2x32xf32>
    %519 = arith.negf %518 : vector<2x32xf32>
    %520 = math.exp %519 : vector<2x32xf32>
    %cst_219 = arith.constant 1.000000e+00 : f32
    %521 = vector.broadcast %cst_219 : f32 to vector<2x32xf32>
    %522 = arith.addf %521, %520 : vector<2x32xf32>
    %523 = arith.divf %521, %522 : vector<2x32xf32>
    %524 = arith.mulf %515, %503 : vector<2x32xf32>
    %525 = arith.mulf %509, %517 : vector<2x32xf32>
    %526 = arith.addf %524, %525 : vector<2x32xf32>
    %527 = math.tanh %526 : vector<2x32xf32>
    %528 = arith.mulf %523, %527 : vector<2x32xf32>
    %c0_220 = arith.constant 0 : index
    %c0_221 = arith.constant 0 : index
    %529 = vector.load %arg5[%c0_220, %c0_221] : memref<2x32xf32, #tpu.memory_space<vmem>>, vector<2x32xf32>
    tpu.vector_store %arg5[%c0_220, %c0_221], %528 {strides = array<i32>} : memref<2x32xf32, #tpu.memory_space<vmem>>, vector<2x32xf32>,
    %c0_222 = arith.constant 0 : index
    %c0_223 = arith.constant 0 : index
    %530 = vector.load %arg6[%c0_222, %c0_223] : memref<2x32xf32, #tpu.memory_space<vmem>>, vector<2x32xf32>
    tpu.vector_store %arg6[%c0_222, %c0_223], %526 {strides = array<i32>} : memref<2x32xf32, #tpu.memory_space<vmem>>, vector<2x32xf32>,
    %531 = arith.truncf %528 : vector<2x32xf32> to vector<2x32xbf16>
    %532 = arith.index_cast %c6_i32 : i32 to index
    %c0_224 = arith.constant 0 : index
    %c0_225 = arith.constant 0 : index
    %533 = vector.load %arg4[%532, %c0_224, %c0_225] : memref<8x2x64xbf16, #tpu.memory_space<vmem>>, vector<1x2x32xbf16>
    %534 = vector.shape_cast %533 : vector<1x2x32xbf16> to vector<2x32xbf16>
    %535 = vector.shape_cast %531 : vector<2x32xbf16> to vector<1x2x32xbf16>
    tpu.vector_store %arg4[%532, %c0_224, %c0_225], %535 {strides = array<i32>} : memref<8x2x64xbf16, #tpu.memory_space<vmem>>, vector<1x2x32xbf16>,
    %c7_i32_226 = arith.constant 7 : i32
    %536 = arith.subi %c7_i32_226, %c6_i32 : i32
    %537 = arith.index_cast %536 : i32 to index
    %c0_227 = arith.constant 0 : index
    %c0_228 = arith.constant 0 : index
    %538 = vector.load %arg1[%537, %c0_227, %c0_228] : memref<8x2x128xf32, #tpu.memory_space<vmem>>, vector<1x2x128xf32>
    %539 = vector.shape_cast %538 : vector<1x2x128xf32> to vector<2x128xf32>
    %c0_229 = arith.constant 0 : index
    %c0_230 = arith.constant 0 : index
    %540 = vector.load %arg7[%c0_229, %c0_230] : memref<2x32xf32, #tpu.memory_space<vmem>>, vector<2x32xf32>
    %541 = arith.truncf %540 : vector<2x32xf32> to vector<2x32xbf16>
    %cst_231 = arith.constant dense<0.000000e+00> : vector<2x128xf32>
    %542 = tpu.matmul %541, %9, %cst_231 {dimension_numbers = #tpu.dot_dimension_numbers<[1], [0], [0], [1], [0, 0, 1, 1], [], []>} : vector<2x32xbf16>, vector<32x128xbf16>, vector<2x128xf32> -> vector<2x128xf32>
    %543 = arith.addf %539, %542 : vector<2x128xf32>
    %c0_232 = arith.constant 0 : index
    %c0_233 = arith.constant 0 : index
    %544 = vector.load %arg8[%c0_232, %c0_233] : memref<2x32xf32, #tpu.memory_space<vmem>>, vector<2x32xf32>
    %545 = vector.extract_strided_slice %543 {offsets = [0, 0], sizes = [2, 32], strides = [1, 1]} : vector<2x128xf32> to vector<2x32xf32>
    %546 = arith.negf %545 : vector<2x32xf32>
    %547 = math.exp %546 : vector<2x32xf32>
    %cst_234 = arith.constant 1.000000e+00 : f32
    %548 = vector.broadcast %cst_234 : f32 to vector<2x32xf32>
    %549 = arith.addf %548, %547 : vector<2x32xf32>
    %550 = arith.divf %548, %549 : vector<2x32xf32>
    %551 = vector.extract_strided_slice %543 {offsets = [0, 32], sizes = [2, 32], strides = [1, 1]} : vector<2x128xf32> to vector<2x32xf32>
    %552 = arith.negf %551 : vector<2x32xf32>
    %553 = math.exp %552 : vector<2x32xf32>
    %cst_235 = arith.constant 1.000000e+00 : f32
    %554 = vector.broadcast %cst_235 : f32 to vector<2x32xf32>
    %555 = arith.addf %554, %553 : vector<2x32xf32>
    %556 = arith.divf %554, %555 : vector<2x32xf32>
    %557 = vector.extract_strided_slice %543 {offsets = [0, 64], sizes = [2, 32], strides = [1, 1]} : vector<2x128xf32> to vector<2x32xf32>
    %558 = math.tanh %557 : vector<2x32xf32>
    %559 = vector.extract_strided_slice %543 {offsets = [0, 96], sizes = [2, 32], strides = [1, 1]} : vector<2x128xf32> to vector<2x32xf32>
    %560 = arith.negf %559 : vector<2x32xf32>
    %561 = math.exp %560 : vector<2x32xf32>
    %cst_236 = arith.constant 1.000000e+00 : f32
    %562 = vector.broadcast %cst_236 : f32 to vector<2x32xf32>
    %563 = arith.addf %562, %561 : vector<2x32xf32>
    %564 = arith.divf %562, %563 : vector<2x32xf32>
    %565 = arith.mulf %556, %544 : vector<2x32xf32>
    %566 = arith.mulf %550, %558 : vector<2x32xf32>
    %567 = arith.addf %565, %566 : vector<2x32xf32>
    %568 = math.tanh %567 : vector<2x32xf32>
    %569 = arith.mulf %564, %568 : vector<2x32xf32>
    %c0_237 = arith.constant 0 : index
    %c0_238 = arith.constant 0 : index
    %570 = vector.load %arg7[%c0_237, %c0_238] : memref<2x32xf32, #tpu.memory_space<vmem>>, vector<2x32xf32>
    tpu.vector_store %arg7[%c0_237, %c0_238], %569 {strides = array<i32>} : memref<2x32xf32, #tpu.memory_space<vmem>>, vector<2x32xf32>,
    %c0_239 = arith.constant 0 : index
    %c0_240 = arith.constant 0 : index
    %571 = vector.load %arg8[%c0_239, %c0_240] : memref<2x32xf32, #tpu.memory_space<vmem>>, vector<2x32xf32>
    tpu.vector_store %arg8[%c0_239, %c0_240], %567 {strides = array<i32>} : memref<2x32xf32, #tpu.memory_space<vmem>>, vector<2x32xf32>,
    %572 = arith.truncf %569 : vector<2x32xf32> to vector<2x32xbf16>
    %573 = arith.index_cast %536 : i32 to index
    %c0_241 = arith.constant 0 : index
    %c32_242 = arith.constant 32 : index
    %574 = vector.load %arg4[%573, %c0_241, %c32_242] : memref<8x2x64xbf16, #tpu.memory_space<vmem>>, vector<1x2x32xbf16>
    %575 = vector.shape_cast %574 : vector<1x2x32xbf16> to vector<2x32xbf16>
    %576 = vector.shape_cast %572 : vector<2x32xbf16> to vector<1x2x32xbf16>
    tpu.vector_store %arg4[%573, %c0_241, %c32_242], %576 {strides = array<i32>} : memref<8x2x64xbf16, #tpu.memory_space<vmem>>, vector<1x2x32xbf16>,
    %c7_i32_243 = arith.constant 7 : i32
    %577 = arith.index_cast %c7_i32_243 : i32 to index
    %c0_244 = arith.constant 0 : index
    %c0_245 = arith.constant 0 : index
    %578 = vector.load %arg0[%577, %c0_244, %c0_245] : memref<8x2x128xf32, #tpu.memory_space<vmem>>, vector<1x2x128xf32>
    %579 = vector.shape_cast %578 : vector<1x2x128xf32> to vector<2x128xf32>
    %c0_246 = arith.constant 0 : index
    %c0_247 = arith.constant 0 : index
    %580 = vector.load %arg5[%c0_246, %c0_247] : memref<2x32xf32, #tpu.memory_space<vmem>>, vector<2x32xf32>
    %581 = arith.truncf %580 : vector<2x32xf32> to vector<2x32xbf16>
    %cst_248 = arith.constant dense<0.000000e+00> : vector<2x128xf32>
    %582 = tpu.matmul %581, %8, %cst_248 {dimension_numbers = #tpu.dot_dimension_numbers<[1], [0], [0], [1], [0, 0, 1, 1], [], []>} : vector<2x32xbf16>, vector<32x128xbf16>, vector<2x128xf32> -> vector<2x128xf32>
    %583 = arith.addf %579, %582 : vector<2x128xf32>
    %c0_249 = arith.constant 0 : index
    %c0_250 = arith.constant 0 : index
    %584 = vector.load %arg6[%c0_249, %c0_250] : memref<2x32xf32, #tpu.memory_space<vmem>>, vector<2x32xf32>
    %585 = vector.extract_strided_slice %583 {offsets = [0, 0], sizes = [2, 32], strides = [1, 1]} : vector<2x128xf32> to vector<2x32xf32>
    %586 = arith.negf %585 : vector<2x32xf32>
    %587 = math.exp %586 : vector<2x32xf32>
    %cst_251 = arith.constant 1.000000e+00 : f32
    %588 = vector.broadcast %cst_251 : f32 to vector<2x32xf32>
    %589 = arith.addf %588, %587 : vector<2x32xf32>
    %590 = arith.divf %588, %589 : vector<2x32xf32>
    %591 = vector.extract_strided_slice %583 {offsets = [0, 32], sizes = [2, 32], strides = [1, 1]} : vector<2x128xf32> to vector<2x32xf32>
    %592 = arith.negf %591 : vector<2x32xf32>
    %593 = math.exp %592 : vector<2x32xf32>
    %cst_252 = arith.constant 1.000000e+00 : f32
    %594 = vector.broadcast %cst_252 : f32 to vector<2x32xf32>
    %595 = arith.addf %594, %593 : vector<2x32xf32>
    %596 = arith.divf %594, %595 : vector<2x32xf32>
    %597 = vector.extract_strided_slice %583 {offsets = [0, 64], sizes = [2, 32], strides = [1, 1]} : vector<2x128xf32> to vector<2x32xf32>
    %598 = math.tanh %597 : vector<2x32xf32>
    %599 = vector.extract_strided_slice %583 {offsets = [0, 96], sizes = [2, 32], strides = [1, 1]} : vector<2x128xf32> to vector<2x32xf32>
    %600 = arith.negf %599 : vector<2x32xf32>
    %601 = math.exp %600 : vector<2x32xf32>
    %cst_253 = arith.constant 1.000000e+00 : f32
    %602 = vector.broadcast %cst_253 : f32 to vector<2x32xf32>
    %603 = arith.addf %602, %601 : vector<2x32xf32>
    %604 = arith.divf %602, %603 : vector<2x32xf32>
    %605 = arith.mulf %596, %584 : vector<2x32xf32>
    %606 = arith.mulf %590, %598 : vector<2x32xf32>
    %607 = arith.addf %605, %606 : vector<2x32xf32>
    %608 = math.tanh %607 : vector<2x32xf32>
    %609 = arith.mulf %604, %608 : vector<2x32xf32>
    %c0_254 = arith.constant 0 : index
    %c0_255 = arith.constant 0 : index
    %610 = vector.load %arg5[%c0_254, %c0_255] : memref<2x32xf32, #tpu.memory_space<vmem>>, vector<2x32xf32>
    tpu.vector_store %arg5[%c0_254, %c0_255], %609 {strides = array<i32>} : memref<2x32xf32, #tpu.memory_space<vmem>>, vector<2x32xf32>,
    %c0_256 = arith.constant 0 : index
    %c0_257 = arith.constant 0 : index
    %611 = vector.load %arg6[%c0_256, %c0_257] : memref<2x32xf32, #tpu.memory_space<vmem>>, vector<2x32xf32>
    tpu.vector_store %arg6[%c0_256, %c0_257], %607 {strides = array<i32>} : memref<2x32xf32, #tpu.memory_space<vmem>>, vector<2x32xf32>,
    %612 = arith.truncf %609 : vector<2x32xf32> to vector<2x32xbf16>
    %613 = arith.index_cast %c7_i32_243 : i32 to index
    %c0_258 = arith.constant 0 : index
    %c0_259 = arith.constant 0 : index
    %614 = vector.load %arg4[%613, %c0_258, %c0_259] : memref<8x2x64xbf16, #tpu.memory_space<vmem>>, vector<1x2x32xbf16>
    %615 = vector.shape_cast %614 : vector<1x2x32xbf16> to vector<2x32xbf16>
    %616 = vector.shape_cast %612 : vector<2x32xbf16> to vector<1x2x32xbf16>
    tpu.vector_store %arg4[%613, %c0_258, %c0_259], %616 {strides = array<i32>} : memref<8x2x64xbf16, #tpu.memory_space<vmem>>, vector<1x2x32xbf16>,
    %c7_i32_260 = arith.constant 7 : i32
    %617 = arith.subi %c7_i32_260, %c7_i32_243 : i32
    %618 = arith.index_cast %617 : i32 to index
    %c0_261 = arith.constant 0 : index
    %c0_262 = arith.constant 0 : index
    %619 = vector.load %arg1[%618, %c0_261, %c0_262] : memref<8x2x128xf32, #tpu.memory_space<vmem>>, vector<1x2x128xf32>
    %620 = vector.shape_cast %619 : vector<1x2x128xf32> to vector<2x128xf32>
    %c0_263 = arith.constant 0 : index
    %c0_264 = arith.constant 0 : index
    %621 = vector.load %arg7[%c0_263, %c0_264] : memref<2x32xf32, #tpu.memory_space<vmem>>, vector<2x32xf32>
    %622 = arith.truncf %621 : vector<2x32xf32> to vector<2x32xbf16>
    %cst_265 = arith.constant dense<0.000000e+00> : vector<2x128xf32>
    %623 = tpu.matmul %622, %9, %cst_265 {dimension_numbers = #tpu.dot_dimension_numbers<[1], [0], [0], [1], [0, 0, 1, 1], [], []>} : vector<2x32xbf16>, vector<32x128xbf16>, vector<2x128xf32> -> vector<2x128xf32>
    %624 = arith.addf %620, %623 : vector<2x128xf32>
    %c0_266 = arith.constant 0 : index
    %c0_267 = arith.constant 0 : index
    %625 = vector.load %arg8[%c0_266, %c0_267] : memref<2x32xf32, #tpu.memory_space<vmem>>, vector<2x32xf32>
    %626 = vector.extract_strided_slice %624 {offsets = [0, 0], sizes = [2, 32], strides = [1, 1]} : vector<2x128xf32> to vector<2x32xf32>
    %627 = arith.negf %626 : vector<2x32xf32>
    %628 = math.exp %627 : vector<2x32xf32>
    %cst_268 = arith.constant 1.000000e+00 : f32
    %629 = vector.broadcast %cst_268 : f32 to vector<2x32xf32>
    %630 = arith.addf %629, %628 : vector<2x32xf32>
    %631 = arith.divf %629, %630 : vector<2x32xf32>
    %632 = vector.extract_strided_slice %624 {offsets = [0, 32], sizes = [2, 32], strides = [1, 1]} : vector<2x128xf32> to vector<2x32xf32>
    %633 = arith.negf %632 : vector<2x32xf32>
    %634 = math.exp %633 : vector<2x32xf32>
    %cst_269 = arith.constant 1.000000e+00 : f32
    %635 = vector.broadcast %cst_269 : f32 to vector<2x32xf32>
    %636 = arith.addf %635, %634 : vector<2x32xf32>
    %637 = arith.divf %635, %636 : vector<2x32xf32>
    %638 = vector.extract_strided_slice %624 {offsets = [0, 64], sizes = [2, 32], strides = [1, 1]} : vector<2x128xf32> to vector<2x32xf32>
    %639 = math.tanh %638 : vector<2x32xf32>
    %640 = vector.extract_strided_slice %624 {offsets = [0, 96], sizes = [2, 32], strides = [1, 1]} : vector<2x128xf32> to vector<2x32xf32>
    %641 = arith.negf %640 : vector<2x32xf32>
    %642 = math.exp %641 : vector<2x32xf32>
    %cst_270 = arith.constant 1.000000e+00 : f32
    %643 = vector.broadcast %cst_270 : f32 to vector<2x32xf32>
    %644 = arith.addf %643, %642 : vector<2x32xf32>
    %645 = arith.divf %643, %644 : vector<2x32xf32>
    %646 = arith.mulf %637, %625 : vector<2x32xf32>
    %647 = arith.mulf %631, %639 : vector<2x32xf32>
    %648 = arith.addf %646, %647 : vector<2x32xf32>
    %649 = math.tanh %648 : vector<2x32xf32>
    %650 = arith.mulf %645, %649 : vector<2x32xf32>
    %c0_271 = arith.constant 0 : index
    %c0_272 = arith.constant 0 : index
    %651 = vector.load %arg7[%c0_271, %c0_272] : memref<2x32xf32, #tpu.memory_space<vmem>>, vector<2x32xf32>
    tpu.vector_store %arg7[%c0_271, %c0_272], %650 {strides = array<i32>} : memref<2x32xf32, #tpu.memory_space<vmem>>, vector<2x32xf32>,
    %c0_273 = arith.constant 0 : index
    %c0_274 = arith.constant 0 : index
    %652 = vector.load %arg8[%c0_273, %c0_274] : memref<2x32xf32, #tpu.memory_space<vmem>>, vector<2x32xf32>
    tpu.vector_store %arg8[%c0_273, %c0_274], %648 {strides = array<i32>} : memref<2x32xf32, #tpu.memory_space<vmem>>, vector<2x32xf32>,
    %653 = arith.truncf %650 : vector<2x32xf32> to vector<2x32xbf16>
    %654 = arith.index_cast %617 : i32 to index
    %c0_275 = arith.constant 0 : index
    %c32_276 = arith.constant 32 : index
    %655 = vector.load %arg4[%654, %c0_275, %c32_276] : memref<8x2x64xbf16, #tpu.memory_space<vmem>>, vector<1x2x32xbf16>
    %656 = vector.shape_cast %655 : vector<1x2x32xbf16> to vector<2x32xbf16>
    %657 = vector.shape_cast %653 : vector<2x32xbf16> to vector<1x2x32xbf16>
    tpu.vector_store %arg4[%654, %c0_275, %c32_276], %657 {strides = array<i32>} : memref<8x2x64xbf16, #tpu.memory_space<vmem>>, vector<1x2x32xbf16>,
    %c8_i32 = arith.constant 8 : i32
    return
  }
}

module attributes {stable_mosaic.version = 11 : i64} {
  func.func @kernel(%arg0: memref<8x2x128xf32, #tpu.memory_space<vmem>>, %arg1: memref<8x2x128xf32, #tpu.memory_space<vmem>>, %arg2: memref<32x128xbf16, #tpu.memory_space<vmem>>, %arg3: memref<32x128xbf16, #tpu.memory_space<vmem>>, %arg4: memref<128x2xbf16, #tpu.memory_space<vmem>>, %arg5: memref<1x2xf32, #tpu.memory_space<vmem>>, %arg6: memref<8x2x64xbf16, #tpu.memory_space<vmem>>, %arg7: memref<2x2xf32, #tpu.memory_space<vmem>>, %arg8: memref<2x32xf32, #tpu.memory_space<vmem>>, %arg9: memref<2x32xf32, #tpu.memory_space<vmem>>, %arg10: memref<2x32xf32, #tpu.memory_space<vmem>>, %arg11: memref<2x32xf32, #tpu.memory_space<vmem>>) attributes {dimension_semantics = [], scalar_prefetch = 0 : i64, scratch_operands = 4 : i64, tpu.core_type = #tpu.core_type<tc>} {
    %cst = arith.constant 0.000000e+00 : f32
    %0 = vector.broadcast %cst : f32 to vector<2x32xf32>
    %c0 = arith.constant 0 : index
    %c0_0 = arith.constant 0 : index
    %1 = vector.load %arg8[%c0, %c0_0] : memref<2x32xf32, #tpu.memory_space<vmem>>, vector<2x32xf32>
    tpu.vector_store %arg8[%c0, %c0_0], %0 {strides = array<i32>} : memref<2x32xf32, #tpu.memory_space<vmem>>, vector<2x32xf32>,
    %cst_1 = arith.constant 0.000000e+00 : f32
    %2 = vector.broadcast %cst_1 : f32 to vector<2x32xf32>
    %c0_2 = arith.constant 0 : index
    %c0_3 = arith.constant 0 : index
    %3 = vector.load %arg9[%c0_2, %c0_3] : memref<2x32xf32, #tpu.memory_space<vmem>>, vector<2x32xf32>
    tpu.vector_store %arg9[%c0_2, %c0_3], %2 {strides = array<i32>} : memref<2x32xf32, #tpu.memory_space<vmem>>, vector<2x32xf32>,
    %cst_4 = arith.constant 0.000000e+00 : f32
    %4 = vector.broadcast %cst_4 : f32 to vector<2x32xf32>
    %c0_5 = arith.constant 0 : index
    %c0_6 = arith.constant 0 : index
    %5 = vector.load %arg10[%c0_5, %c0_6] : memref<2x32xf32, #tpu.memory_space<vmem>>, vector<2x32xf32>
    tpu.vector_store %arg10[%c0_5, %c0_6], %4 {strides = array<i32>} : memref<2x32xf32, #tpu.memory_space<vmem>>, vector<2x32xf32>,
    %cst_7 = arith.constant 0.000000e+00 : f32
    %6 = vector.broadcast %cst_7 : f32 to vector<2x32xf32>
    %c0_8 = arith.constant 0 : index
    %c0_9 = arith.constant 0 : index
    %7 = vector.load %arg11[%c0_8, %c0_9] : memref<2x32xf32, #tpu.memory_space<vmem>>, vector<2x32xf32>
    tpu.vector_store %arg11[%c0_8, %c0_9], %6 {strides = array<i32>} : memref<2x32xf32, #tpu.memory_space<vmem>>, vector<2x32xf32>,
    %c0_10 = arith.constant 0 : index
    %c0_11 = arith.constant 0 : index
    %8 = vector.load %arg2[%c0_10, %c0_11] : memref<32x128xbf16, #tpu.memory_space<vmem>>, vector<32x128xbf16>
    %c0_12 = arith.constant 0 : index
    %c0_13 = arith.constant 0 : index
    %9 = vector.load %arg3[%c0_12, %c0_13] : memref<32x128xbf16, #tpu.memory_space<vmem>>, vector<32x128xbf16>
    %c0_i32 = arith.constant 0 : i32
    %10 = arith.index_cast %c0_i32 : i32 to index
    %c0_14 = arith.constant 0 : index
    %c0_15 = arith.constant 0 : index
    %11 = vector.load %arg0[%10, %c0_14, %c0_15] : memref<8x2x128xf32, #tpu.memory_space<vmem>>, vector<1x2x128xf32>
    %12 = vector.shape_cast %11 : vector<1x2x128xf32> to vector<2x128xf32>
    %c0_16 = arith.constant 0 : index
    %c0_17 = arith.constant 0 : index
    %13 = vector.load %arg8[%c0_16, %c0_17] : memref<2x32xf32, #tpu.memory_space<vmem>>, vector<2x32xf32>
    %14 = arith.truncf %13 : vector<2x32xf32> to vector<2x32xbf16>
    %cst_18 = arith.constant dense<0.000000e+00> : vector<2x128xf32>
    %15 = tpu.matmul %14, %8, %cst_18 {dimension_numbers = #tpu.dot_dimension_numbers<[1], [0], [0], [1], [0, 0, 1, 1], [], []>} : vector<2x32xbf16>, vector<32x128xbf16>, vector<2x128xf32> -> vector<2x128xf32>
    %16 = arith.addf %12, %15 : vector<2x128xf32>
    %c0_19 = arith.constant 0 : index
    %c0_20 = arith.constant 0 : index
    %17 = vector.load %arg9[%c0_19, %c0_20] : memref<2x32xf32, #tpu.memory_space<vmem>>, vector<2x32xf32>
    %18 = vector.extract_strided_slice %16 {offsets = [0, 0], sizes = [2, 32], strides = [1, 1]} : vector<2x128xf32> to vector<2x32xf32>
    %19 = arith.negf %18 : vector<2x32xf32>
    %20 = math.exp %19 : vector<2x32xf32>
    %cst_21 = arith.constant 1.000000e+00 : f32
    %21 = vector.broadcast %cst_21 : f32 to vector<2x32xf32>
    %22 = arith.addf %21, %20 : vector<2x32xf32>
    %23 = arith.divf %21, %22 : vector<2x32xf32>
    %24 = vector.extract_strided_slice %16 {offsets = [0, 32], sizes = [2, 32], strides = [1, 1]} : vector<2x128xf32> to vector<2x32xf32>
    %25 = arith.negf %24 : vector<2x32xf32>
    %26 = math.exp %25 : vector<2x32xf32>
    %cst_22 = arith.constant 1.000000e+00 : f32
    %27 = vector.broadcast %cst_22 : f32 to vector<2x32xf32>
    %28 = arith.addf %27, %26 : vector<2x32xf32>
    %29 = arith.divf %27, %28 : vector<2x32xf32>
    %30 = vector.extract_strided_slice %16 {offsets = [0, 64], sizes = [2, 32], strides = [1, 1]} : vector<2x128xf32> to vector<2x32xf32>
    %31 = math.tanh %30 : vector<2x32xf32>
    %32 = vector.extract_strided_slice %16 {offsets = [0, 96], sizes = [2, 32], strides = [1, 1]} : vector<2x128xf32> to vector<2x32xf32>
    %33 = arith.negf %32 : vector<2x32xf32>
    %34 = math.exp %33 : vector<2x32xf32>
    %cst_23 = arith.constant 1.000000e+00 : f32
    %35 = vector.broadcast %cst_23 : f32 to vector<2x32xf32>
    %36 = arith.addf %35, %34 : vector<2x32xf32>
    %37 = arith.divf %35, %36 : vector<2x32xf32>
    %38 = arith.mulf %29, %17 : vector<2x32xf32>
    %39 = arith.mulf %23, %31 : vector<2x32xf32>
    %40 = arith.addf %38, %39 : vector<2x32xf32>
    %41 = math.tanh %40 : vector<2x32xf32>
    %42 = arith.mulf %37, %41 : vector<2x32xf32>
    %c0_24 = arith.constant 0 : index
    %c0_25 = arith.constant 0 : index
    %43 = vector.load %arg8[%c0_24, %c0_25] : memref<2x32xf32, #tpu.memory_space<vmem>>, vector<2x32xf32>
    tpu.vector_store %arg8[%c0_24, %c0_25], %42 {strides = array<i32>} : memref<2x32xf32, #tpu.memory_space<vmem>>, vector<2x32xf32>,
    %c0_26 = arith.constant 0 : index
    %c0_27 = arith.constant 0 : index
    %44 = vector.load %arg9[%c0_26, %c0_27] : memref<2x32xf32, #tpu.memory_space<vmem>>, vector<2x32xf32>
    tpu.vector_store %arg9[%c0_26, %c0_27], %40 {strides = array<i32>} : memref<2x32xf32, #tpu.memory_space<vmem>>, vector<2x32xf32>,
    %45 = arith.truncf %42 : vector<2x32xf32> to vector<2x32xbf16>
    %46 = arith.index_cast %c0_i32 : i32 to index
    %c0_28 = arith.constant 0 : index
    %c0_29 = arith.constant 0 : index
    %47 = vector.load %arg6[%46, %c0_28, %c0_29] : memref<8x2x64xbf16, #tpu.memory_space<vmem>>, vector<1x2x32xbf16>
    %48 = vector.shape_cast %47 : vector<1x2x32xbf16> to vector<2x32xbf16>
    %49 = vector.shape_cast %45 : vector<2x32xbf16> to vector<1x2x32xbf16>
    tpu.vector_store %arg6[%46, %c0_28, %c0_29], %49 {strides = array<i32>} : memref<8x2x64xbf16, #tpu.memory_space<vmem>>, vector<1x2x32xbf16>,
    %c7_i32 = arith.constant 7 : i32
    %50 = arith.subi %c7_i32, %c0_i32 : i32
    %51 = arith.index_cast %50 : i32 to index
    %c0_30 = arith.constant 0 : index
    %c0_31 = arith.constant 0 : index
    %52 = vector.load %arg1[%51, %c0_30, %c0_31] : memref<8x2x128xf32, #tpu.memory_space<vmem>>, vector<1x2x128xf32>
    %53 = vector.shape_cast %52 : vector<1x2x128xf32> to vector<2x128xf32>
    %c0_32 = arith.constant 0 : index
    %c0_33 = arith.constant 0 : index
    %54 = vector.load %arg10[%c0_32, %c0_33] : memref<2x32xf32, #tpu.memory_space<vmem>>, vector<2x32xf32>
    %55 = arith.truncf %54 : vector<2x32xf32> to vector<2x32xbf16>
    %cst_34 = arith.constant dense<0.000000e+00> : vector<2x128xf32>
    %56 = tpu.matmul %55, %9, %cst_34 {dimension_numbers = #tpu.dot_dimension_numbers<[1], [0], [0], [1], [0, 0, 1, 1], [], []>} : vector<2x32xbf16>, vector<32x128xbf16>, vector<2x128xf32> -> vector<2x128xf32>
    %57 = arith.addf %53, %56 : vector<2x128xf32>
    %c0_35 = arith.constant 0 : index
    %c0_36 = arith.constant 0 : index
    %58 = vector.load %arg11[%c0_35, %c0_36] : memref<2x32xf32, #tpu.memory_space<vmem>>, vector<2x32xf32>
    %59 = vector.extract_strided_slice %57 {offsets = [0, 0], sizes = [2, 32], strides = [1, 1]} : vector<2x128xf32> to vector<2x32xf32>
    %60 = arith.negf %59 : vector<2x32xf32>
    %61 = math.exp %60 : vector<2x32xf32>
    %cst_37 = arith.constant 1.000000e+00 : f32
    %62 = vector.broadcast %cst_37 : f32 to vector<2x32xf32>
    %63 = arith.addf %62, %61 : vector<2x32xf32>
    %64 = arith.divf %62, %63 : vector<2x32xf32>
    %65 = vector.extract_strided_slice %57 {offsets = [0, 32], sizes = [2, 32], strides = [1, 1]} : vector<2x128xf32> to vector<2x32xf32>
    %66 = arith.negf %65 : vector<2x32xf32>
    %67 = math.exp %66 : vector<2x32xf32>
    %cst_38 = arith.constant 1.000000e+00 : f32
    %68 = vector.broadcast %cst_38 : f32 to vector<2x32xf32>
    %69 = arith.addf %68, %67 : vector<2x32xf32>
    %70 = arith.divf %68, %69 : vector<2x32xf32>
    %71 = vector.extract_strided_slice %57 {offsets = [0, 64], sizes = [2, 32], strides = [1, 1]} : vector<2x128xf32> to vector<2x32xf32>
    %72 = math.tanh %71 : vector<2x32xf32>
    %73 = vector.extract_strided_slice %57 {offsets = [0, 96], sizes = [2, 32], strides = [1, 1]} : vector<2x128xf32> to vector<2x32xf32>
    %74 = arith.negf %73 : vector<2x32xf32>
    %75 = math.exp %74 : vector<2x32xf32>
    %cst_39 = arith.constant 1.000000e+00 : f32
    %76 = vector.broadcast %cst_39 : f32 to vector<2x32xf32>
    %77 = arith.addf %76, %75 : vector<2x32xf32>
    %78 = arith.divf %76, %77 : vector<2x32xf32>
    %79 = arith.mulf %70, %58 : vector<2x32xf32>
    %80 = arith.mulf %64, %72 : vector<2x32xf32>
    %81 = arith.addf %79, %80 : vector<2x32xf32>
    %82 = math.tanh %81 : vector<2x32xf32>
    %83 = arith.mulf %78, %82 : vector<2x32xf32>
    %c0_40 = arith.constant 0 : index
    %c0_41 = arith.constant 0 : index
    %84 = vector.load %arg10[%c0_40, %c0_41] : memref<2x32xf32, #tpu.memory_space<vmem>>, vector<2x32xf32>
    tpu.vector_store %arg10[%c0_40, %c0_41], %83 {strides = array<i32>} : memref<2x32xf32, #tpu.memory_space<vmem>>, vector<2x32xf32>,
    %c0_42 = arith.constant 0 : index
    %c0_43 = arith.constant 0 : index
    %85 = vector.load %arg11[%c0_42, %c0_43] : memref<2x32xf32, #tpu.memory_space<vmem>>, vector<2x32xf32>
    tpu.vector_store %arg11[%c0_42, %c0_43], %81 {strides = array<i32>} : memref<2x32xf32, #tpu.memory_space<vmem>>, vector<2x32xf32>,
    %86 = arith.truncf %83 : vector<2x32xf32> to vector<2x32xbf16>
    %87 = arith.index_cast %50 : i32 to index
    %c0_44 = arith.constant 0 : index
    %c32 = arith.constant 32 : index
    %88 = vector.load %arg6[%87, %c0_44, %c32] : memref<8x2x64xbf16, #tpu.memory_space<vmem>>, vector<1x2x32xbf16>
    %89 = vector.shape_cast %88 : vector<1x2x32xbf16> to vector<2x32xbf16>
    %90 = vector.shape_cast %86 : vector<2x32xbf16> to vector<1x2x32xbf16>
    tpu.vector_store %arg6[%87, %c0_44, %c32], %90 {strides = array<i32>} : memref<8x2x64xbf16, #tpu.memory_space<vmem>>, vector<1x2x32xbf16>,
    %c1_i32 = arith.constant 1 : i32
    %91 = arith.index_cast %c1_i32 : i32 to index
    %c0_45 = arith.constant 0 : index
    %c0_46 = arith.constant 0 : index
    %92 = vector.load %arg0[%91, %c0_45, %c0_46] : memref<8x2x128xf32, #tpu.memory_space<vmem>>, vector<1x2x128xf32>
    %93 = vector.shape_cast %92 : vector<1x2x128xf32> to vector<2x128xf32>
    %c0_47 = arith.constant 0 : index
    %c0_48 = arith.constant 0 : index
    %94 = vector.load %arg8[%c0_47, %c0_48] : memref<2x32xf32, #tpu.memory_space<vmem>>, vector<2x32xf32>
    %95 = arith.truncf %94 : vector<2x32xf32> to vector<2x32xbf16>
    %cst_49 = arith.constant dense<0.000000e+00> : vector<2x128xf32>
    %96 = tpu.matmul %95, %8, %cst_49 {dimension_numbers = #tpu.dot_dimension_numbers<[1], [0], [0], [1], [0, 0, 1, 1], [], []>} : vector<2x32xbf16>, vector<32x128xbf16>, vector<2x128xf32> -> vector<2x128xf32>
    %97 = arith.addf %93, %96 : vector<2x128xf32>
    %c0_50 = arith.constant 0 : index
    %c0_51 = arith.constant 0 : index
    %98 = vector.load %arg9[%c0_50, %c0_51] : memref<2x32xf32, #tpu.memory_space<vmem>>, vector<2x32xf32>
    %99 = vector.extract_strided_slice %97 {offsets = [0, 0], sizes = [2, 32], strides = [1, 1]} : vector<2x128xf32> to vector<2x32xf32>
    %100 = arith.negf %99 : vector<2x32xf32>
    %101 = math.exp %100 : vector<2x32xf32>
    %cst_52 = arith.constant 1.000000e+00 : f32
    %102 = vector.broadcast %cst_52 : f32 to vector<2x32xf32>
    %103 = arith.addf %102, %101 : vector<2x32xf32>
    %104 = arith.divf %102, %103 : vector<2x32xf32>
    %105 = vector.extract_strided_slice %97 {offsets = [0, 32], sizes = [2, 32], strides = [1, 1]} : vector<2x128xf32> to vector<2x32xf32>
    %106 = arith.negf %105 : vector<2x32xf32>
    %107 = math.exp %106 : vector<2x32xf32>
    %cst_53 = arith.constant 1.000000e+00 : f32
    %108 = vector.broadcast %cst_53 : f32 to vector<2x32xf32>
    %109 = arith.addf %108, %107 : vector<2x32xf32>
    %110 = arith.divf %108, %109 : vector<2x32xf32>
    %111 = vector.extract_strided_slice %97 {offsets = [0, 64], sizes = [2, 32], strides = [1, 1]} : vector<2x128xf32> to vector<2x32xf32>
    %112 = math.tanh %111 : vector<2x32xf32>
    %113 = vector.extract_strided_slice %97 {offsets = [0, 96], sizes = [2, 32], strides = [1, 1]} : vector<2x128xf32> to vector<2x32xf32>
    %114 = arith.negf %113 : vector<2x32xf32>
    %115 = math.exp %114 : vector<2x32xf32>
    %cst_54 = arith.constant 1.000000e+00 : f32
    %116 = vector.broadcast %cst_54 : f32 to vector<2x32xf32>
    %117 = arith.addf %116, %115 : vector<2x32xf32>
    %118 = arith.divf %116, %117 : vector<2x32xf32>
    %119 = arith.mulf %110, %98 : vector<2x32xf32>
    %120 = arith.mulf %104, %112 : vector<2x32xf32>
    %121 = arith.addf %119, %120 : vector<2x32xf32>
    %122 = math.tanh %121 : vector<2x32xf32>
    %123 = arith.mulf %118, %122 : vector<2x32xf32>
    %c0_55 = arith.constant 0 : index
    %c0_56 = arith.constant 0 : index
    %124 = vector.load %arg8[%c0_55, %c0_56] : memref<2x32xf32, #tpu.memory_space<vmem>>, vector<2x32xf32>
    tpu.vector_store %arg8[%c0_55, %c0_56], %123 {strides = array<i32>} : memref<2x32xf32, #tpu.memory_space<vmem>>, vector<2x32xf32>,
    %c0_57 = arith.constant 0 : index
    %c0_58 = arith.constant 0 : index
    %125 = vector.load %arg9[%c0_57, %c0_58] : memref<2x32xf32, #tpu.memory_space<vmem>>, vector<2x32xf32>
    tpu.vector_store %arg9[%c0_57, %c0_58], %121 {strides = array<i32>} : memref<2x32xf32, #tpu.memory_space<vmem>>, vector<2x32xf32>,
    %126 = arith.truncf %123 : vector<2x32xf32> to vector<2x32xbf16>
    %127 = arith.index_cast %c1_i32 : i32 to index
    %c0_59 = arith.constant 0 : index
    %c0_60 = arith.constant 0 : index
    %128 = vector.load %arg6[%127, %c0_59, %c0_60] : memref<8x2x64xbf16, #tpu.memory_space<vmem>>, vector<1x2x32xbf16>
    %129 = vector.shape_cast %128 : vector<1x2x32xbf16> to vector<2x32xbf16>
    %130 = vector.shape_cast %126 : vector<2x32xbf16> to vector<1x2x32xbf16>
    tpu.vector_store %arg6[%127, %c0_59, %c0_60], %130 {strides = array<i32>} : memref<8x2x64xbf16, #tpu.memory_space<vmem>>, vector<1x2x32xbf16>,
    %c7_i32_61 = arith.constant 7 : i32
    %131 = arith.subi %c7_i32_61, %c1_i32 : i32
    %132 = arith.index_cast %131 : i32 to index
    %c0_62 = arith.constant 0 : index
    %c0_63 = arith.constant 0 : index
    %133 = vector.load %arg1[%132, %c0_62, %c0_63] : memref<8x2x128xf32, #tpu.memory_space<vmem>>, vector<1x2x128xf32>
    %134 = vector.shape_cast %133 : vector<1x2x128xf32> to vector<2x128xf32>
    %c0_64 = arith.constant 0 : index
    %c0_65 = arith.constant 0 : index
    %135 = vector.load %arg10[%c0_64, %c0_65] : memref<2x32xf32, #tpu.memory_space<vmem>>, vector<2x32xf32>
    %136 = arith.truncf %135 : vector<2x32xf32> to vector<2x32xbf16>
    %cst_66 = arith.constant dense<0.000000e+00> : vector<2x128xf32>
    %137 = tpu.matmul %136, %9, %cst_66 {dimension_numbers = #tpu.dot_dimension_numbers<[1], [0], [0], [1], [0, 0, 1, 1], [], []>} : vector<2x32xbf16>, vector<32x128xbf16>, vector<2x128xf32> -> vector<2x128xf32>
    %138 = arith.addf %134, %137 : vector<2x128xf32>
    %c0_67 = arith.constant 0 : index
    %c0_68 = arith.constant 0 : index
    %139 = vector.load %arg11[%c0_67, %c0_68] : memref<2x32xf32, #tpu.memory_space<vmem>>, vector<2x32xf32>
    %140 = vector.extract_strided_slice %138 {offsets = [0, 0], sizes = [2, 32], strides = [1, 1]} : vector<2x128xf32> to vector<2x32xf32>
    %141 = arith.negf %140 : vector<2x32xf32>
    %142 = math.exp %141 : vector<2x32xf32>
    %cst_69 = arith.constant 1.000000e+00 : f32
    %143 = vector.broadcast %cst_69 : f32 to vector<2x32xf32>
    %144 = arith.addf %143, %142 : vector<2x32xf32>
    %145 = arith.divf %143, %144 : vector<2x32xf32>
    %146 = vector.extract_strided_slice %138 {offsets = [0, 32], sizes = [2, 32], strides = [1, 1]} : vector<2x128xf32> to vector<2x32xf32>
    %147 = arith.negf %146 : vector<2x32xf32>
    %148 = math.exp %147 : vector<2x32xf32>
    %cst_70 = arith.constant 1.000000e+00 : f32
    %149 = vector.broadcast %cst_70 : f32 to vector<2x32xf32>
    %150 = arith.addf %149, %148 : vector<2x32xf32>
    %151 = arith.divf %149, %150 : vector<2x32xf32>
    %152 = vector.extract_strided_slice %138 {offsets = [0, 64], sizes = [2, 32], strides = [1, 1]} : vector<2x128xf32> to vector<2x32xf32>
    %153 = math.tanh %152 : vector<2x32xf32>
    %154 = vector.extract_strided_slice %138 {offsets = [0, 96], sizes = [2, 32], strides = [1, 1]} : vector<2x128xf32> to vector<2x32xf32>
    %155 = arith.negf %154 : vector<2x32xf32>
    %156 = math.exp %155 : vector<2x32xf32>
    %cst_71 = arith.constant 1.000000e+00 : f32
    %157 = vector.broadcast %cst_71 : f32 to vector<2x32xf32>
    %158 = arith.addf %157, %156 : vector<2x32xf32>
    %159 = arith.divf %157, %158 : vector<2x32xf32>
    %160 = arith.mulf %151, %139 : vector<2x32xf32>
    %161 = arith.mulf %145, %153 : vector<2x32xf32>
    %162 = arith.addf %160, %161 : vector<2x32xf32>
    %163 = math.tanh %162 : vector<2x32xf32>
    %164 = arith.mulf %159, %163 : vector<2x32xf32>
    %c0_72 = arith.constant 0 : index
    %c0_73 = arith.constant 0 : index
    %165 = vector.load %arg10[%c0_72, %c0_73] : memref<2x32xf32, #tpu.memory_space<vmem>>, vector<2x32xf32>
    tpu.vector_store %arg10[%c0_72, %c0_73], %164 {strides = array<i32>} : memref<2x32xf32, #tpu.memory_space<vmem>>, vector<2x32xf32>,
    %c0_74 = arith.constant 0 : index
    %c0_75 = arith.constant 0 : index
    %166 = vector.load %arg11[%c0_74, %c0_75] : memref<2x32xf32, #tpu.memory_space<vmem>>, vector<2x32xf32>
    tpu.vector_store %arg11[%c0_74, %c0_75], %162 {strides = array<i32>} : memref<2x32xf32, #tpu.memory_space<vmem>>, vector<2x32xf32>,
    %167 = arith.truncf %164 : vector<2x32xf32> to vector<2x32xbf16>
    %168 = arith.index_cast %131 : i32 to index
    %c0_76 = arith.constant 0 : index
    %c32_77 = arith.constant 32 : index
    %169 = vector.load %arg6[%168, %c0_76, %c32_77] : memref<8x2x64xbf16, #tpu.memory_space<vmem>>, vector<1x2x32xbf16>
    %170 = vector.shape_cast %169 : vector<1x2x32xbf16> to vector<2x32xbf16>
    %171 = vector.shape_cast %167 : vector<2x32xbf16> to vector<1x2x32xbf16>
    tpu.vector_store %arg6[%168, %c0_76, %c32_77], %171 {strides = array<i32>} : memref<8x2x64xbf16, #tpu.memory_space<vmem>>, vector<1x2x32xbf16>,
    %c2_i32 = arith.constant 2 : i32
    %172 = arith.index_cast %c2_i32 : i32 to index
    %c0_78 = arith.constant 0 : index
    %c0_79 = arith.constant 0 : index
    %173 = vector.load %arg0[%172, %c0_78, %c0_79] : memref<8x2x128xf32, #tpu.memory_space<vmem>>, vector<1x2x128xf32>
    %174 = vector.shape_cast %173 : vector<1x2x128xf32> to vector<2x128xf32>
    %c0_80 = arith.constant 0 : index
    %c0_81 = arith.constant 0 : index
    %175 = vector.load %arg8[%c0_80, %c0_81] : memref<2x32xf32, #tpu.memory_space<vmem>>, vector<2x32xf32>
    %176 = arith.truncf %175 : vector<2x32xf32> to vector<2x32xbf16>
    %cst_82 = arith.constant dense<0.000000e+00> : vector<2x128xf32>
    %177 = tpu.matmul %176, %8, %cst_82 {dimension_numbers = #tpu.dot_dimension_numbers<[1], [0], [0], [1], [0, 0, 1, 1], [], []>} : vector<2x32xbf16>, vector<32x128xbf16>, vector<2x128xf32> -> vector<2x128xf32>
    %178 = arith.addf %174, %177 : vector<2x128xf32>
    %c0_83 = arith.constant 0 : index
    %c0_84 = arith.constant 0 : index
    %179 = vector.load %arg9[%c0_83, %c0_84] : memref<2x32xf32, #tpu.memory_space<vmem>>, vector<2x32xf32>
    %180 = vector.extract_strided_slice %178 {offsets = [0, 0], sizes = [2, 32], strides = [1, 1]} : vector<2x128xf32> to vector<2x32xf32>
    %181 = arith.negf %180 : vector<2x32xf32>
    %182 = math.exp %181 : vector<2x32xf32>
    %cst_85 = arith.constant 1.000000e+00 : f32
    %183 = vector.broadcast %cst_85 : f32 to vector<2x32xf32>
    %184 = arith.addf %183, %182 : vector<2x32xf32>
    %185 = arith.divf %183, %184 : vector<2x32xf32>
    %186 = vector.extract_strided_slice %178 {offsets = [0, 32], sizes = [2, 32], strides = [1, 1]} : vector<2x128xf32> to vector<2x32xf32>
    %187 = arith.negf %186 : vector<2x32xf32>
    %188 = math.exp %187 : vector<2x32xf32>
    %cst_86 = arith.constant 1.000000e+00 : f32
    %189 = vector.broadcast %cst_86 : f32 to vector<2x32xf32>
    %190 = arith.addf %189, %188 : vector<2x32xf32>
    %191 = arith.divf %189, %190 : vector<2x32xf32>
    %192 = vector.extract_strided_slice %178 {offsets = [0, 64], sizes = [2, 32], strides = [1, 1]} : vector<2x128xf32> to vector<2x32xf32>
    %193 = math.tanh %192 : vector<2x32xf32>
    %194 = vector.extract_strided_slice %178 {offsets = [0, 96], sizes = [2, 32], strides = [1, 1]} : vector<2x128xf32> to vector<2x32xf32>
    %195 = arith.negf %194 : vector<2x32xf32>
    %196 = math.exp %195 : vector<2x32xf32>
    %cst_87 = arith.constant 1.000000e+00 : f32
    %197 = vector.broadcast %cst_87 : f32 to vector<2x32xf32>
    %198 = arith.addf %197, %196 : vector<2x32xf32>
    %199 = arith.divf %197, %198 : vector<2x32xf32>
    %200 = arith.mulf %191, %179 : vector<2x32xf32>
    %201 = arith.mulf %185, %193 : vector<2x32xf32>
    %202 = arith.addf %200, %201 : vector<2x32xf32>
    %203 = math.tanh %202 : vector<2x32xf32>
    %204 = arith.mulf %199, %203 : vector<2x32xf32>
    %c0_88 = arith.constant 0 : index
    %c0_89 = arith.constant 0 : index
    %205 = vector.load %arg8[%c0_88, %c0_89] : memref<2x32xf32, #tpu.memory_space<vmem>>, vector<2x32xf32>
    tpu.vector_store %arg8[%c0_88, %c0_89], %204 {strides = array<i32>} : memref<2x32xf32, #tpu.memory_space<vmem>>, vector<2x32xf32>,
    %c0_90 = arith.constant 0 : index
    %c0_91 = arith.constant 0 : index
    %206 = vector.load %arg9[%c0_90, %c0_91] : memref<2x32xf32, #tpu.memory_space<vmem>>, vector<2x32xf32>
    tpu.vector_store %arg9[%c0_90, %c0_91], %202 {strides = array<i32>} : memref<2x32xf32, #tpu.memory_space<vmem>>, vector<2x32xf32>,
    %207 = arith.truncf %204 : vector<2x32xf32> to vector<2x32xbf16>
    %208 = arith.index_cast %c2_i32 : i32 to index
    %c0_92 = arith.constant 0 : index
    %c0_93 = arith.constant 0 : index
    %209 = vector.load %arg6[%208, %c0_92, %c0_93] : memref<8x2x64xbf16, #tpu.memory_space<vmem>>, vector<1x2x32xbf16>
    %210 = vector.shape_cast %209 : vector<1x2x32xbf16> to vector<2x32xbf16>
    %211 = vector.shape_cast %207 : vector<2x32xbf16> to vector<1x2x32xbf16>
    tpu.vector_store %arg6[%208, %c0_92, %c0_93], %211 {strides = array<i32>} : memref<8x2x64xbf16, #tpu.memory_space<vmem>>, vector<1x2x32xbf16>,
    %c7_i32_94 = arith.constant 7 : i32
    %212 = arith.subi %c7_i32_94, %c2_i32 : i32
    %213 = arith.index_cast %212 : i32 to index
    %c0_95 = arith.constant 0 : index
    %c0_96 = arith.constant 0 : index
    %214 = vector.load %arg1[%213, %c0_95, %c0_96] : memref<8x2x128xf32, #tpu.memory_space<vmem>>, vector<1x2x128xf32>
    %215 = vector.shape_cast %214 : vector<1x2x128xf32> to vector<2x128xf32>
    %c0_97 = arith.constant 0 : index
    %c0_98 = arith.constant 0 : index
    %216 = vector.load %arg10[%c0_97, %c0_98] : memref<2x32xf32, #tpu.memory_space<vmem>>, vector<2x32xf32>
    %217 = arith.truncf %216 : vector<2x32xf32> to vector<2x32xbf16>
    %cst_99 = arith.constant dense<0.000000e+00> : vector<2x128xf32>
    %218 = tpu.matmul %217, %9, %cst_99 {dimension_numbers = #tpu.dot_dimension_numbers<[1], [0], [0], [1], [0, 0, 1, 1], [], []>} : vector<2x32xbf16>, vector<32x128xbf16>, vector<2x128xf32> -> vector<2x128xf32>
    %219 = arith.addf %215, %218 : vector<2x128xf32>
    %c0_100 = arith.constant 0 : index
    %c0_101 = arith.constant 0 : index
    %220 = vector.load %arg11[%c0_100, %c0_101] : memref<2x32xf32, #tpu.memory_space<vmem>>, vector<2x32xf32>
    %221 = vector.extract_strided_slice %219 {offsets = [0, 0], sizes = [2, 32], strides = [1, 1]} : vector<2x128xf32> to vector<2x32xf32>
    %222 = arith.negf %221 : vector<2x32xf32>
    %223 = math.exp %222 : vector<2x32xf32>
    %cst_102 = arith.constant 1.000000e+00 : f32
    %224 = vector.broadcast %cst_102 : f32 to vector<2x32xf32>
    %225 = arith.addf %224, %223 : vector<2x32xf32>
    %226 = arith.divf %224, %225 : vector<2x32xf32>
    %227 = vector.extract_strided_slice %219 {offsets = [0, 32], sizes = [2, 32], strides = [1, 1]} : vector<2x128xf32> to vector<2x32xf32>
    %228 = arith.negf %227 : vector<2x32xf32>
    %229 = math.exp %228 : vector<2x32xf32>
    %cst_103 = arith.constant 1.000000e+00 : f32
    %230 = vector.broadcast %cst_103 : f32 to vector<2x32xf32>
    %231 = arith.addf %230, %229 : vector<2x32xf32>
    %232 = arith.divf %230, %231 : vector<2x32xf32>
    %233 = vector.extract_strided_slice %219 {offsets = [0, 64], sizes = [2, 32], strides = [1, 1]} : vector<2x128xf32> to vector<2x32xf32>
    %234 = math.tanh %233 : vector<2x32xf32>
    %235 = vector.extract_strided_slice %219 {offsets = [0, 96], sizes = [2, 32], strides = [1, 1]} : vector<2x128xf32> to vector<2x32xf32>
    %236 = arith.negf %235 : vector<2x32xf32>
    %237 = math.exp %236 : vector<2x32xf32>
    %cst_104 = arith.constant 1.000000e+00 : f32
    %238 = vector.broadcast %cst_104 : f32 to vector<2x32xf32>
    %239 = arith.addf %238, %237 : vector<2x32xf32>
    %240 = arith.divf %238, %239 : vector<2x32xf32>
    %241 = arith.mulf %232, %220 : vector<2x32xf32>
    %242 = arith.mulf %226, %234 : vector<2x32xf32>
    %243 = arith.addf %241, %242 : vector<2x32xf32>
    %244 = math.tanh %243 : vector<2x32xf32>
    %245 = arith.mulf %240, %244 : vector<2x32xf32>
    %c0_105 = arith.constant 0 : index
    %c0_106 = arith.constant 0 : index
    %246 = vector.load %arg10[%c0_105, %c0_106] : memref<2x32xf32, #tpu.memory_space<vmem>>, vector<2x32xf32>
    tpu.vector_store %arg10[%c0_105, %c0_106], %245 {strides = array<i32>} : memref<2x32xf32, #tpu.memory_space<vmem>>, vector<2x32xf32>,
    %c0_107 = arith.constant 0 : index
    %c0_108 = arith.constant 0 : index
    %247 = vector.load %arg11[%c0_107, %c0_108] : memref<2x32xf32, #tpu.memory_space<vmem>>, vector<2x32xf32>
    tpu.vector_store %arg11[%c0_107, %c0_108], %243 {strides = array<i32>} : memref<2x32xf32, #tpu.memory_space<vmem>>, vector<2x32xf32>,
    %248 = arith.truncf %245 : vector<2x32xf32> to vector<2x32xbf16>
    %249 = arith.index_cast %212 : i32 to index
    %c0_109 = arith.constant 0 : index
    %c32_110 = arith.constant 32 : index
    %250 = vector.load %arg6[%249, %c0_109, %c32_110] : memref<8x2x64xbf16, #tpu.memory_space<vmem>>, vector<1x2x32xbf16>
    %251 = vector.shape_cast %250 : vector<1x2x32xbf16> to vector<2x32xbf16>
    %252 = vector.shape_cast %248 : vector<2x32xbf16> to vector<1x2x32xbf16>
    tpu.vector_store %arg6[%249, %c0_109, %c32_110], %252 {strides = array<i32>} : memref<8x2x64xbf16, #tpu.memory_space<vmem>>, vector<1x2x32xbf16>,
    %c3_i32 = arith.constant 3 : i32
    %253 = arith.index_cast %c3_i32 : i32 to index
    %c0_111 = arith.constant 0 : index
    %c0_112 = arith.constant 0 : index
    %254 = vector.load %arg0[%253, %c0_111, %c0_112] : memref<8x2x128xf32, #tpu.memory_space<vmem>>, vector<1x2x128xf32>
    %255 = vector.shape_cast %254 : vector<1x2x128xf32> to vector<2x128xf32>
    %c0_113 = arith.constant 0 : index
    %c0_114 = arith.constant 0 : index
    %256 = vector.load %arg8[%c0_113, %c0_114] : memref<2x32xf32, #tpu.memory_space<vmem>>, vector<2x32xf32>
    %257 = arith.truncf %256 : vector<2x32xf32> to vector<2x32xbf16>
    %cst_115 = arith.constant dense<0.000000e+00> : vector<2x128xf32>
    %258 = tpu.matmul %257, %8, %cst_115 {dimension_numbers = #tpu.dot_dimension_numbers<[1], [0], [0], [1], [0, 0, 1, 1], [], []>} : vector<2x32xbf16>, vector<32x128xbf16>, vector<2x128xf32> -> vector<2x128xf32>
    %259 = arith.addf %255, %258 : vector<2x128xf32>
    %c0_116 = arith.constant 0 : index
    %c0_117 = arith.constant 0 : index
    %260 = vector.load %arg9[%c0_116, %c0_117] : memref<2x32xf32, #tpu.memory_space<vmem>>, vector<2x32xf32>
    %261 = vector.extract_strided_slice %259 {offsets = [0, 0], sizes = [2, 32], strides = [1, 1]} : vector<2x128xf32> to vector<2x32xf32>
    %262 = arith.negf %261 : vector<2x32xf32>
    %263 = math.exp %262 : vector<2x32xf32>
    %cst_118 = arith.constant 1.000000e+00 : f32
    %264 = vector.broadcast %cst_118 : f32 to vector<2x32xf32>
    %265 = arith.addf %264, %263 : vector<2x32xf32>
    %266 = arith.divf %264, %265 : vector<2x32xf32>
    %267 = vector.extract_strided_slice %259 {offsets = [0, 32], sizes = [2, 32], strides = [1, 1]} : vector<2x128xf32> to vector<2x32xf32>
    %268 = arith.negf %267 : vector<2x32xf32>
    %269 = math.exp %268 : vector<2x32xf32>
    %cst_119 = arith.constant 1.000000e+00 : f32
    %270 = vector.broadcast %cst_119 : f32 to vector<2x32xf32>
    %271 = arith.addf %270, %269 : vector<2x32xf32>
    %272 = arith.divf %270, %271 : vector<2x32xf32>
    %273 = vector.extract_strided_slice %259 {offsets = [0, 64], sizes = [2, 32], strides = [1, 1]} : vector<2x128xf32> to vector<2x32xf32>
    %274 = math.tanh %273 : vector<2x32xf32>
    %275 = vector.extract_strided_slice %259 {offsets = [0, 96], sizes = [2, 32], strides = [1, 1]} : vector<2x128xf32> to vector<2x32xf32>
    %276 = arith.negf %275 : vector<2x32xf32>
    %277 = math.exp %276 : vector<2x32xf32>
    %cst_120 = arith.constant 1.000000e+00 : f32
    %278 = vector.broadcast %cst_120 : f32 to vector<2x32xf32>
    %279 = arith.addf %278, %277 : vector<2x32xf32>
    %280 = arith.divf %278, %279 : vector<2x32xf32>
    %281 = arith.mulf %272, %260 : vector<2x32xf32>
    %282 = arith.mulf %266, %274 : vector<2x32xf32>
    %283 = arith.addf %281, %282 : vector<2x32xf32>
    %284 = math.tanh %283 : vector<2x32xf32>
    %285 = arith.mulf %280, %284 : vector<2x32xf32>
    %c0_121 = arith.constant 0 : index
    %c0_122 = arith.constant 0 : index
    %286 = vector.load %arg8[%c0_121, %c0_122] : memref<2x32xf32, #tpu.memory_space<vmem>>, vector<2x32xf32>
    tpu.vector_store %arg8[%c0_121, %c0_122], %285 {strides = array<i32>} : memref<2x32xf32, #tpu.memory_space<vmem>>, vector<2x32xf32>,
    %c0_123 = arith.constant 0 : index
    %c0_124 = arith.constant 0 : index
    %287 = vector.load %arg9[%c0_123, %c0_124] : memref<2x32xf32, #tpu.memory_space<vmem>>, vector<2x32xf32>
    tpu.vector_store %arg9[%c0_123, %c0_124], %283 {strides = array<i32>} : memref<2x32xf32, #tpu.memory_space<vmem>>, vector<2x32xf32>,
    %288 = arith.truncf %285 : vector<2x32xf32> to vector<2x32xbf16>
    %289 = arith.index_cast %c3_i32 : i32 to index
    %c0_125 = arith.constant 0 : index
    %c0_126 = arith.constant 0 : index
    %290 = vector.load %arg6[%289, %c0_125, %c0_126] : memref<8x2x64xbf16, #tpu.memory_space<vmem>>, vector<1x2x32xbf16>
    %291 = vector.shape_cast %290 : vector<1x2x32xbf16> to vector<2x32xbf16>
    %292 = vector.shape_cast %288 : vector<2x32xbf16> to vector<1x2x32xbf16>
    tpu.vector_store %arg6[%289, %c0_125, %c0_126], %292 {strides = array<i32>} : memref<8x2x64xbf16, #tpu.memory_space<vmem>>, vector<1x2x32xbf16>,
    %c7_i32_127 = arith.constant 7 : i32
    %293 = arith.subi %c7_i32_127, %c3_i32 : i32
    %294 = arith.index_cast %293 : i32 to index
    %c0_128 = arith.constant 0 : index
    %c0_129 = arith.constant 0 : index
    %295 = vector.load %arg1[%294, %c0_128, %c0_129] : memref<8x2x128xf32, #tpu.memory_space<vmem>>, vector<1x2x128xf32>
    %296 = vector.shape_cast %295 : vector<1x2x128xf32> to vector<2x128xf32>
    %c0_130 = arith.constant 0 : index
    %c0_131 = arith.constant 0 : index
    %297 = vector.load %arg10[%c0_130, %c0_131] : memref<2x32xf32, #tpu.memory_space<vmem>>, vector<2x32xf32>
    %298 = arith.truncf %297 : vector<2x32xf32> to vector<2x32xbf16>
    %cst_132 = arith.constant dense<0.000000e+00> : vector<2x128xf32>
    %299 = tpu.matmul %298, %9, %cst_132 {dimension_numbers = #tpu.dot_dimension_numbers<[1], [0], [0], [1], [0, 0, 1, 1], [], []>} : vector<2x32xbf16>, vector<32x128xbf16>, vector<2x128xf32> -> vector<2x128xf32>
    %300 = arith.addf %296, %299 : vector<2x128xf32>
    %c0_133 = arith.constant 0 : index
    %c0_134 = arith.constant 0 : index
    %301 = vector.load %arg11[%c0_133, %c0_134] : memref<2x32xf32, #tpu.memory_space<vmem>>, vector<2x32xf32>
    %302 = vector.extract_strided_slice %300 {offsets = [0, 0], sizes = [2, 32], strides = [1, 1]} : vector<2x128xf32> to vector<2x32xf32>
    %303 = arith.negf %302 : vector<2x32xf32>
    %304 = math.exp %303 : vector<2x32xf32>
    %cst_135 = arith.constant 1.000000e+00 : f32
    %305 = vector.broadcast %cst_135 : f32 to vector<2x32xf32>
    %306 = arith.addf %305, %304 : vector<2x32xf32>
    %307 = arith.divf %305, %306 : vector<2x32xf32>
    %308 = vector.extract_strided_slice %300 {offsets = [0, 32], sizes = [2, 32], strides = [1, 1]} : vector<2x128xf32> to vector<2x32xf32>
    %309 = arith.negf %308 : vector<2x32xf32>
    %310 = math.exp %309 : vector<2x32xf32>
    %cst_136 = arith.constant 1.000000e+00 : f32
    %311 = vector.broadcast %cst_136 : f32 to vector<2x32xf32>
    %312 = arith.addf %311, %310 : vector<2x32xf32>
    %313 = arith.divf %311, %312 : vector<2x32xf32>
    %314 = vector.extract_strided_slice %300 {offsets = [0, 64], sizes = [2, 32], strides = [1, 1]} : vector<2x128xf32> to vector<2x32xf32>
    %315 = math.tanh %314 : vector<2x32xf32>
    %316 = vector.extract_strided_slice %300 {offsets = [0, 96], sizes = [2, 32], strides = [1, 1]} : vector<2x128xf32> to vector<2x32xf32>
    %317 = arith.negf %316 : vector<2x32xf32>
    %318 = math.exp %317 : vector<2x32xf32>
    %cst_137 = arith.constant 1.000000e+00 : f32
    %319 = vector.broadcast %cst_137 : f32 to vector<2x32xf32>
    %320 = arith.addf %319, %318 : vector<2x32xf32>
    %321 = arith.divf %319, %320 : vector<2x32xf32>
    %322 = arith.mulf %313, %301 : vector<2x32xf32>
    %323 = arith.mulf %307, %315 : vector<2x32xf32>
    %324 = arith.addf %322, %323 : vector<2x32xf32>
    %325 = math.tanh %324 : vector<2x32xf32>
    %326 = arith.mulf %321, %325 : vector<2x32xf32>
    %c0_138 = arith.constant 0 : index
    %c0_139 = arith.constant 0 : index
    %327 = vector.load %arg10[%c0_138, %c0_139] : memref<2x32xf32, #tpu.memory_space<vmem>>, vector<2x32xf32>
    tpu.vector_store %arg10[%c0_138, %c0_139], %326 {strides = array<i32>} : memref<2x32xf32, #tpu.memory_space<vmem>>, vector<2x32xf32>,
    %c0_140 = arith.constant 0 : index
    %c0_141 = arith.constant 0 : index
    %328 = vector.load %arg11[%c0_140, %c0_141] : memref<2x32xf32, #tpu.memory_space<vmem>>, vector<2x32xf32>
    tpu.vector_store %arg11[%c0_140, %c0_141], %324 {strides = array<i32>} : memref<2x32xf32, #tpu.memory_space<vmem>>, vector<2x32xf32>,
    %329 = arith.truncf %326 : vector<2x32xf32> to vector<2x32xbf16>
    %330 = arith.index_cast %293 : i32 to index
    %c0_142 = arith.constant 0 : index
    %c32_143 = arith.constant 32 : index
    %331 = vector.load %arg6[%330, %c0_142, %c32_143] : memref<8x2x64xbf16, #tpu.memory_space<vmem>>, vector<1x2x32xbf16>
    %332 = vector.shape_cast %331 : vector<1x2x32xbf16> to vector<2x32xbf16>
    %333 = vector.shape_cast %329 : vector<2x32xbf16> to vector<1x2x32xbf16>
    tpu.vector_store %arg6[%330, %c0_142, %c32_143], %333 {strides = array<i32>} : memref<8x2x64xbf16, #tpu.memory_space<vmem>>, vector<1x2x32xbf16>,
    %c4_i32 = arith.constant 4 : i32
    %334 = arith.index_cast %c4_i32 : i32 to index
    %c0_144 = arith.constant 0 : index
    %c0_145 = arith.constant 0 : index
    %335 = vector.load %arg0[%334, %c0_144, %c0_145] : memref<8x2x128xf32, #tpu.memory_space<vmem>>, vector<1x2x128xf32>
    %336 = vector.shape_cast %335 : vector<1x2x128xf32> to vector<2x128xf32>
    %c0_146 = arith.constant 0 : index
    %c0_147 = arith.constant 0 : index
    %337 = vector.load %arg8[%c0_146, %c0_147] : memref<2x32xf32, #tpu.memory_space<vmem>>, vector<2x32xf32>
    %338 = arith.truncf %337 : vector<2x32xf32> to vector<2x32xbf16>
    %cst_148 = arith.constant dense<0.000000e+00> : vector<2x128xf32>
    %339 = tpu.matmul %338, %8, %cst_148 {dimension_numbers = #tpu.dot_dimension_numbers<[1], [0], [0], [1], [0, 0, 1, 1], [], []>} : vector<2x32xbf16>, vector<32x128xbf16>, vector<2x128xf32> -> vector<2x128xf32>
    %340 = arith.addf %336, %339 : vector<2x128xf32>
    %c0_149 = arith.constant 0 : index
    %c0_150 = arith.constant 0 : index
    %341 = vector.load %arg9[%c0_149, %c0_150] : memref<2x32xf32, #tpu.memory_space<vmem>>, vector<2x32xf32>
    %342 = vector.extract_strided_slice %340 {offsets = [0, 0], sizes = [2, 32], strides = [1, 1]} : vector<2x128xf32> to vector<2x32xf32>
    %343 = arith.negf %342 : vector<2x32xf32>
    %344 = math.exp %343 : vector<2x32xf32>
    %cst_151 = arith.constant 1.000000e+00 : f32
    %345 = vector.broadcast %cst_151 : f32 to vector<2x32xf32>
    %346 = arith.addf %345, %344 : vector<2x32xf32>
    %347 = arith.divf %345, %346 : vector<2x32xf32>
    %348 = vector.extract_strided_slice %340 {offsets = [0, 32], sizes = [2, 32], strides = [1, 1]} : vector<2x128xf32> to vector<2x32xf32>
    %349 = arith.negf %348 : vector<2x32xf32>
    %350 = math.exp %349 : vector<2x32xf32>
    %cst_152 = arith.constant 1.000000e+00 : f32
    %351 = vector.broadcast %cst_152 : f32 to vector<2x32xf32>
    %352 = arith.addf %351, %350 : vector<2x32xf32>
    %353 = arith.divf %351, %352 : vector<2x32xf32>
    %354 = vector.extract_strided_slice %340 {offsets = [0, 64], sizes = [2, 32], strides = [1, 1]} : vector<2x128xf32> to vector<2x32xf32>
    %355 = math.tanh %354 : vector<2x32xf32>
    %356 = vector.extract_strided_slice %340 {offsets = [0, 96], sizes = [2, 32], strides = [1, 1]} : vector<2x128xf32> to vector<2x32xf32>
    %357 = arith.negf %356 : vector<2x32xf32>
    %358 = math.exp %357 : vector<2x32xf32>
    %cst_153 = arith.constant 1.000000e+00 : f32
    %359 = vector.broadcast %cst_153 : f32 to vector<2x32xf32>
    %360 = arith.addf %359, %358 : vector<2x32xf32>
    %361 = arith.divf %359, %360 : vector<2x32xf32>
    %362 = arith.mulf %353, %341 : vector<2x32xf32>
    %363 = arith.mulf %347, %355 : vector<2x32xf32>
    %364 = arith.addf %362, %363 : vector<2x32xf32>
    %365 = math.tanh %364 : vector<2x32xf32>
    %366 = arith.mulf %361, %365 : vector<2x32xf32>
    %c0_154 = arith.constant 0 : index
    %c0_155 = arith.constant 0 : index
    %367 = vector.load %arg8[%c0_154, %c0_155] : memref<2x32xf32, #tpu.memory_space<vmem>>, vector<2x32xf32>
    tpu.vector_store %arg8[%c0_154, %c0_155], %366 {strides = array<i32>} : memref<2x32xf32, #tpu.memory_space<vmem>>, vector<2x32xf32>,
    %c0_156 = arith.constant 0 : index
    %c0_157 = arith.constant 0 : index
    %368 = vector.load %arg9[%c0_156, %c0_157] : memref<2x32xf32, #tpu.memory_space<vmem>>, vector<2x32xf32>
    tpu.vector_store %arg9[%c0_156, %c0_157], %364 {strides = array<i32>} : memref<2x32xf32, #tpu.memory_space<vmem>>, vector<2x32xf32>,
    %369 = arith.truncf %366 : vector<2x32xf32> to vector<2x32xbf16>
    %370 = arith.index_cast %c4_i32 : i32 to index
    %c0_158 = arith.constant 0 : index
    %c0_159 = arith.constant 0 : index
    %371 = vector.load %arg6[%370, %c0_158, %c0_159] : memref<8x2x64xbf16, #tpu.memory_space<vmem>>, vector<1x2x32xbf16>
    %372 = vector.shape_cast %371 : vector<1x2x32xbf16> to vector<2x32xbf16>
    %373 = vector.shape_cast %369 : vector<2x32xbf16> to vector<1x2x32xbf16>
    tpu.vector_store %arg6[%370, %c0_158, %c0_159], %373 {strides = array<i32>} : memref<8x2x64xbf16, #tpu.memory_space<vmem>>, vector<1x2x32xbf16>,
    %c7_i32_160 = arith.constant 7 : i32
    %374 = arith.subi %c7_i32_160, %c4_i32 : i32
    %375 = arith.index_cast %374 : i32 to index
    %c0_161 = arith.constant 0 : index
    %c0_162 = arith.constant 0 : index
    %376 = vector.load %arg1[%375, %c0_161, %c0_162] : memref<8x2x128xf32, #tpu.memory_space<vmem>>, vector<1x2x128xf32>
    %377 = vector.shape_cast %376 : vector<1x2x128xf32> to vector<2x128xf32>
    %c0_163 = arith.constant 0 : index
    %c0_164 = arith.constant 0 : index
    %378 = vector.load %arg10[%c0_163, %c0_164] : memref<2x32xf32, #tpu.memory_space<vmem>>, vector<2x32xf32>
    %379 = arith.truncf %378 : vector<2x32xf32> to vector<2x32xbf16>
    %cst_165 = arith.constant dense<0.000000e+00> : vector<2x128xf32>
    %380 = tpu.matmul %379, %9, %cst_165 {dimension_numbers = #tpu.dot_dimension_numbers<[1], [0], [0], [1], [0, 0, 1, 1], [], []>} : vector<2x32xbf16>, vector<32x128xbf16>, vector<2x128xf32> -> vector<2x128xf32>
    %381 = arith.addf %377, %380 : vector<2x128xf32>
    %c0_166 = arith.constant 0 : index
    %c0_167 = arith.constant 0 : index
    %382 = vector.load %arg11[%c0_166, %c0_167] : memref<2x32xf32, #tpu.memory_space<vmem>>, vector<2x32xf32>
    %383 = vector.extract_strided_slice %381 {offsets = [0, 0], sizes = [2, 32], strides = [1, 1]} : vector<2x128xf32> to vector<2x32xf32>
    %384 = arith.negf %383 : vector<2x32xf32>
    %385 = math.exp %384 : vector<2x32xf32>
    %cst_168 = arith.constant 1.000000e+00 : f32
    %386 = vector.broadcast %cst_168 : f32 to vector<2x32xf32>
    %387 = arith.addf %386, %385 : vector<2x32xf32>
    %388 = arith.divf %386, %387 : vector<2x32xf32>
    %389 = vector.extract_strided_slice %381 {offsets = [0, 32], sizes = [2, 32], strides = [1, 1]} : vector<2x128xf32> to vector<2x32xf32>
    %390 = arith.negf %389 : vector<2x32xf32>
    %391 = math.exp %390 : vector<2x32xf32>
    %cst_169 = arith.constant 1.000000e+00 : f32
    %392 = vector.broadcast %cst_169 : f32 to vector<2x32xf32>
    %393 = arith.addf %392, %391 : vector<2x32xf32>
    %394 = arith.divf %392, %393 : vector<2x32xf32>
    %395 = vector.extract_strided_slice %381 {offsets = [0, 64], sizes = [2, 32], strides = [1, 1]} : vector<2x128xf32> to vector<2x32xf32>
    %396 = math.tanh %395 : vector<2x32xf32>
    %397 = vector.extract_strided_slice %381 {offsets = [0, 96], sizes = [2, 32], strides = [1, 1]} : vector<2x128xf32> to vector<2x32xf32>
    %398 = arith.negf %397 : vector<2x32xf32>
    %399 = math.exp %398 : vector<2x32xf32>
    %cst_170 = arith.constant 1.000000e+00 : f32
    %400 = vector.broadcast %cst_170 : f32 to vector<2x32xf32>
    %401 = arith.addf %400, %399 : vector<2x32xf32>
    %402 = arith.divf %400, %401 : vector<2x32xf32>
    %403 = arith.mulf %394, %382 : vector<2x32xf32>
    %404 = arith.mulf %388, %396 : vector<2x32xf32>
    %405 = arith.addf %403, %404 : vector<2x32xf32>
    %406 = math.tanh %405 : vector<2x32xf32>
    %407 = arith.mulf %402, %406 : vector<2x32xf32>
    %c0_171 = arith.constant 0 : index
    %c0_172 = arith.constant 0 : index
    %408 = vector.load %arg10[%c0_171, %c0_172] : memref<2x32xf32, #tpu.memory_space<vmem>>, vector<2x32xf32>
    tpu.vector_store %arg10[%c0_171, %c0_172], %407 {strides = array<i32>} : memref<2x32xf32, #tpu.memory_space<vmem>>, vector<2x32xf32>,
    %c0_173 = arith.constant 0 : index
    %c0_174 = arith.constant 0 : index
    %409 = vector.load %arg11[%c0_173, %c0_174] : memref<2x32xf32, #tpu.memory_space<vmem>>, vector<2x32xf32>
    tpu.vector_store %arg11[%c0_173, %c0_174], %405 {strides = array<i32>} : memref<2x32xf32, #tpu.memory_space<vmem>>, vector<2x32xf32>,
    %410 = arith.truncf %407 : vector<2x32xf32> to vector<2x32xbf16>
    %411 = arith.index_cast %374 : i32 to index
    %c0_175 = arith.constant 0 : index
    %c32_176 = arith.constant 32 : index
    %412 = vector.load %arg6[%411, %c0_175, %c32_176] : memref<8x2x64xbf16, #tpu.memory_space<vmem>>, vector<1x2x32xbf16>
    %413 = vector.shape_cast %412 : vector<1x2x32xbf16> to vector<2x32xbf16>
    %414 = vector.shape_cast %410 : vector<2x32xbf16> to vector<1x2x32xbf16>
    tpu.vector_store %arg6[%411, %c0_175, %c32_176], %414 {strides = array<i32>} : memref<8x2x64xbf16, #tpu.memory_space<vmem>>, vector<1x2x32xbf16>,
    %c5_i32 = arith.constant 5 : i32
    %415 = arith.index_cast %c5_i32 : i32 to index
    %c0_177 = arith.constant 0 : index
    %c0_178 = arith.constant 0 : index
    %416 = vector.load %arg0[%415, %c0_177, %c0_178] : memref<8x2x128xf32, #tpu.memory_space<vmem>>, vector<1x2x128xf32>
    %417 = vector.shape_cast %416 : vector<1x2x128xf32> to vector<2x128xf32>
    %c0_179 = arith.constant 0 : index
    %c0_180 = arith.constant 0 : index
    %418 = vector.load %arg8[%c0_179, %c0_180] : memref<2x32xf32, #tpu.memory_space<vmem>>, vector<2x32xf32>
    %419 = arith.truncf %418 : vector<2x32xf32> to vector<2x32xbf16>
    %cst_181 = arith.constant dense<0.000000e+00> : vector<2x128xf32>
    %420 = tpu.matmul %419, %8, %cst_181 {dimension_numbers = #tpu.dot_dimension_numbers<[1], [0], [0], [1], [0, 0, 1, 1], [], []>} : vector<2x32xbf16>, vector<32x128xbf16>, vector<2x128xf32> -> vector<2x128xf32>
    %421 = arith.addf %417, %420 : vector<2x128xf32>
    %c0_182 = arith.constant 0 : index
    %c0_183 = arith.constant 0 : index
    %422 = vector.load %arg9[%c0_182, %c0_183] : memref<2x32xf32, #tpu.memory_space<vmem>>, vector<2x32xf32>
    %423 = vector.extract_strided_slice %421 {offsets = [0, 0], sizes = [2, 32], strides = [1, 1]} : vector<2x128xf32> to vector<2x32xf32>
    %424 = arith.negf %423 : vector<2x32xf32>
    %425 = math.exp %424 : vector<2x32xf32>
    %cst_184 = arith.constant 1.000000e+00 : f32
    %426 = vector.broadcast %cst_184 : f32 to vector<2x32xf32>
    %427 = arith.addf %426, %425 : vector<2x32xf32>
    %428 = arith.divf %426, %427 : vector<2x32xf32>
    %429 = vector.extract_strided_slice %421 {offsets = [0, 32], sizes = [2, 32], strides = [1, 1]} : vector<2x128xf32> to vector<2x32xf32>
    %430 = arith.negf %429 : vector<2x32xf32>
    %431 = math.exp %430 : vector<2x32xf32>
    %cst_185 = arith.constant 1.000000e+00 : f32
    %432 = vector.broadcast %cst_185 : f32 to vector<2x32xf32>
    %433 = arith.addf %432, %431 : vector<2x32xf32>
    %434 = arith.divf %432, %433 : vector<2x32xf32>
    %435 = vector.extract_strided_slice %421 {offsets = [0, 64], sizes = [2, 32], strides = [1, 1]} : vector<2x128xf32> to vector<2x32xf32>
    %436 = math.tanh %435 : vector<2x32xf32>
    %437 = vector.extract_strided_slice %421 {offsets = [0, 96], sizes = [2, 32], strides = [1, 1]} : vector<2x128xf32> to vector<2x32xf32>
    %438 = arith.negf %437 : vector<2x32xf32>
    %439 = math.exp %438 : vector<2x32xf32>
    %cst_186 = arith.constant 1.000000e+00 : f32
    %440 = vector.broadcast %cst_186 : f32 to vector<2x32xf32>
    %441 = arith.addf %440, %439 : vector<2x32xf32>
    %442 = arith.divf %440, %441 : vector<2x32xf32>
    %443 = arith.mulf %434, %422 : vector<2x32xf32>
    %444 = arith.mulf %428, %436 : vector<2x32xf32>
    %445 = arith.addf %443, %444 : vector<2x32xf32>
    %446 = math.tanh %445 : vector<2x32xf32>
    %447 = arith.mulf %442, %446 : vector<2x32xf32>
    %c0_187 = arith.constant 0 : index
    %c0_188 = arith.constant 0 : index
    %448 = vector.load %arg8[%c0_187, %c0_188] : memref<2x32xf32, #tpu.memory_space<vmem>>, vector<2x32xf32>
    tpu.vector_store %arg8[%c0_187, %c0_188], %447 {strides = array<i32>} : memref<2x32xf32, #tpu.memory_space<vmem>>, vector<2x32xf32>,
    %c0_189 = arith.constant 0 : index
    %c0_190 = arith.constant 0 : index
    %449 = vector.load %arg9[%c0_189, %c0_190] : memref<2x32xf32, #tpu.memory_space<vmem>>, vector<2x32xf32>
    tpu.vector_store %arg9[%c0_189, %c0_190], %445 {strides = array<i32>} : memref<2x32xf32, #tpu.memory_space<vmem>>, vector<2x32xf32>,
    %450 = arith.truncf %447 : vector<2x32xf32> to vector<2x32xbf16>
    %451 = arith.index_cast %c5_i32 : i32 to index
    %c0_191 = arith.constant 0 : index
    %c0_192 = arith.constant 0 : index
    %452 = vector.load %arg6[%451, %c0_191, %c0_192] : memref<8x2x64xbf16, #tpu.memory_space<vmem>>, vector<1x2x32xbf16>
    %453 = vector.shape_cast %452 : vector<1x2x32xbf16> to vector<2x32xbf16>
    %454 = vector.shape_cast %450 : vector<2x32xbf16> to vector<1x2x32xbf16>
    tpu.vector_store %arg6[%451, %c0_191, %c0_192], %454 {strides = array<i32>} : memref<8x2x64xbf16, #tpu.memory_space<vmem>>, vector<1x2x32xbf16>,
    %c7_i32_193 = arith.constant 7 : i32
    %455 = arith.subi %c7_i32_193, %c5_i32 : i32
    %456 = arith.index_cast %455 : i32 to index
    %c0_194 = arith.constant 0 : index
    %c0_195 = arith.constant 0 : index
    %457 = vector.load %arg1[%456, %c0_194, %c0_195] : memref<8x2x128xf32, #tpu.memory_space<vmem>>, vector<1x2x128xf32>
    %458 = vector.shape_cast %457 : vector<1x2x128xf32> to vector<2x128xf32>
    %c0_196 = arith.constant 0 : index
    %c0_197 = arith.constant 0 : index
    %459 = vector.load %arg10[%c0_196, %c0_197] : memref<2x32xf32, #tpu.memory_space<vmem>>, vector<2x32xf32>
    %460 = arith.truncf %459 : vector<2x32xf32> to vector<2x32xbf16>
    %cst_198 = arith.constant dense<0.000000e+00> : vector<2x128xf32>
    %461 = tpu.matmul %460, %9, %cst_198 {dimension_numbers = #tpu.dot_dimension_numbers<[1], [0], [0], [1], [0, 0, 1, 1], [], []>} : vector<2x32xbf16>, vector<32x128xbf16>, vector<2x128xf32> -> vector<2x128xf32>
    %462 = arith.addf %458, %461 : vector<2x128xf32>
    %c0_199 = arith.constant 0 : index
    %c0_200 = arith.constant 0 : index
    %463 = vector.load %arg11[%c0_199, %c0_200] : memref<2x32xf32, #tpu.memory_space<vmem>>, vector<2x32xf32>
    %464 = vector.extract_strided_slice %462 {offsets = [0, 0], sizes = [2, 32], strides = [1, 1]} : vector<2x128xf32> to vector<2x32xf32>
    %465 = arith.negf %464 : vector<2x32xf32>
    %466 = math.exp %465 : vector<2x32xf32>
    %cst_201 = arith.constant 1.000000e+00 : f32
    %467 = vector.broadcast %cst_201 : f32 to vector<2x32xf32>
    %468 = arith.addf %467, %466 : vector<2x32xf32>
    %469 = arith.divf %467, %468 : vector<2x32xf32>
    %470 = vector.extract_strided_slice %462 {offsets = [0, 32], sizes = [2, 32], strides = [1, 1]} : vector<2x128xf32> to vector<2x32xf32>
    %471 = arith.negf %470 : vector<2x32xf32>
    %472 = math.exp %471 : vector<2x32xf32>
    %cst_202 = arith.constant 1.000000e+00 : f32
    %473 = vector.broadcast %cst_202 : f32 to vector<2x32xf32>
    %474 = arith.addf %473, %472 : vector<2x32xf32>
    %475 = arith.divf %473, %474 : vector<2x32xf32>
    %476 = vector.extract_strided_slice %462 {offsets = [0, 64], sizes = [2, 32], strides = [1, 1]} : vector<2x128xf32> to vector<2x32xf32>
    %477 = math.tanh %476 : vector<2x32xf32>
    %478 = vector.extract_strided_slice %462 {offsets = [0, 96], sizes = [2, 32], strides = [1, 1]} : vector<2x128xf32> to vector<2x32xf32>
    %479 = arith.negf %478 : vector<2x32xf32>
    %480 = math.exp %479 : vector<2x32xf32>
    %cst_203 = arith.constant 1.000000e+00 : f32
    %481 = vector.broadcast %cst_203 : f32 to vector<2x32xf32>
    %482 = arith.addf %481, %480 : vector<2x32xf32>
    %483 = arith.divf %481, %482 : vector<2x32xf32>
    %484 = arith.mulf %475, %463 : vector<2x32xf32>
    %485 = arith.mulf %469, %477 : vector<2x32xf32>
    %486 = arith.addf %484, %485 : vector<2x32xf32>
    %487 = math.tanh %486 : vector<2x32xf32>
    %488 = arith.mulf %483, %487 : vector<2x32xf32>
    %c0_204 = arith.constant 0 : index
    %c0_205 = arith.constant 0 : index
    %489 = vector.load %arg10[%c0_204, %c0_205] : memref<2x32xf32, #tpu.memory_space<vmem>>, vector<2x32xf32>
    tpu.vector_store %arg10[%c0_204, %c0_205], %488 {strides = array<i32>} : memref<2x32xf32, #tpu.memory_space<vmem>>, vector<2x32xf32>,
    %c0_206 = arith.constant 0 : index
    %c0_207 = arith.constant 0 : index
    %490 = vector.load %arg11[%c0_206, %c0_207] : memref<2x32xf32, #tpu.memory_space<vmem>>, vector<2x32xf32>
    tpu.vector_store %arg11[%c0_206, %c0_207], %486 {strides = array<i32>} : memref<2x32xf32, #tpu.memory_space<vmem>>, vector<2x32xf32>,
    %491 = arith.truncf %488 : vector<2x32xf32> to vector<2x32xbf16>
    %492 = arith.index_cast %455 : i32 to index
    %c0_208 = arith.constant 0 : index
    %c32_209 = arith.constant 32 : index
    %493 = vector.load %arg6[%492, %c0_208, %c32_209] : memref<8x2x64xbf16, #tpu.memory_space<vmem>>, vector<1x2x32xbf16>
    %494 = vector.shape_cast %493 : vector<1x2x32xbf16> to vector<2x32xbf16>
    %495 = vector.shape_cast %491 : vector<2x32xbf16> to vector<1x2x32xbf16>
    tpu.vector_store %arg6[%492, %c0_208, %c32_209], %495 {strides = array<i32>} : memref<8x2x64xbf16, #tpu.memory_space<vmem>>, vector<1x2x32xbf16>,
    %c6_i32 = arith.constant 6 : i32
    %496 = arith.index_cast %c6_i32 : i32 to index
    %c0_210 = arith.constant 0 : index
    %c0_211 = arith.constant 0 : index
    %497 = vector.load %arg0[%496, %c0_210, %c0_211] : memref<8x2x128xf32, #tpu.memory_space<vmem>>, vector<1x2x128xf32>
    %498 = vector.shape_cast %497 : vector<1x2x128xf32> to vector<2x128xf32>
    %c0_212 = arith.constant 0 : index
    %c0_213 = arith.constant 0 : index
    %499 = vector.load %arg8[%c0_212, %c0_213] : memref<2x32xf32, #tpu.memory_space<vmem>>, vector<2x32xf32>
    %500 = arith.truncf %499 : vector<2x32xf32> to vector<2x32xbf16>
    %cst_214 = arith.constant dense<0.000000e+00> : vector<2x128xf32>
    %501 = tpu.matmul %500, %8, %cst_214 {dimension_numbers = #tpu.dot_dimension_numbers<[1], [0], [0], [1], [0, 0, 1, 1], [], []>} : vector<2x32xbf16>, vector<32x128xbf16>, vector<2x128xf32> -> vector<2x128xf32>
    %502 = arith.addf %498, %501 : vector<2x128xf32>
    %c0_215 = arith.constant 0 : index
    %c0_216 = arith.constant 0 : index
    %503 = vector.load %arg9[%c0_215, %c0_216] : memref<2x32xf32, #tpu.memory_space<vmem>>, vector<2x32xf32>
    %504 = vector.extract_strided_slice %502 {offsets = [0, 0], sizes = [2, 32], strides = [1, 1]} : vector<2x128xf32> to vector<2x32xf32>
    %505 = arith.negf %504 : vector<2x32xf32>
    %506 = math.exp %505 : vector<2x32xf32>
    %cst_217 = arith.constant 1.000000e+00 : f32
    %507 = vector.broadcast %cst_217 : f32 to vector<2x32xf32>
    %508 = arith.addf %507, %506 : vector<2x32xf32>
    %509 = arith.divf %507, %508 : vector<2x32xf32>
    %510 = vector.extract_strided_slice %502 {offsets = [0, 32], sizes = [2, 32], strides = [1, 1]} : vector<2x128xf32> to vector<2x32xf32>
    %511 = arith.negf %510 : vector<2x32xf32>
    %512 = math.exp %511 : vector<2x32xf32>
    %cst_218 = arith.constant 1.000000e+00 : f32
    %513 = vector.broadcast %cst_218 : f32 to vector<2x32xf32>
    %514 = arith.addf %513, %512 : vector<2x32xf32>
    %515 = arith.divf %513, %514 : vector<2x32xf32>
    %516 = vector.extract_strided_slice %502 {offsets = [0, 64], sizes = [2, 32], strides = [1, 1]} : vector<2x128xf32> to vector<2x32xf32>
    %517 = math.tanh %516 : vector<2x32xf32>
    %518 = vector.extract_strided_slice %502 {offsets = [0, 96], sizes = [2, 32], strides = [1, 1]} : vector<2x128xf32> to vector<2x32xf32>
    %519 = arith.negf %518 : vector<2x32xf32>
    %520 = math.exp %519 : vector<2x32xf32>
    %cst_219 = arith.constant 1.000000e+00 : f32
    %521 = vector.broadcast %cst_219 : f32 to vector<2x32xf32>
    %522 = arith.addf %521, %520 : vector<2x32xf32>
    %523 = arith.divf %521, %522 : vector<2x32xf32>
    %524 = arith.mulf %515, %503 : vector<2x32xf32>
    %525 = arith.mulf %509, %517 : vector<2x32xf32>
    %526 = arith.addf %524, %525 : vector<2x32xf32>
    %527 = math.tanh %526 : vector<2x32xf32>
    %528 = arith.mulf %523, %527 : vector<2x32xf32>
    %c0_220 = arith.constant 0 : index
    %c0_221 = arith.constant 0 : index
    %529 = vector.load %arg8[%c0_220, %c0_221] : memref<2x32xf32, #tpu.memory_space<vmem>>, vector<2x32xf32>
    tpu.vector_store %arg8[%c0_220, %c0_221], %528 {strides = array<i32>} : memref<2x32xf32, #tpu.memory_space<vmem>>, vector<2x32xf32>,
    %c0_222 = arith.constant 0 : index
    %c0_223 = arith.constant 0 : index
    %530 = vector.load %arg9[%c0_222, %c0_223] : memref<2x32xf32, #tpu.memory_space<vmem>>, vector<2x32xf32>
    tpu.vector_store %arg9[%c0_222, %c0_223], %526 {strides = array<i32>} : memref<2x32xf32, #tpu.memory_space<vmem>>, vector<2x32xf32>,
    %531 = arith.truncf %528 : vector<2x32xf32> to vector<2x32xbf16>
    %532 = arith.index_cast %c6_i32 : i32 to index
    %c0_224 = arith.constant 0 : index
    %c0_225 = arith.constant 0 : index
    %533 = vector.load %arg6[%532, %c0_224, %c0_225] : memref<8x2x64xbf16, #tpu.memory_space<vmem>>, vector<1x2x32xbf16>
    %534 = vector.shape_cast %533 : vector<1x2x32xbf16> to vector<2x32xbf16>
    %535 = vector.shape_cast %531 : vector<2x32xbf16> to vector<1x2x32xbf16>
    tpu.vector_store %arg6[%532, %c0_224, %c0_225], %535 {strides = array<i32>} : memref<8x2x64xbf16, #tpu.memory_space<vmem>>, vector<1x2x32xbf16>,
    %c7_i32_226 = arith.constant 7 : i32
    %536 = arith.subi %c7_i32_226, %c6_i32 : i32
    %537 = arith.index_cast %536 : i32 to index
    %c0_227 = arith.constant 0 : index
    %c0_228 = arith.constant 0 : index
    %538 = vector.load %arg1[%537, %c0_227, %c0_228] : memref<8x2x128xf32, #tpu.memory_space<vmem>>, vector<1x2x128xf32>
    %539 = vector.shape_cast %538 : vector<1x2x128xf32> to vector<2x128xf32>
    %c0_229 = arith.constant 0 : index
    %c0_230 = arith.constant 0 : index
    %540 = vector.load %arg10[%c0_229, %c0_230] : memref<2x32xf32, #tpu.memory_space<vmem>>, vector<2x32xf32>
    %541 = arith.truncf %540 : vector<2x32xf32> to vector<2x32xbf16>
    %cst_231 = arith.constant dense<0.000000e+00> : vector<2x128xf32>
    %542 = tpu.matmul %541, %9, %cst_231 {dimension_numbers = #tpu.dot_dimension_numbers<[1], [0], [0], [1], [0, 0, 1, 1], [], []>} : vector<2x32xbf16>, vector<32x128xbf16>, vector<2x128xf32> -> vector<2x128xf32>
    %543 = arith.addf %539, %542 : vector<2x128xf32>
    %c0_232 = arith.constant 0 : index
    %c0_233 = arith.constant 0 : index
    %544 = vector.load %arg11[%c0_232, %c0_233] : memref<2x32xf32, #tpu.memory_space<vmem>>, vector<2x32xf32>
    %545 = vector.extract_strided_slice %543 {offsets = [0, 0], sizes = [2, 32], strides = [1, 1]} : vector<2x128xf32> to vector<2x32xf32>
    %546 = arith.negf %545 : vector<2x32xf32>
    %547 = math.exp %546 : vector<2x32xf32>
    %cst_234 = arith.constant 1.000000e+00 : f32
    %548 = vector.broadcast %cst_234 : f32 to vector<2x32xf32>
    %549 = arith.addf %548, %547 : vector<2x32xf32>
    %550 = arith.divf %548, %549 : vector<2x32xf32>
    %551 = vector.extract_strided_slice %543 {offsets = [0, 32], sizes = [2, 32], strides = [1, 1]} : vector<2x128xf32> to vector<2x32xf32>
    %552 = arith.negf %551 : vector<2x32xf32>
    %553 = math.exp %552 : vector<2x32xf32>
    %cst_235 = arith.constant 1.000000e+00 : f32
    %554 = vector.broadcast %cst_235 : f32 to vector<2x32xf32>
    %555 = arith.addf %554, %553 : vector<2x32xf32>
    %556 = arith.divf %554, %555 : vector<2x32xf32>
    %557 = vector.extract_strided_slice %543 {offsets = [0, 64], sizes = [2, 32], strides = [1, 1]} : vector<2x128xf32> to vector<2x32xf32>
    %558 = math.tanh %557 : vector<2x32xf32>
    %559 = vector.extract_strided_slice %543 {offsets = [0, 96], sizes = [2, 32], strides = [1, 1]} : vector<2x128xf32> to vector<2x32xf32>
    %560 = arith.negf %559 : vector<2x32xf32>
    %561 = math.exp %560 : vector<2x32xf32>
    %cst_236 = arith.constant 1.000000e+00 : f32
    %562 = vector.broadcast %cst_236 : f32 to vector<2x32xf32>
    %563 = arith.addf %562, %561 : vector<2x32xf32>
    %564 = arith.divf %562, %563 : vector<2x32xf32>
    %565 = arith.mulf %556, %544 : vector<2x32xf32>
    %566 = arith.mulf %550, %558 : vector<2x32xf32>
    %567 = arith.addf %565, %566 : vector<2x32xf32>
    %568 = math.tanh %567 : vector<2x32xf32>
    %569 = arith.mulf %564, %568 : vector<2x32xf32>
    %c0_237 = arith.constant 0 : index
    %c0_238 = arith.constant 0 : index
    %570 = vector.load %arg10[%c0_237, %c0_238] : memref<2x32xf32, #tpu.memory_space<vmem>>, vector<2x32xf32>
    tpu.vector_store %arg10[%c0_237, %c0_238], %569 {strides = array<i32>} : memref<2x32xf32, #tpu.memory_space<vmem>>, vector<2x32xf32>,
    %c0_239 = arith.constant 0 : index
    %c0_240 = arith.constant 0 : index
    %571 = vector.load %arg11[%c0_239, %c0_240] : memref<2x32xf32, #tpu.memory_space<vmem>>, vector<2x32xf32>
    tpu.vector_store %arg11[%c0_239, %c0_240], %567 {strides = array<i32>} : memref<2x32xf32, #tpu.memory_space<vmem>>, vector<2x32xf32>,
    %572 = arith.truncf %569 : vector<2x32xf32> to vector<2x32xbf16>
    %573 = arith.index_cast %536 : i32 to index
    %c0_241 = arith.constant 0 : index
    %c32_242 = arith.constant 32 : index
    %574 = vector.load %arg6[%573, %c0_241, %c32_242] : memref<8x2x64xbf16, #tpu.memory_space<vmem>>, vector<1x2x32xbf16>
    %575 = vector.shape_cast %574 : vector<1x2x32xbf16> to vector<2x32xbf16>
    %576 = vector.shape_cast %572 : vector<2x32xbf16> to vector<1x2x32xbf16>
    tpu.vector_store %arg6[%573, %c0_241, %c32_242], %576 {strides = array<i32>} : memref<8x2x64xbf16, #tpu.memory_space<vmem>>, vector<1x2x32xbf16>,
    %c7_i32_243 = arith.constant 7 : i32
    %577 = arith.index_cast %c7_i32_243 : i32 to index
    %c0_244 = arith.constant 0 : index
    %c0_245 = arith.constant 0 : index
    %578 = vector.load %arg0[%577, %c0_244, %c0_245] : memref<8x2x128xf32, #tpu.memory_space<vmem>>, vector<1x2x128xf32>
    %579 = vector.shape_cast %578 : vector<1x2x128xf32> to vector<2x128xf32>
    %c0_246 = arith.constant 0 : index
    %c0_247 = arith.constant 0 : index
    %580 = vector.load %arg8[%c0_246, %c0_247] : memref<2x32xf32, #tpu.memory_space<vmem>>, vector<2x32xf32>
    %581 = arith.truncf %580 : vector<2x32xf32> to vector<2x32xbf16>
    %cst_248 = arith.constant dense<0.000000e+00> : vector<2x128xf32>
    %582 = tpu.matmul %581, %8, %cst_248 {dimension_numbers = #tpu.dot_dimension_numbers<[1], [0], [0], [1], [0, 0, 1, 1], [], []>} : vector<2x32xbf16>, vector<32x128xbf16>, vector<2x128xf32> -> vector<2x128xf32>
    %583 = arith.addf %579, %582 : vector<2x128xf32>
    %c0_249 = arith.constant 0 : index
    %c0_250 = arith.constant 0 : index
    %584 = vector.load %arg9[%c0_249, %c0_250] : memref<2x32xf32, #tpu.memory_space<vmem>>, vector<2x32xf32>
    %585 = vector.extract_strided_slice %583 {offsets = [0, 0], sizes = [2, 32], strides = [1, 1]} : vector<2x128xf32> to vector<2x32xf32>
    %586 = arith.negf %585 : vector<2x32xf32>
    %587 = math.exp %586 : vector<2x32xf32>
    %cst_251 = arith.constant 1.000000e+00 : f32
    %588 = vector.broadcast %cst_251 : f32 to vector<2x32xf32>
    %589 = arith.addf %588, %587 : vector<2x32xf32>
    %590 = arith.divf %588, %589 : vector<2x32xf32>
    %591 = vector.extract_strided_slice %583 {offsets = [0, 32], sizes = [2, 32], strides = [1, 1]} : vector<2x128xf32> to vector<2x32xf32>
    %592 = arith.negf %591 : vector<2x32xf32>
    %593 = math.exp %592 : vector<2x32xf32>
    %cst_252 = arith.constant 1.000000e+00 : f32
    %594 = vector.broadcast %cst_252 : f32 to vector<2x32xf32>
    %595 = arith.addf %594, %593 : vector<2x32xf32>
    %596 = arith.divf %594, %595 : vector<2x32xf32>
    %597 = vector.extract_strided_slice %583 {offsets = [0, 64], sizes = [2, 32], strides = [1, 1]} : vector<2x128xf32> to vector<2x32xf32>
    %598 = math.tanh %597 : vector<2x32xf32>
    %599 = vector.extract_strided_slice %583 {offsets = [0, 96], sizes = [2, 32], strides = [1, 1]} : vector<2x128xf32> to vector<2x32xf32>
    %600 = arith.negf %599 : vector<2x32xf32>
    %601 = math.exp %600 : vector<2x32xf32>
    %cst_253 = arith.constant 1.000000e+00 : f32
    %602 = vector.broadcast %cst_253 : f32 to vector<2x32xf32>
    %603 = arith.addf %602, %601 : vector<2x32xf32>
    %604 = arith.divf %602, %603 : vector<2x32xf32>
    %605 = arith.mulf %596, %584 : vector<2x32xf32>
    %606 = arith.mulf %590, %598 : vector<2x32xf32>
    %607 = arith.addf %605, %606 : vector<2x32xf32>
    %608 = math.tanh %607 : vector<2x32xf32>
    %609 = arith.mulf %604, %608 : vector<2x32xf32>
    %c0_254 = arith.constant 0 : index
    %c0_255 = arith.constant 0 : index
    %610 = vector.load %arg8[%c0_254, %c0_255] : memref<2x32xf32, #tpu.memory_space<vmem>>, vector<2x32xf32>
    tpu.vector_store %arg8[%c0_254, %c0_255], %609 {strides = array<i32>} : memref<2x32xf32, #tpu.memory_space<vmem>>, vector<2x32xf32>,
    %c0_256 = arith.constant 0 : index
    %c0_257 = arith.constant 0 : index
    %611 = vector.load %arg9[%c0_256, %c0_257] : memref<2x32xf32, #tpu.memory_space<vmem>>, vector<2x32xf32>
    tpu.vector_store %arg9[%c0_256, %c0_257], %607 {strides = array<i32>} : memref<2x32xf32, #tpu.memory_space<vmem>>, vector<2x32xf32>,
    %612 = arith.truncf %609 : vector<2x32xf32> to vector<2x32xbf16>
    %613 = arith.index_cast %c7_i32_243 : i32 to index
    %c0_258 = arith.constant 0 : index
    %c0_259 = arith.constant 0 : index
    %614 = vector.load %arg6[%613, %c0_258, %c0_259] : memref<8x2x64xbf16, #tpu.memory_space<vmem>>, vector<1x2x32xbf16>
    %615 = vector.shape_cast %614 : vector<1x2x32xbf16> to vector<2x32xbf16>
    %616 = vector.shape_cast %612 : vector<2x32xbf16> to vector<1x2x32xbf16>
    tpu.vector_store %arg6[%613, %c0_258, %c0_259], %616 {strides = array<i32>} : memref<8x2x64xbf16, #tpu.memory_space<vmem>>, vector<1x2x32xbf16>,
    %c7_i32_260 = arith.constant 7 : i32
    %617 = arith.subi %c7_i32_260, %c7_i32_243 : i32
    %618 = arith.index_cast %617 : i32 to index
    %c0_261 = arith.constant 0 : index
    %c0_262 = arith.constant 0 : index
    %619 = vector.load %arg1[%618, %c0_261, %c0_262] : memref<8x2x128xf32, #tpu.memory_space<vmem>>, vector<1x2x128xf32>
    %620 = vector.shape_cast %619 : vector<1x2x128xf32> to vector<2x128xf32>
    %c0_263 = arith.constant 0 : index
    %c0_264 = arith.constant 0 : index
    %621 = vector.load %arg10[%c0_263, %c0_264] : memref<2x32xf32, #tpu.memory_space<vmem>>, vector<2x32xf32>
    %622 = arith.truncf %621 : vector<2x32xf32> to vector<2x32xbf16>
    %cst_265 = arith.constant dense<0.000000e+00> : vector<2x128xf32>
    %623 = tpu.matmul %622, %9, %cst_265 {dimension_numbers = #tpu.dot_dimension_numbers<[1], [0], [0], [1], [0, 0, 1, 1], [], []>} : vector<2x32xbf16>, vector<32x128xbf16>, vector<2x128xf32> -> vector<2x128xf32>
    %624 = arith.addf %620, %623 : vector<2x128xf32>
    %c0_266 = arith.constant 0 : index
    %c0_267 = arith.constant 0 : index
    %625 = vector.load %arg11[%c0_266, %c0_267] : memref<2x32xf32, #tpu.memory_space<vmem>>, vector<2x32xf32>
    %626 = vector.extract_strided_slice %624 {offsets = [0, 0], sizes = [2, 32], strides = [1, 1]} : vector<2x128xf32> to vector<2x32xf32>
    %627 = arith.negf %626 : vector<2x32xf32>
    %628 = math.exp %627 : vector<2x32xf32>
    %cst_268 = arith.constant 1.000000e+00 : f32
    %629 = vector.broadcast %cst_268 : f32 to vector<2x32xf32>
    %630 = arith.addf %629, %628 : vector<2x32xf32>
    %631 = arith.divf %629, %630 : vector<2x32xf32>
    %632 = vector.extract_strided_slice %624 {offsets = [0, 32], sizes = [2, 32], strides = [1, 1]} : vector<2x128xf32> to vector<2x32xf32>
    %633 = arith.negf %632 : vector<2x32xf32>
    %634 = math.exp %633 : vector<2x32xf32>
    %cst_269 = arith.constant 1.000000e+00 : f32
    %635 = vector.broadcast %cst_269 : f32 to vector<2x32xf32>
    %636 = arith.addf %635, %634 : vector<2x32xf32>
    %637 = arith.divf %635, %636 : vector<2x32xf32>
    %638 = vector.extract_strided_slice %624 {offsets = [0, 64], sizes = [2, 32], strides = [1, 1]} : vector<2x128xf32> to vector<2x32xf32>
    %639 = math.tanh %638 : vector<2x32xf32>
    %640 = vector.extract_strided_slice %624 {offsets = [0, 96], sizes = [2, 32], strides = [1, 1]} : vector<2x128xf32> to vector<2x32xf32>
    %641 = arith.negf %640 : vector<2x32xf32>
    %642 = math.exp %641 : vector<2x32xf32>
    %cst_270 = arith.constant 1.000000e+00 : f32
    %643 = vector.broadcast %cst_270 : f32 to vector<2x32xf32>
    %644 = arith.addf %643, %642 : vector<2x32xf32>
    %645 = arith.divf %643, %644 : vector<2x32xf32>
    %646 = arith.mulf %637, %625 : vector<2x32xf32>
    %647 = arith.mulf %631, %639 : vector<2x32xf32>
    %648 = arith.addf %646, %647 : vector<2x32xf32>
    %649 = math.tanh %648 : vector<2x32xf32>
    %650 = arith.mulf %645, %649 : vector<2x32xf32>
    %c0_271 = arith.constant 0 : index
    %c0_272 = arith.constant 0 : index
    %651 = vector.load %arg10[%c0_271, %c0_272] : memref<2x32xf32, #tpu.memory_space<vmem>>, vector<2x32xf32>
    tpu.vector_store %arg10[%c0_271, %c0_272], %650 {strides = array<i32>} : memref<2x32xf32, #tpu.memory_space<vmem>>, vector<2x32xf32>,
    %c0_273 = arith.constant 0 : index
    %c0_274 = arith.constant 0 : index
    %652 = vector.load %arg11[%c0_273, %c0_274] : memref<2x32xf32, #tpu.memory_space<vmem>>, vector<2x32xf32>
    tpu.vector_store %arg11[%c0_273, %c0_274], %648 {strides = array<i32>} : memref<2x32xf32, #tpu.memory_space<vmem>>, vector<2x32xf32>,
    %653 = arith.truncf %650 : vector<2x32xf32> to vector<2x32xbf16>
    %654 = arith.index_cast %617 : i32 to index
    %c0_275 = arith.constant 0 : index
    %c32_276 = arith.constant 32 : index
    %655 = vector.load %arg6[%654, %c0_275, %c32_276] : memref<8x2x64xbf16, #tpu.memory_space<vmem>>, vector<1x2x32xbf16>
    %656 = vector.shape_cast %655 : vector<1x2x32xbf16> to vector<2x32xbf16>
    %657 = vector.shape_cast %653 : vector<2x32xbf16> to vector<1x2x32xbf16>
    tpu.vector_store %arg6[%654, %c0_275, %c32_276], %657 {strides = array<i32>} : memref<8x2x64xbf16, #tpu.memory_space<vmem>>, vector<1x2x32xbf16>,
    %c8_i32 = arith.constant 8 : i32
    %c0_277 = arith.constant 0 : index
    %c0_278 = arith.constant 0 : index
    %c0_279 = arith.constant 0 : index
    %658 = vector.load %arg6[%c0_277, %c0_278, %c0_279] : memref<8x2x64xbf16, #tpu.memory_space<vmem>>, vector<1x2x64xbf16>
    %659 = vector.shape_cast %658 : vector<1x2x64xbf16> to vector<2x64xbf16>
    %c7 = arith.constant 7 : index
    %c0_280 = arith.constant 0 : index
    %c0_281 = arith.constant 0 : index
    %660 = vector.load %arg6[%c7, %c0_280, %c0_281] : memref<8x2x64xbf16, #tpu.memory_space<vmem>>, vector<1x2x64xbf16>
    %661 = vector.shape_cast %660 : vector<1x2x64xbf16> to vector<2x64xbf16>
    %662 = tpu.concatenate %659, %661 in 1 : vector<2x64xbf16>, vector<2x64xbf16> -> vector<2x128xbf16>
    %c0_282 = arith.constant 0 : index
    %c0_283 = arith.constant 0 : index
    %663 = vector.load %arg4[%c0_282, %c0_283] : memref<128x2xbf16, #tpu.memory_space<vmem>>, vector<128x2xbf16>
    %cst_284 = arith.constant dense<0.000000e+00> : vector<2x2xf32>
    %664 = tpu.matmul %662, %663, %cst_284 {dimension_numbers = #tpu.dot_dimension_numbers<[1], [0], [0], [1], [0, 0, 1, 1], [], []>} : vector<2x128xbf16>, vector<128x2xbf16>, vector<2x2xf32> -> vector<2x2xf32>
    %c0_285 = arith.constant 0 : index
    %c0_286 = arith.constant 0 : index
    %665 = vector.load %arg5[%c0_285, %c0_286] : memref<1x2xf32, #tpu.memory_space<vmem>>, vector<1x2xf32>
    %666 = vector.broadcast %665 : vector<1x2xf32> to vector<2x2xf32>
    %667 = arith.addf %664, %666 : vector<2x2xf32>
    %c0_287 = arith.constant 0 : index
    %c0_288 = arith.constant 0 : index
    %668 = vector.load %arg7[%c0_287, %c0_288] : memref<2x2xf32, #tpu.memory_space<vmem>>, vector<2x2xf32>
    tpu.vector_store %arg7[%c0_287, %c0_288], %667 {strides = array<i32>} : memref<2x2xf32, #tpu.memory_space<vmem>>, vector<2x2xf32>,
    return
  }
}

</mosaic_0001>

<bundles_post_ra>
// kernel: birnn_forward.2
= control target key start
LH: loop header
LB: loop body
LE: loop exit
PB: predicated region body
PF: predicated region fallthrough
CT: control target
= control target key end

     0   :  { %vm18_vm0 = vcmask 254976   ;;  %v2161_v0 = vmov 0.0   ;;  %vm2162_vm1 = vmmov 0   ;;  %vm46_vm2 = vcmask 261120   ;;  %s2163_s23 = smov 32   ;;  %s2164_s28 = smov 64   ;;  %s2718_s2 = inlined_call_operand.vmem [shape: bf16[32,128], index: 2, kind: input, shape index: {}]   ;;  %s2719_s3 = inlined_call_operand.vmem [shape: bf16[32,128], index: 3, kind: input, shape index: {}]   ;;  %s2720_s0 = inlined_call_operand.vmem [shape: f32[8,2,128], index: 0, kind: input, shape index: {}]   ;;  %s2721_s1 = inlined_call_operand.vmem [shape: f32[8,2,128], index: 1, kind: input, shape index: {}]   ;;  %s2722_s4 = inlined_call_operand.vmem [shape: bf16[8,2,64], index: 4, kind: output, shape index: {}]  }
   0x1   :  { %1891 = vmatprep.subr.bf16.mxu0 %v2161_v0  ;;  %v2196_v1 = vld [vmem:[%s2718_s2] sm:$0xff]   ;;  %1899 = vmatprep.subr.bf16.mxu1 %v2161_v0  ;;  %19 = vst.msk [vmem:[#allocation2] sm:$0x3] %vm18_vm0, %v2161_v0  ;;  %20 = vst.msk [vmem:[#allocation3] sm:$0x3] %vm18_vm0, %v2161_v0  ;;  %v2220_v3 = vld [vmem:[%s2718_s2 + $0x8] sm:$0xff]  }
   0x2   :  { %21 = vst.msk [vmem:[#allocation4] sm:$0x3] %vm18_vm0, %v2161_v0  ;;  %22 = vst.msk [vmem:[#allocation5] sm:$0x3] %vm18_vm0, %v2161_v0  ;;  %v2210_v2 = vld [vmem:[%s2719_s3] sm:$0xff]   ;;  %1895 = vmatprep.mubr.msk.bf16.mxu0 %vm2162_vm1, %v2161_v0  ;;  %1903 = vmatprep.mubr.msk.bf16.mxu1 %vm2162_vm1, %v2161_v0  ;;  %v2227_v4 = vld [vmem:[%s2719_s3 + $0x8] sm:$0xff]  }
   0x3   :  { %1892 = vmatpush3.bf16.msra.mxu0 %v2196_v1  ;;  %1900 = vmatpush3.bf16.msra.mxu1 %v2210_v2  ;;  %v31_v11 = vld [vmem:[%s2720_s0] sm:$0x3]  ;;  %v1783_v12 = vld [vmem:[%s2721_s1 + $0xe] sm:$0x3]  ;;  %s2165_s29 = smov 96   ;;  %vm149_vm3 = vcmask 253952  }
   0x4   :  { %1893 = vmatprep.subr.bf16.mxu0 %v2161_v0  ;;  %1901 = vmatprep.subr.bf16.mxu1 %v2161_v0  ;;  %v1789_v59 = vld [vmem:[%s2720_s0 + $0x2] sm:$0x3]  ;;  %vm270_vm4 = vcmask 516352  }
   0x7   :  { %1894 = vmatpush3.bf16.msra.mxu0 %v2220_v3  ;;  %1902 = vmatpush3.bf16.msra.mxu1 %v2227_v4 }
   0x8   :  { %v32_v5 = vld [vmem:[#allocation2] sm:$0x3]  ;;  %v91_v7 = vld [vmem:[#allocation3] sm:$0x3]  ;;  %1907 = vmatprep.subr.bf16.mxu0 %v2161_v0  ;;  %1915 = vmatprep.subr.bf16.mxu1 %v2161_v0 }
   0x9   :  { %v153_v6 = vld [vmem:[#allocation4] sm:$0x3]  ;;  %v33_v8 = vpack.c.bf16 %v32_v5, %v32_v5  ;;  %100 = vrot.lane.b32.xlu1 %v91_v7, %s2163_s23  ;;  %v211_v10 = vld [vmem:[#allocation5] sm:$0x3]  ;;  %v1793_v5 = vld [vmem:[%s2721_s1 + $0xc] sm:$0x3] }
   0xa   :  { %v154_v9 = vpack.c.bf16 %v153_v6, %v153_v6 }
   0xb   :  { %1896 = vmatmul.mubr.msk.bf16.vlgmr.msra.gmra.mrb[0].mxu0 %vm46_vm2, %v33_v8 }
   0xc   :  { %1904 = vmatmul.mubr.msk.bf16.vlgmr.msra.gmra.mrb[0].mxu1 %vm46_vm2, %v154_v9  ;;  %1908 = vmatpush3.bf16.msra.mxu0 %v2196_v1 }
   0xd   :  { %1916 = vmatpush3.bf16.msra.mxu1 %v2210_v2  ;;  %220 = vrot.lane.b32.xlu1 %v211_v10, %s2163_s23 }
   0xe   :  { %1909 = vmatprep.subr.bf16.mxu0 %v2161_v0  ;;  %1911 = vmatprep.mubr.msk.bf16.mxu0 %vm2162_vm1, %v2161_v0 }
   0xf   :  { %1917 = vmatprep.subr.bf16.mxu1 %v2161_v0  ;;  %1919 = vmatprep.mubr.msk.bf16.mxu1 %vm2162_vm1, %v2161_v0 }
  0x10   :  { %1910 = vmatpush3.bf16.msra.mxu0 %v2220_v3 }
  0x11   :  { %1918 = vmatpush3.bf16.msra.mxu1 %v2227_v4  ;;  %1923 = vmatprep.subr.bf16.mxu0 %v2161_v0 }
  0x12   :  { %1931 = vmatprep.subr.bf16.mxu1 %v2161_v0 }
  0x7b   :  { %v101_v37 = vpop.permute.xlu1 %100 }
  0x7f   :  { %v221_v39 = vpop.permute.xlu1 %220 }
  0xde   :  { %v84_v13 = vpop.f32.mrb[0].mxu0 }
  0xdf   :  { %v204_v14 = vpop.f32.mrb[0].mxu1  ;;  %v90_v15 = vadd.f32 %v84_v13, %v31_v11  ;;  %v1897_v16 = vpop.f32.mrb[1].mxu0 }
  0xe0   :  { %v210_v17 = vadd.f32 %v1783_v12, %v204_v14  ;;  %v1905_v18 = vpop.f32.mrb[1].mxu1  ;;  %v87_v19 = vpop.f32.mrb[2].mxu0 }
  0xe1   :  { %v207_v20 = vpop.f32.mrb[2].mxu1  ;;  %2029 = vtanh.f32 %v90_v15  ;;  %v1898_v21 = vpop.f32.mrb[3].mxu0  ;;  %v1782_v25 = vmul.f32 -1.442695, %v90_v15 }
  0xe2   :  { %v1906_v22 = vpop.f32.mrb[3].mxu1  ;;  %2031 = vtanh.f32 %v210_v17  ;;  %v1787_v26 = vmul.f32 -1.442695, %v210_v17 }
  0xe3   :  { %2033 = vpow2.f32 %v1782_v25 }
  0xe4   :  { %2035 = vpow2.f32 %v1787_v26 }
  0xeb   :  { %v2030_v23 = vpop.eup %2029 }
  0xec   :  { %105 = vrot.lane.b32.xlu0 %v2030_v23, %s2164_s28  ;;  %v2032_v24 = vpop.eup %2031 }
  0xed   :  { %v2034_v27 = vpop.eup %2033 }
  0xee   :  { %v95_v28 = vadd.f32 1.0, %v2034_v27  ;;  %v2036_v29 = vpop.eup %2035 }
  0xef   :  { %v215_v30 = vadd.f32 1.0, %v2036_v29 }
  0xf0   :  { %225 = vrot.lane.b32.xlu0 %v2032_v24, %s2164_s28  ;;  %2037 = vrcp.f32 %v95_v28 }
  0xf1   :  { %2039 = vrcp.f32 %v215_v30 }
  0xfa   :  { %v2038_v31 = vpop.eup %2037 }
  0xfb   :  { %v2040_v34 = vpop.eup %2039  ;;  %v103_v38 = vmul.f32 %v2038_v31, %v101_v37 }
  0xfc   :  { %v223_v42 = vmul.f32 %v2040_v34, %v221_v39 }
 0x15e   :  { %v106_v32 = vpop.permute.xlu0 %105 }
 0x15f   :  { %v108_v33 = vmul.f32 %v2038_v31, %v106_v32 }
 0x161   :  { %110 = vrot.lane.b32.xlu0 %v108_v33, %s2163_s23 }
 0x162   :  { %v226_v35 = vpop.permute.xlu0 %225 }
 0x163   :  { %v228_v36 = vmul.f32 %v2040_v34, %v226_v35 }
 0x165   :  { %230 = vrot.lane.b32.xlu1 %v228_v36, %s2163_s23 }
 0x1d3   :  { %v111_v40 = vpop.permute.xlu0 %110 }
 0x1d4   :  { %v113_v41 = vadd.f32 %v111_v40, %v103_v38 }
 0x1d6   :  { %2041 = vtanh.f32 %v113_v41 }
 0x1d7   :  { %v231_v43 = vpop.permute.xlu1 %230 }
 0x1d8   :  { %v233_v44 = vadd.f32 %v231_v43, %v223_v42 }
 0x1da   :  { %2043 = vtanh.f32 %v233_v44 }
 0x1e0   :  { %v2042_v45 = vpop.eup %2041 }
 0x1e1   :  { %116 = vrot.lane.b32.xlu0 %v2042_v45, %s2164_s28 }
 0x1e4   :  { %v2044_v46 = vpop.eup %2043 }
 0x1e5   :  { %236 = vrot.lane.b32.xlu1 %v2044_v46, %s2164_s28 }
 0x253   :  { %v117_v47 = vpop.permute.xlu0 %116 }
 0x254   :  { %v2262_v48 = vmul.f32 %v2038_v31, %v117_v47 }
 0x256   :  { %121 = vrot.lane.b32.xlu0 %v2262_v48, %s2163_s23 }
 0x257   :  { %v237_v49 = vpop.permute.xlu1 %236 }
 0x258   :  { %v2266_v50 = vmul.f32 %v2040_v34, %v237_v49 }
 0x25a   :  { %241 = vrot.lane.b32.xlu1 %v2266_v50, %s2163_s23  ;;  %126 = vrot.lane.b32.xlu0 %v113_v41, %s2165_s29 }
 0x25e   :  { %246 = vrot.lane.b32.xlu1 %v233_v44, %s2165_s29 }
 0x2c8   :  { %v122_v51 = vpop.permute.xlu0 %121 }
 0x2c9   :  { %124 = vst.msk [vmem:[#allocation2] sm:$0x3] %vm18_vm0, %v122_v51 }
 0x2cc   :  { %v242_v52 = vpop.permute.xlu1 %241  ;;  %v127_v53 = vpop.permute.xlu0 %126 }
 0x2cd   :  { %244 = vst.msk [vmem:[#allocation4] sm:$0x3] %vm18_vm0, %v242_v52  ;;  %129 = vst.msk [vmem:[#allocation3] sm:$0x3] %vm18_vm0, %v127_v53  ;;  %v1797_v52 = vld [vmem:[%s2720_s0 + $0x4] sm:$0x3] }
 0x2d0   :  { %v247_v54 = vpop.permute.xlu1 %246  ;;  %v274_v55 = vld [vmem:[#allocation2] sm:$0x3] }
 0x2d1   :  { %249 = vst.msk [vmem:[#allocation5] sm:$0x3] %vm18_vm0, %v247_v54  ;;  %v275_v56 = vpack.c.bf16 %v274_v55, %v274_v55 }
 0x2d3   :  { %1912 = vmatmul.mubr.msk.bf16.vlgmr.msra.gmra.mrb[4].mxu0 %vm46_vm2, %v275_v56 }
 0x2d4   :  { %v382_v57 = vld [vmem:[#allocation4] sm:$0x3]  ;;  %1924 = vmatpush3.bf16.msra.mxu0 %v2196_v1  ;;  %1927 = vmatprep.mubr.msk.bf16.mxu0 %vm2162_vm1, %v2161_v0  ;;  %v320_v14 = vld [vmem:[#allocation3] sm:$0x3] }
 0x2d5   :  { %v383_v58 = vpack.c.bf16 %v382_v57, %v382_v57  ;;  %1925 = vmatprep.subr.bf16.mxu0 %v2161_v0  ;;  %v1801_v57 = vld [vmem:[%s2721_s1 + $0xa] sm:$0x3] }
 0x2d7   :  { %1920 = vmatmul.mubr.msk.bf16.vlgmr.msra.gmra.mrb[4].mxu1 %vm46_vm2, %v383_v58 }
 0x2d8   :  { %1926 = vmatpush3.bf16.msra.mxu0 %v2220_v3  ;;  %1932 = vmatpush3.bf16.msra.mxu1 %v2210_v2  ;;  %v428_v15 = vld [vmem:[#allocation5] sm:$0x3] }
 0x2d9   :  { %1933 = vmatprep.subr.bf16.mxu1 %v2161_v0  ;;  %1935 = vmatprep.mubr.msk.bf16.mxu1 %vm2162_vm1, %v2161_v0 }
 0x2da   :  { %1939 = vmatprep.subr.bf16.mxu0 %v2161_v0 }
 0x2dc   :  { %1934 = vmatpush3.bf16.msra.mxu1 %v2227_v4 }
 0x2dd   :  { %1947 = vmatprep.subr.bf16.mxu1 %v2161_v0 }
 0x3a6   :  { %v313_v60 = vpop.f32.mrb[4].mxu0 }
 0x3a7   :  { %v319_v61 = vadd.f32 %v1789_v59, %v313_v60  ;;  %v1913_v62 = vpop.f32.mrb[5].mxu0 }
 0x3a8   :  { %v316_v63 = vpop.f32.mrb[6].mxu0 }
 0x3a9   :  { %2045 = vtanh.f32 %v319_v61  ;;  %v1914_v6 = vpop.f32.mrb[7].mxu0  ;;  %v1791_v16 = vmul.f32 -1.442695, %v319_v61 }
 0x3aa   :  { %v421_v7 = vpop.f32.mrb[4].mxu1 }
 0x3ab   :  { %v427_v8 = vadd.f32 %v1793_v5, %v421_v7  ;;  %v1921_v9 = vpop.f32.mrb[5].mxu1 }
 0x3ac   :  { %v424_v10 = vpop.f32.mrb[6].mxu1 }
 0x3ad   :  { %2047 = vtanh.f32 %v427_v8  ;;  %v1922_v11 = vpop.f32.mrb[7].mxu1  ;;  %v1795_v17 = vmul.f32 -1.442695, %v427_v8 }
 0x3ae   :  { %2049 = vpow2.f32 %v1791_v16 }
 0x3af   :  { %2051 = vpow2.f32 %v1795_v17 }
 0x3b3   :  { %v2046_v12 = vpop.eup %2045 }
 0x3b4   :  { %334 = vrot.lane.b32.xlu0 %v2046_v12, %s2164_s28 }
 0x3b7   :  { %v2048_v13 = vpop.eup %2047 }
 0x3b8   :  { %442 = vrot.lane.b32.xlu1 %v2048_v13, %s2164_s28  ;;  %329 = vrot.lane.b32.xlu0 %v320_v14, %s2163_s23  ;;  %v2050_v18 = vpop.eup %2049 }
 0x3b9   :  { %v324_v19 = vadd.f32 1.0, %v2050_v18  ;;  %v2052_v20 = vpop.eup %2051 }
 0x3ba   :  { %v432_v21 = vadd.f32 1.0, %v2052_v20 }
 0x3bb   :  { %2053 = vrcp.f32 %v324_v19 }
 0x3bc   :  { %437 = vrot.lane.b32.xlu1 %v428_v15, %s2163_s23  ;;  %2055 = vrcp.f32 %v432_v21 }
 0x3c5   :  { %v2054_v22 = vpop.eup %2053 }
 0x3c6   :  { %v2056_v25 = vpop.eup %2055 }
 0x426   :  { %v335_v23 = vpop.permute.xlu0 %334 }
 0x427   :  { %v337_v24 = vmul.f32 %v2054_v22, %v335_v23 }
 0x429   :  { %339 = vrot.lane.b32.xlu0 %v337_v24, %s2163_s23 }
 0x42a   :  { %v443_v26 = vpop.permute.xlu1 %442  ;;  %v330_v28 = vpop.permute.xlu0 %329 }
 0x42b   :  { %v445_v27 = vmul.f32 %v2056_v25, %v443_v26  ;;  %v332_v29 = vmul.f32 %v2054_v22, %v330_v28 }
 0x42d   :  { %447 = vrot.lane.b32.xlu1 %v445_v27, %s2163_s23 }
 0x42e   :  { %v438_v30 = vpop.permute.xlu1 %437 }
 0x42f   :  { %v440_v33 = vmul.f32 %v2056_v25, %v438_v30 }
 0x49b   :  { %v340_v31 = vpop.permute.xlu0 %339 }
 0x49c   :  { %v342_v32 = vadd.f32 %v340_v31, %v332_v29 }
 0x49e   :  { %2057 = vtanh.f32 %v342_v32 }
 0x49f   :  { %v448_v34 = vpop.permute.xlu1 %447 }
 0x4a0   :  { %v450_v35 = vadd.f32 %v448_v34, %v440_v33 }
 0x4a2   :  { %2059 = vtanh.f32 %v450_v35 }
 0x4a8   :  { %v2058_v36 = vpop.eup %2057 }
 0x4a9   :  { %345 = vrot.lane.b32.xlu0 %v2058_v36, %s2164_s28 }
 0x4ac   :  { %v2060_v37 = vpop.eup %2059 }
 0x4ad   :  { %453 = vrot.lane.b32.xlu1 %v2060_v37, %s2164_s28 }
 0x51b   :  { %v346_v38 = vpop.permute.xlu0 %345 }
 0x51c   :  { %v2304_v39 = vmul.f32 %v2054_v22, %v346_v38 }
 0x51e   :  { %350 = vrot.lane.b32.xlu0 %v2304_v39, %s2163_s23 }
 0x51f   :  { %v454_v40 = vpop.permute.xlu1 %453 }
 0x520   :  { %v2308_v41 = vmul.f32 %v2056_v25, %v454_v40 }
 0x522   :  { %458 = vrot.lane.b32.xlu1 %v2308_v41, %s2163_s23  ;;  %355 = vrot.lane.b32.xlu0 %v342_v32, %s2165_s29 }
 0x526   :  { %463 = vrot.lane.b32.xlu1 %v450_v35, %s2165_s29 }
 0x590   :  { %v351_v42 = vpop.permute.xlu0 %350 }
 0x591   :  { %353 = vst.msk [vmem:[#allocation2] sm:$0x3] %vm18_vm0, %v351_v42 }
 0x594   :  { %v459_v43 = vpop.permute.xlu1 %458  ;;  %v356_v44 = vpop.permute.xlu0 %355 }
 0x595   :  { %461 = vst.msk [vmem:[#allocation4] sm:$0x3] %vm18_vm0, %v459_v43  ;;  %358 = vst.msk [vmem:[#allocation3] sm:$0x3] %vm18_vm0, %v356_v44 }
 0x598   :  { %v464_v45 = vpop.permute.xlu1 %463  ;;  %v490_v46 = vld [vmem:[#allocation2] sm:$0x3] }
 0x599   :  { %466 = vst.msk [vmem:[#allocation5] sm:$0x3] %vm18_vm0, %v464_v45  ;;  %v491_v47 = vpack.c.bf16 %v490_v46, %v490_v46  ;;  %v1805_v45 = vld [vmem:[%s2720_s0 + $0x6] sm:$0x3] }
 0x59b   :  { %1928 = vmatmul.mubr.msk.bf16.vlgmr.msra.gmra.mrb[8].mxu0 %vm46_vm2, %v491_v47 }
 0x59c   :  { %v598_v49 = vld [vmem:[#allocation4] sm:$0x3]  ;;  %1940 = vmatpush3.bf16.msra.mxu0 %v2196_v1  ;;  %1943 = vmatprep.mubr.msk.bf16.mxu0 %vm2162_vm1, %v2161_v0  ;;  %v536_v7 = vld [vmem:[#allocation3] sm:$0x3] }
 0x59d   :  { %v599_v51 = vpack.c.bf16 %v598_v49, %v598_v49  ;;  %1941 = vmatprep.subr.bf16.mxu0 %v2161_v0 }
 0x59f   :  { %1936 = vmatmul.mubr.msk.bf16.vlgmr.msra.gmra.mrb[8].mxu1 %vm46_vm2, %v599_v51 }
 0x5a0   :  { %1942 = vmatpush3.bf16.msra.mxu0 %v2220_v3  ;;  %1948 = vmatpush3.bf16.msra.mxu1 %v2210_v2  ;;  %v644_v8 = vld [vmem:[#allocation5] sm:$0x3] }
 0x5a1   :  { %1949 = vmatprep.subr.bf16.mxu1 %v2161_v0  ;;  %1951 = vmatprep.mubr.msk.bf16.mxu1 %vm2162_vm1, %v2161_v0 }
 0x5a2   :  { %1955 = vmatprep.subr.bf16.mxu0 %v2161_v0 }
 0x5a4   :  { %1950 = vmatpush3.bf16.msra.mxu1 %v2227_v4 }
 0x5a5   :  { %1963 = vmatprep.subr.bf16.mxu1 %v2161_v0 }
 0x66e   :  { %v529_v53 = vpop.f32.mrb[8].mxu0 }
 0x66f   :  { %v535_v54 = vadd.f32 %v1797_v52, %v529_v53  ;;  %v1929_v55 = vpop.f32.mrb[9].mxu0  ;;  %v1809_v52 = vld [vmem:[%s2721_s1 + $0x8] sm:$0x3] }
 0x670   :  { %v532_v56 = vpop.f32.mrb[10].mxu0 }
 0x671   :  { %2061 = vtanh.f32 %v535_v54  ;;  %v1930_v58 = vpop.f32.mrb[11].mxu0  ;;  %v1799_v9 = vmul.f32 -1.442695, %v535_v54 }
 0x672   :  { %v637_v59 = vpop.f32.mrb[8].mxu1 }
 0x673   :  { %v643_v60 = vadd.f32 %v1801_v57, %v637_v59  ;;  %v1937_v61 = vpop.f32.mrb[9].mxu1 }
 0x674   :  { %v640_v62 = vpop.f32.mrb[10].mxu1 }
 0x675   :  { %2063 = vtanh.f32 %v643_v60  ;;  %v1938_v63 = vpop.f32.mrb[11].mxu1  ;;  %v1803_v10 = vmul.f32 -1.442695, %v643_v60 }
 0x676   :  { %2065 = vpow2.f32 %v1799_v9 }
 0x677   :  { %2067 = vpow2.f32 %v1803_v10 }
 0x67b   :  { %v2062_v5 = vpop.eup %2061 }
 0x67c   :  { %550 = vrot.lane.b32.xlu0 %v2062_v5, %s2164_s28 }
 0x67f   :  { %v2064_v6 = vpop.eup %2063 }
 0x680   :  { %658 = vrot.lane.b32.xlu1 %v2064_v6, %s2164_s28  ;;  %545 = vrot.lane.b32.xlu0 %v536_v7, %s2163_s23  ;;  %v2066_v11 = vpop.eup %2065 }
 0x681   :  { %v540_v12 = vadd.f32 1.0, %v2066_v11  ;;  %v2068_v13 = vpop.eup %2067 }
 0x682   :  { %v648_v14 = vadd.f32 1.0, %v2068_v13 }
 0x683   :  { %2069 = vrcp.f32 %v540_v12 }
 0x684   :  { %653 = vrot.lane.b32.xlu1 %v644_v8, %s2163_s23  ;;  %2071 = vrcp.f32 %v648_v14 }
 0x68d   :  { %v2070_v15 = vpop.eup %2069 }
 0x68e   :  { %v2072_v18 = vpop.eup %2071 }
 0x6ee   :  { %v551_v16 = vpop.permute.xlu0 %550 }
 0x6ef   :  { %v553_v17 = vmul.f32 %v2070_v15, %v551_v16 }
 0x6f1   :  { %555 = vrot.lane.b32.xlu0 %v553_v17, %s2163_s23 }
 0x6f2   :  { %v659_v19 = vpop.permute.xlu1 %658  ;;  %v546_v21 = vpop.permute.xlu0 %545 }
 0x6f3   :  { %v661_v20 = vmul.f32 %v2072_v18, %v659_v19  ;;  %v548_v22 = vmul.f32 %v2070_v15, %v546_v21 }
 0x6f5   :  { %663 = vrot.lane.b32.xlu1 %v661_v20, %s2163_s23 }
 0x6f6   :  { %v654_v23 = vpop.permute.xlu1 %653 }
 0x6f7   :  { %v656_v26 = vmul.f32 %v2072_v18, %v654_v23 }
 0x763   :  { %v556_v24 = vpop.permute.xlu0 %555 }
 0x764   :  { %v558_v25 = vadd.f32 %v556_v24, %v548_v22 }
 0x766   :  { %2073 = vtanh.f32 %v558_v25 }
 0x767   :  { %v664_v27 = vpop.permute.xlu1 %663 }
 0x768   :  { %v666_v28 = vadd.f32 %v664_v27, %v656_v26 }
 0x76a   :  { %2075 = vtanh.f32 %v666_v28 }
 0x770   :  { %v2074_v29 = vpop.eup %2073 }
 0x771   :  { %561 = vrot.lane.b32.xlu0 %v2074_v29, %s2164_s28 }
 0x774   :  { %v2076_v30 = vpop.eup %2075 }
 0x775   :  { %669 = vrot.lane.b32.xlu1 %v2076_v30, %s2164_s28 }
 0x7e3   :  { %v562_v31 = vpop.permute.xlu0 %561 }
 0x7e4   :  { %v2346_v32 = vmul.f32 %v2070_v15, %v562_v31 }
 0x7e6   :  { %566 = vrot.lane.b32.xlu0 %v2346_v32, %s2163_s23 }
 0x7e7   :  { %v670_v33 = vpop.permute.xlu1 %669 }
 0x7e8   :  { %v2350_v34 = vmul.f32 %v2072_v18, %v670_v33 }
 0x7ea   :  { %674 = vrot.lane.b32.xlu1 %v2350_v34, %s2163_s23  ;;  %571 = vrot.lane.b32.xlu0 %v558_v25, %s2165_s29 }
 0x7ee   :  { %679 = vrot.lane.b32.xlu1 %v666_v28, %s2165_s29 }
 0x858   :  { %v567_v35 = vpop.permute.xlu0 %566 }
 0x859   :  { %569 = vst.msk [vmem:[#allocation2] sm:$0x3] %vm18_vm0, %v567_v35 }
 0x85c   :  { %v675_v36 = vpop.permute.xlu1 %674  ;;  %v572_v37 = vpop.permute.xlu0 %571 }
 0x85d   :  { %677 = vst.msk [vmem:[#allocation4] sm:$0x3] %vm18_vm0, %v675_v36  ;;  %574 = vst.msk [vmem:[#allocation3] sm:$0x3] %vm18_vm0, %v572_v37 }
 0x860   :  { %v680_v38 = vpop.permute.xlu1 %679  ;;  %v706_v40 = vld [vmem:[#allocation2] sm:$0x3] }
 0x861   :  { %682 = vst.msk [vmem:[#allocation5] sm:$0x3] %vm18_vm0, %v680_v38  ;;  %v707_v42 = vpack.c.bf16 %v706_v40, %v706_v40 }
 0x863   :  { %1944 = vmatmul.mubr.msk.bf16.vlgmr.msra.gmra.mrb[12].mxu0 %vm46_vm2, %v707_v42  ;;  %v1813_v42 = vld [vmem:[%s2720_s0 + $0x8] sm:$0x3] }
 0x864   :  { %v814_v43 = vld [vmem:[#allocation4] sm:$0x3]  ;;  %1956 = vmatpush3.bf16.msra.mxu0 %v2196_v1  ;;  %1959 = vmatprep.mubr.msk.bf16.mxu0 %vm2162_vm1, %v2161_v0  ;;  %v752_v61 = vld [vmem:[#allocation3] sm:$0x3] }
 0x865   :  { %v815_v44 = vpack.c.bf16 %v814_v43, %v814_v43  ;;  %1957 = vmatprep.subr.bf16.mxu0 %v2161_v0 }
 0x867   :  { %1952 = vmatmul.mubr.msk.bf16.vlgmr.msra.gmra.mrb[12].mxu1 %vm46_vm2, %v815_v44 }
 0x868   :  { %1958 = vmatpush3.bf16.msra.mxu0 %v2220_v3  ;;  %1964 = vmatpush3.bf16.msra.mxu1 %v2210_v2  ;;  %v860_v62 = vld [vmem:[#allocation5] sm:$0x3] }
 0x869   :  { %1965 = vmatprep.subr.bf16.mxu1 %v2161_v0  ;;  %1967 = vmatprep.mubr.msk.bf16.mxu1 %vm2162_vm1, %v2161_v0 }
 0x86a   :  { %1971 = vmatprep.subr.bf16.mxu0 %v2161_v0 }
 0x86c   :  { %1966 = vmatpush3.bf16.msra.mxu1 %v2227_v4 }
 0x86d   :  { %1979 = vmatprep.subr.bf16.mxu1 %v2161_v0 }
 0x936   :  { %v745_v46 = vpop.f32.mrb[12].mxu0 }
 0x937   :  { %v751_v47 = vadd.f32 %v1805_v45, %v745_v46  ;;  %v1945_v49 = vpop.f32.mrb[13].mxu0 }
 0x938   :  { %v748_v51 = vpop.f32.mrb[14].mxu0 }
 0x939   :  { %2077 = vtanh.f32 %v751_v47  ;;  %v1946_v53 = vpop.f32.mrb[15].mxu0  ;;  %v1807_v63 = vmul.f32 -1.442695, %v751_v47  ;;  %v1817_v47 = vld [vmem:[%s2721_s1 + $0x6] sm:$0x3] }
 0x93a   :  { %v853_v54 = vpop.f32.mrb[12].mxu1 }
 0x93b   :  { %v859_v55 = vadd.f32 %v1809_v52, %v853_v54  ;;  %v1953_v56 = vpop.f32.mrb[13].mxu1 }
 0x93c   :  { %v856_v57 = vpop.f32.mrb[14].mxu1 }
 0x93d   :  { %2079 = vtanh.f32 %v859_v55  ;;  %v1954_v58 = vpop.f32.mrb[15].mxu1  ;;  %v1811_v5 = vmul.f32 -1.442695, %v859_v55 }
 0x93e   :  { %2081 = vpow2.f32 %v1807_v63 }
 0x93f   :  { %2083 = vpow2.f32 %v1811_v5 }
 0x943   :  { %v2078_v59 = vpop.eup %2077 }
 0x944   :  { %766 = vrot.lane.b32.xlu0 %v2078_v59, %s2164_s28 }
 0x947   :  { %v2080_v60 = vpop.eup %2079 }
 0x948   :  { %874 = vrot.lane.b32.xlu1 %v2080_v60, %s2164_s28  ;;  %761 = vrot.lane.b32.xlu0 %v752_v61, %s2163_s23  ;;  %v2082_v6 = vpop.eup %2081 }
 0x949   :  { %v756_v7 = vadd.f32 1.0, %v2082_v6  ;;  %v2084_v8 = vpop.eup %2083 }
 0x94a   :  { %v864_v9 = vadd.f32 1.0, %v2084_v8 }
 0x94b   :  { %2085 = vrcp.f32 %v756_v7 }
 0x94c   :  { %869 = vrot.lane.b32.xlu1 %v860_v62, %s2163_s23  ;;  %2087 = vrcp.f32 %v864_v9 }
 0x955   :  { %v2086_v10 = vpop.eup %2085 }
 0x956   :  { %v2088_v13 = vpop.eup %2087 }
 0x9b6   :  { %v767_v11 = vpop.permute.xlu0 %766 }
 0x9b7   :  { %v769_v12 = vmul.f32 %v2086_v10, %v767_v11 }
 0x9b9   :  { %771 = vrot.lane.b32.xlu0 %v769_v12, %s2163_s23 }
 0x9ba   :  { %v875_v14 = vpop.permute.xlu1 %874  ;;  %v762_v16 = vpop.permute.xlu0 %761 }
 0x9bb   :  { %v877_v15 = vmul.f32 %v2088_v13, %v875_v14  ;;  %v764_v17 = vmul.f32 %v2086_v10, %v762_v16 }
 0x9bd   :  { %879 = vrot.lane.b32.xlu1 %v877_v15, %s2163_s23 }
 0x9be   :  { %v870_v18 = vpop.permute.xlu1 %869 }
 0x9bf   :  { %v872_v21 = vmul.f32 %v2088_v13, %v870_v18 }
 0xa2b   :  { %v772_v19 = vpop.permute.xlu0 %771 }
 0xa2c   :  { %v774_v20 = vadd.f32 %v772_v19, %v764_v17 }
 0xa2e   :  { %2089 = vtanh.f32 %v774_v20 }
 0xa2f   :  { %v880_v22 = vpop.permute.xlu1 %879 }
 0xa30   :  { %v882_v23 = vadd.f32 %v880_v22, %v872_v21 }
 0xa32   :  { %2091 = vtanh.f32 %v882_v23 }
 0xa38   :  { %v2090_v24 = vpop.eup %2089 }
 0xa39   :  { %777 = vrot.lane.b32.xlu0 %v2090_v24, %s2164_s28 }
 0xa3c   :  { %v2092_v25 = vpop.eup %2091 }
 0xa3d   :  { %885 = vrot.lane.b32.xlu1 %v2092_v25, %s2164_s28 }
 0xaab   :  { %v778_v26 = vpop.permute.xlu0 %777 }
 0xaac   :  { %v2388_v27 = vmul.f32 %v2086_v10, %v778_v26 }
 0xaae   :  { %782 = vrot.lane.b32.xlu0 %v2388_v27, %s2163_s23 }
 0xaaf   :  { %v886_v28 = vpop.permute.xlu1 %885 }
 0xab0   :  { %v2392_v29 = vmul.f32 %v2088_v13, %v886_v28 }
 0xab2   :  { %890 = vrot.lane.b32.xlu1 %v2392_v29, %s2163_s23  ;;  %787 = vrot.lane.b32.xlu0 %v774_v20, %s2165_s29 }
 0xab6   :  { %895 = vrot.lane.b32.xlu1 %v882_v23, %s2165_s29 }
 0xb20   :  { %v783_v30 = vpop.permute.xlu0 %782 }
 0xb21   :  { %785 = vst.msk [vmem:[#allocation2] sm:$0x3] %vm18_vm0, %v783_v30 }
 0xb24   :  { %v891_v31 = vpop.permute.xlu1 %890  ;;  %v788_v33 = vpop.permute.xlu0 %787 }
 0xb25   :  { %893 = vst.msk [vmem:[#allocation4] sm:$0x3] %vm18_vm0, %v891_v31  ;;  %790 = vst.msk [vmem:[#allocation3] sm:$0x3] %vm18_vm0, %v788_v33 }
 0xb28   :  { %v896_v35 = vpop.permute.xlu1 %895  ;;  %v922_v36 = vld [vmem:[#allocation2] sm:$0x3] }
 0xb29   :  { %898 = vst.msk [vmem:[#allocation5] sm:$0x3] %vm18_vm0, %v896_v35  ;;  %v923_v37 = vpack.c.bf16 %v922_v36, %v922_v36 }
 0xb2b   :  { %1960 = vmatmul.mubr.msk.bf16.vlgmr.msra.gmra.mrb[16].mxu0 %vm46_vm2, %v923_v37 }
 0xb2c   :  { %v1029_v38 = vld [vmem:[#allocation4] sm:$0x3]  ;;  %1972 = vmatpush3.bf16.msra.mxu0 %v2196_v1  ;;  %1975 = vmatprep.mubr.msk.bf16.mxu0 %vm2162_vm1, %v2161_v0  ;;  %v968_v58 = vld [vmem:[#allocation3] sm:$0x3] }
 0xb2d   :  { %v1030_v40 = vpack.c.bf16 %v1029_v38, %v1029_v38  ;;  %1973 = vmatprep.subr.bf16.mxu0 %v2161_v0 }
 0xb2f   :  { %1968 = vmatmul.mubr.msk.bf16.vlgmr.msra.gmra.mrb[16].mxu1 %vm46_vm2, %v1030_v40 }
 0xb30   :  { %1974 = vmatpush3.bf16.msra.mxu0 %v2220_v3  ;;  %1980 = vmatpush3.bf16.msra.mxu1 %v2210_v2  ;;  %v1075_v59 = vld [vmem:[#allocation5] sm:$0x3] }
 0xb31   :  { %1981 = vmatprep.subr.bf16.mxu1 %v2161_v0  ;;  %1983 = vmatprep.mubr.msk.bf16.mxu1 %vm2162_vm1, %v2161_v0 }
 0xb32   :  { %1987 = vmatprep.subr.bf16.mxu0 %v2161_v0 }
 0xb34   :  { %1982 = vmatpush3.bf16.msra.mxu1 %v2227_v4 }
 0xb35   :  { %1995 = vmatprep.subr.bf16.mxu1 %v2161_v0 }
 0xbfe   :  { %v961_v43 = vpop.f32.mrb[16].mxu0 }
 0xbff   :  { %v967_v44 = vadd.f32 %v1813_v42, %v961_v43  ;;  %v1961_v45 = vpop.f32.mrb[17].mxu0 }
 0xc00   :  { %v964_v46 = vpop.f32.mrb[18].mxu0 }
 0xc01   :  { %2093 = vtanh.f32 %v967_v44  ;;  %v1962_v49 = vpop.f32.mrb[19].mxu0  ;;  %v1815_v60 = vmul.f32 -1.442695, %v967_v44 }
 0xc02   :  { %v1068_v51 = vpop.f32.mrb[16].mxu1 }
 0xc03   :  { %v1074_v52 = vadd.f32 %v1817_v47, %v1068_v51  ;;  %v1969_v53 = vpop.f32.mrb[17].mxu1 }
 0xc04   :  { %v1071_v54 = vpop.f32.mrb[18].mxu1 }
 0xc05   :  { %2095 = vtanh.f32 %v1074_v52  ;;  %v1970_v55 = vpop.f32.mrb[19].mxu1  ;;  %v1819_v61 = vmul.f32 -1.442695, %v1074_v52 }
 0xc06   :  { %2097 = vpow2.f32 %v1815_v60 }
 0xc07   :  { %2099 = vpow2.f32 %v1819_v61 }
 0xc0b   :  { %v2094_v56 = vpop.eup %2093 }
 0xc0c   :  { %982 = vrot.lane.b32.xlu0 %v2094_v56, %s2164_s28 }
 0xc0f   :  { %v2096_v57 = vpop.eup %2095 }
 0xc10   :  { %1089 = vrot.lane.b32.xlu1 %v2096_v57, %s2164_s28  ;;  %977 = vrot.lane.b32.xlu0 %v968_v58, %s2163_s23  ;;  %v2098_v62 = vpop.eup %2097 }
 0xc11   :  { %v972_v63 = vadd.f32 1.0, %v2098_v62  ;;  %v2100_v5 = vpop.eup %2099 }
 0xc12   :  { %v1079_v6 = vadd.f32 1.0, %v2100_v5 }
 0xc13   :  { %2101 = vrcp.f32 %v972_v63 }
 0xc14   :  { %1084 = vrot.lane.b32.xlu1 %v1075_v59, %s2163_s23  ;;  %2103 = vrcp.f32 %v1079_v6 }
 0xc1d   :  { %v2102_v7 = vpop.eup %2101 }
 0xc1e   :  { %v2104_v10 = vpop.eup %2103 }
 0xc7e   :  { %v983_v8 = vpop.permute.xlu0 %982 }
 0xc7f   :  { %v985_v9 = vmul.f32 %v2102_v7, %v983_v8 }
 0xc81   :  { %987 = vrot.lane.b32.xlu0 %v985_v9, %s2163_s23 }
 0xc82   :  { %v1090_v11 = vpop.permute.xlu1 %1089  ;;  %v978_v13 = vpop.permute.xlu0 %977 }
 0xc83   :  { %v1092_v12 = vmul.f32 %v2104_v10, %v1090_v11  ;;  %v980_v14 = vmul.f32 %v2102_v7, %v978_v13 }
 0xc85   :  { %1094 = vrot.lane.b32.xlu1 %v1092_v12, %s2163_s23 }
 0xc86   :  { %v1085_v15 = vpop.permute.xlu1 %1084 }
 0xc87   :  { %v1087_v18 = vmul.f32 %v2104_v10, %v1085_v15 }
 0xcf3   :  { %v988_v16 = vpop.permute.xlu0 %987 }
 0xcf4   :  { %v990_v17 = vadd.f32 %v988_v16, %v980_v14 }
 0xcf6   :  { %2105 = vtanh.f32 %v990_v17 }
 0xcf7   :  { %v1095_v19 = vpop.permute.xlu1 %1094 }
 0xcf8   :  { %v1097_v20 = vadd.f32 %v1095_v19, %v1087_v18 }
 0xcfa   :  { %2107 = vtanh.f32 %v1097_v20 }
 0xd00   :  { %v2106_v21 = vpop.eup %2105 }
 0xd01   :  { %993 = vrot.lane.b32.xlu0 %v2106_v21, %s2164_s28 }
 0xd04   :  { %v2108_v22 = vpop.eup %2107 }
 0xd05   :  { %1100 = vrot.lane.b32.xlu1 %v2108_v22, %s2164_s28 }
 0xd73   :  { %v994_v23 = vpop.permute.xlu0 %993 }
 0xd74   :  { %v2430_v24 = vmul.f32 %v2102_v7, %v994_v23 }
 0xd76   :  { %998 = vrot.lane.b32.xlu0 %v2430_v24, %s2163_s23 }
 0xd77   :  { %v1101_v25 = vpop.permute.xlu1 %1100 }
 0xd78   :  { %v2434_v26 = vmul.f32 %v2104_v10, %v1101_v25 }
 0xd7a   :  { %1105 = vrot.lane.b32.xlu1 %v2434_v26, %s2163_s23  ;;  %1003 = vrot.lane.b32.xlu0 %v990_v17, %s2165_s29 }
 0xd7e   :  { %1110 = vrot.lane.b32.xlu1 %v1097_v20, %s2165_s29 }
 0xde8   :  { %v999_v28 = vpop.permute.xlu0 %998 }
 0xde9   :  { %1001 = vst.msk [vmem:[#allocation2] sm:$0x3] %vm18_vm0, %v999_v28 }
 0xdec   :  { %v1106_v30 = vpop.permute.xlu1 %1105  ;;  %v1004_v31 = vpop.permute.xlu0 %1003 }
 0xded   :  { %1108 = vst.msk [vmem:[#allocation4] sm:$0x3] %vm18_vm0, %v1106_v30  ;;  %1006 = vst.msk [vmem:[#allocation3] sm:$0x3] %vm18_vm0, %v1004_v31 }
 0xdf0   :  { %v1111_v33 = vpop.permute.xlu1 %1110  ;;  %v1136_v35 = vld [vmem:[#allocation2] sm:$0x3] }
 0xdf1   :  { %1113 = vst.msk [vmem:[#allocation5] sm:$0x3] %vm18_vm0, %v1111_v33  ;;  %v1137_v36 = vpack.c.bf16 %v1136_v35, %v1136_v35  ;;  %v2157_v35 = vld [vmem:[%s2718_s2] sm:$0xff]  }
 0xdf3   :  { %1976 = vmatmul.mubr.msk.bf16.vlgmr.msra.gmra.mrb[20].mxu0 %vm46_vm2, %v1137_v36 }
 0xdf4   :  { %v1243_v37 = vld [vmem:[#allocation4] sm:$0x3]  ;;  %1988 = vmatpush3.bf16.msra.mxu0 %v2196_v1  ;;  %1991 = vmatprep.mubr.msk.bf16.mxu0 %vm2162_vm1, %v2161_v0  ;;  %v1821_v1 = vld [vmem:[%s2720_s0 + $0xa] sm:$0x3]  ;;  %v1182_v53 = vld [vmem:[#allocation3] sm:$0x3] }
 0xdf5   :  { %v1244_v38 = vpack.c.bf16 %v1243_v37, %v1243_v37  ;;  %1989 = vmatprep.subr.bf16.mxu0 %v2161_v0  ;;  %v2158_v37 = vld [vmem:[%s2718_s2 + $0x8] sm:$0xff]  }
 0xdf7   :  { %1984 = vmatmul.mubr.msk.bf16.vlgmr.msra.gmra.mrb[20].mxu1 %vm46_vm2, %v1244_v38  ;;  %v2159_v38 = vld [vmem:[%s2719_s3] sm:$0xff]  }
 0xdf8   :  { %1990 = vmatpush3.bf16.msra.mxu0 %v2220_v3  ;;  %1996 = vmatpush3.bf16.msra.mxu1 %v2210_v2  ;;  %v1825_v2 = vld [vmem:[%s2721_s1 + $0x4] sm:$0x3]  ;;  %v1289_v54 = vld [vmem:[#allocation5] sm:$0x3] }
 0xdf9   :  { %1997 = vmatprep.subr.bf16.mxu1 %v2161_v0  ;;  %1999 = vmatprep.mubr.msk.bf16.mxu1 %vm2162_vm1, %v2161_v0 }
 0xdfa   :  { %2003 = vmatprep.subr.bf16.mxu0 %v2161_v0 }
 0xdfc   :  { %1998 = vmatpush3.bf16.msra.mxu1 %v2227_v4 }
 0xdfd   :  { %2011 = vmatprep.subr.bf16.mxu1 %v2161_v0 }
 0xec6   :  { %v1175_v40 = vpop.f32.mrb[20].mxu0 }
 0xec7   :  { %v1181_v42 = vadd.f32 %v1821_v1, %v1175_v40  ;;  %v1977_v3 = vpop.f32.mrb[21].mxu0  ;;  %v2160_v1 = vld [vmem:[%s2719_s3 + $0x8] sm:$0xff]  }
 0xec8   :  { %v1178_v43 = vpop.f32.mrb[22].mxu0  ;;  %v1829_v40 = vld [vmem:[%s2720_s0 + $0xc] sm:$0x3] }
 0xec9   :  { %2109 = vtanh.f32 %v1181_v42  ;;  %v1978_v44 = vpop.f32.mrb[23].mxu0  ;;  %v1823_v55 = vmul.f32 -1.442695, %v1181_v42 }
 0xeca   :  { %v1282_v45 = vpop.f32.mrb[20].mxu1  ;;  %v1833_v44 = vld [vmem:[%s2721_s1 + $0x2] sm:$0x3] }
 0xecb   :  { %v1288_v46 = vadd.f32 %v1825_v2, %v1282_v45  ;;  %v1985_v47 = vpop.f32.mrb[21].mxu1 }
 0xecc   :  { %v1285_v4 = vpop.f32.mrb[22].mxu1 }
 0xecd   :  { %2111 = vtanh.f32 %v1288_v46  ;;  %v1986_v49 = vpop.f32.mrb[23].mxu1  ;;  %v1827_v56 = vmul.f32 -1.442695, %v1288_v46 }
 0xece   :  { %2113 = vpow2.f32 %v1823_v55 }
 0xecf   :  { %2115 = vpow2.f32 %v1827_v56 }
 0xed3   :  { %v2110_v51 = vpop.eup %2109 }
 0xed4   :  { %1196 = vrot.lane.b32.xlu0 %v2110_v51, %s2164_s28 }
 0xed7   :  { %v2112_v52 = vpop.eup %2111 }
 0xed8   :  { %1303 = vrot.lane.b32.xlu1 %v2112_v52, %s2164_s28  ;;  %1191 = vrot.lane.b32.xlu0 %v1182_v53, %s2163_s23  ;;  %v2114_v57 = vpop.eup %2113 }
 0xed9   :  { %v1186_v58 = vadd.f32 1.0, %v2114_v57  ;;  %v2116_v59 = vpop.eup %2115 }
 0xeda   :  { %v1293_v60 = vadd.f32 1.0, %v2116_v59 }
 0xedb   :  { %2117 = vrcp.f32 %v1186_v58 }
 0xedc   :  { %1298 = vrot.lane.b32.xlu1 %v1289_v54, %s2163_s23  ;;  %2119 = vrcp.f32 %v1293_v60 }
 0xee5   :  { %v2118_v61 = vpop.eup %2117 }
 0xee6   :  { %v2120_v5 = vpop.eup %2119 }
 0xf46   :  { %v1197_v62 = vpop.permute.xlu0 %1196 }
 0xf47   :  { %v1199_v63 = vmul.f32 %v2118_v61, %v1197_v62 }
 0xf49   :  { %1201 = vrot.lane.b32.xlu0 %v1199_v63, %s2163_s23 }
 0xf4a   :  { %v1304_v6 = vpop.permute.xlu1 %1303  ;;  %v1192_v8 = vpop.permute.xlu0 %1191 }
 0xf4b   :  { %v1306_v7 = vmul.f32 %v2120_v5, %v1304_v6  ;;  %v1194_v9 = vmul.f32 %v2118_v61, %v1192_v8 }
 0xf4d   :  { %1308 = vrot.lane.b32.xlu1 %v1306_v7, %s2163_s23 }
 0xf4e   :  { %v1299_v10 = vpop.permute.xlu1 %1298 }
 0xf4f   :  { %v1301_v13 = vmul.f32 %v2120_v5, %v1299_v10 }
 0xfbb   :  { %v1202_v11 = vpop.permute.xlu0 %1201 }
 0xfbc   :  { %v1204_v12 = vadd.f32 %v1202_v11, %v1194_v9 }
 0xfbe   :  { %2121 = vtanh.f32 %v1204_v12 }
 0xfbf   :  { %v1309_v14 = vpop.permute.xlu1 %1308 }
 0xfc0   :  { %v1311_v15 = vadd.f32 %v1309_v14, %v1301_v13 }
 0xfc2   :  { %2123 = vtanh.f32 %v1311_v15 }
 0xfc8   :  { %v2122_v16 = vpop.eup %2121 }
 0xfc9   :  { %1207 = vrot.lane.b32.xlu0 %v2122_v16, %s2164_s28 }
 0xfcc   :  { %v2124_v17 = vpop.eup %2123 }
 0xfcd   :  { %1314 = vrot.lane.b32.xlu1 %v2124_v17, %s2164_s28 }
0x103b   :  { %v1208_v18 = vpop.permute.xlu0 %1207 }
0x103c   :  { %v2472_v19 = vmul.f32 %v2118_v61, %v1208_v18 }
0x103e   :  { %1212 = vrot.lane.b32.xlu0 %v2472_v19, %s2163_s23 }
0x103f   :  { %v1315_v20 = vpop.permute.xlu1 %1314 }
0x1040   :  { %v2476_v21 = vmul.f32 %v2120_v5, %v1315_v20 }
0x1042   :  { %1319 = vrot.lane.b32.xlu1 %v2476_v21, %s2163_s23  ;;  %1217 = vrot.lane.b32.xlu0 %v1204_v12, %s2165_s29 }
0x1046   :  { %1324 = vrot.lane.b32.xlu1 %v1311_v15, %s2165_s29 }
0x10b0   :  { %v1213_v22 = vpop.permute.xlu0 %1212 }
0x10b1   :  { %1215 = vst.msk [vmem:[#allocation2] sm:$0x3] %vm18_vm0, %v1213_v22 }
0x10b4   :  { %v1320_v23 = vpop.permute.xlu1 %1319  ;;  %v1218_v25 = vpop.permute.xlu0 %1217 }
0x10b5   :  { %1322 = vst.msk [vmem:[#allocation4] sm:$0x3] %vm18_vm0, %v1320_v23  ;;  %1220 = vst.msk [vmem:[#allocation3] sm:$0x3] %vm18_vm0, %v1218_v25 }
0x10b8   :  { %v1325_v28 = vpop.permute.xlu1 %1324  ;;  %v1350_v30 = vld [vmem:[#allocation2] sm:$0x3] }
0x10b9   :  { %1327 = vst.msk [vmem:[#allocation5] sm:$0x3] %vm18_vm0, %v1325_v28  ;;  %v1351_v31 = vpack.c.bf16 %v1350_v30, %v1350_v30 }
0x10bb   :  { %1992 = vmatmul.mubr.msk.bf16.vlgmr.msra.gmra.mrb[24].mxu0 %vm46_vm2, %v1351_v31 }
0x10bc   :  { %v1457_v33 = vld [vmem:[#allocation4] sm:$0x3]  ;;  %2004 = vmatpush3.bf16.msra.mxu0 %v2157_v35  ;;  %2007 = vmatprep.mubr.msk.bf16.mxu0 %vm2162_vm1, %v2161_v0  ;;  %v1396_v53 = vld [vmem:[#allocation3] sm:$0x3] }
0x10bd   :  { %v1458_v36 = vpack.c.bf16 %v1457_v33, %v1457_v33  ;;  %2005 = vmatprep.subr.bf16.mxu0 %v2161_v0 }
0x10bf   :  { %2000 = vmatmul.mubr.msk.bf16.vlgmr.msra.gmra.mrb[24].mxu1 %vm46_vm2, %v1458_v36 }
0x10c0   :  { %2006 = vmatpush3.bf16.msra.mxu0 %v2158_v37  ;;  %2012 = vmatpush3.bf16.msra.mxu1 %v2159_v38  ;;  %v1503_v54 = vld [vmem:[#allocation5] sm:$0x3]  ;;  %v1837_v38 = vld [vmem:[%s2720_s0 + $0xe] sm:$0x3] }
0x10c1   :  { %2013 = vmatprep.subr.bf16.mxu1 %v2161_v0  ;;  %2015 = vmatprep.mubr.msk.bf16.mxu1 %vm2162_vm1, %v2161_v0 }
0x10c4   :  { %2014 = vmatpush3.bf16.msra.mxu1 %v2160_v1 }
0x118e   :  { %v1389_v42 = vpop.f32.mrb[24].mxu0 }
0x118f   :  { %v1395_v3 = vadd.f32 %v1829_v40, %v1389_v42  ;;  %v1993_v43 = vpop.f32.mrb[25].mxu0 }
0x1190   :  { %v1392_v2 = vpop.f32.mrb[26].mxu0  ;;  %v1669_v43 = vld [vmem:[%s2721_s1] sm:$0x3] }
0x1191   :  { %2125 = vtanh.f32 %v1395_v3  ;;  %v1994_v45 = vpop.f32.mrb[27].mxu0  ;;  %v1831_v55 = vmul.f32 -1.442695, %v1395_v3 }
0x1192   :  { %v1496_v0 = vpop.f32.mrb[24].mxu1 }
0x1193   :  { %v1502_v46 = vadd.f32 %v1833_v44, %v1496_v0  ;;  %v2001_v47 = vpop.f32.mrb[25].mxu1 }
0x1194   :  { %v1499_v4 = vpop.f32.mrb[26].mxu1 }
0x1195   :  { %2127 = vtanh.f32 %v1502_v46  ;;  %v2002_v49 = vpop.f32.mrb[27].mxu1  ;;  %v1835_v56 = vmul.f32 -1.442695, %v1502_v46 }
0x1196   :  { %2129 = vpow2.f32 %v1831_v55 }
0x1197   :  { %2131 = vpow2.f32 %v1835_v56 }
0x119b   :  { %v2126_v51 = vpop.eup %2125 }
0x119c   :  { %1410 = vrot.lane.b32.xlu0 %v2126_v51, %s2164_s28 }
0x119f   :  { %v2128_v52 = vpop.eup %2127 }
0x11a0   :  { %1517 = vrot.lane.b32.xlu1 %v2128_v52, %s2164_s28  ;;  %1405 = vrot.lane.b32.xlu0 %v1396_v53, %s2163_s23  ;;  %v2130_v57 = vpop.eup %2129 }
0x11a1   :  { %v1400_v58 = vadd.f32 1.0, %v2130_v57  ;;  %v2132_v59 = vpop.eup %2131 }
0x11a2   :  { %v1507_v60 = vadd.f32 1.0, %v2132_v59 }
0x11a3   :  { %2133 = vrcp.f32 %v1400_v58 }
0x11a4   :  { %1512 = vrot.lane.b32.xlu1 %v1503_v54, %s2163_s23  ;;  %2135 = vrcp.f32 %v1507_v60 }
0x11ad   :  { %v2134_v61 = vpop.eup %2133 }
0x11ae   :  { %v2136_v5 = vpop.eup %2135 }
0x120e   :  { %v1411_v62 = vpop.permute.xlu0 %1410 }
0x120f   :  { %v1413_v63 = vmul.f32 %v2134_v61, %v1411_v62 }
0x1211   :  { %1415 = vrot.lane.b32.xlu0 %v1413_v63, %s2163_s23 }
0x1212   :  { %v1518_v6 = vpop.permute.xlu1 %1517  ;;  %v1406_v8 = vpop.permute.xlu0 %1405 }
0x1213   :  { %v1520_v7 = vmul.f32 %v2136_v5, %v1518_v6  ;;  %v1408_v9 = vmul.f32 %v2134_v61, %v1406_v8  ;;  %v2166_v8 = vmov 1966171168  }
0x1215   :  { %1522 = vrot.lane.b32.xlu1 %v1520_v7, %s2163_s23 }
0x1216   :  { %v1513_v10 = vpop.permute.xlu1 %1512 }
0x1217   :  { %v1515_v13 = vmul.f32 %v2136_v5, %v1513_v10  ;;  %v135_v10 = vlaneseq }
0x1283   :  { %v1416_v11 = vpop.permute.xlu0 %1415 }
0x1284   :  { %v1418_v12 = vadd.f32 %v1416_v11, %v1408_v9  ;;  %v133_v9 = vunpack.c.l.s4 %v2166_v8 }
0x1286   :  { %2137 = vtanh.f32 %v1418_v12 }
0x1287   :  { %v1523_v14 = vpop.permute.xlu1 %1522 }
0x1288   :  { %v1525_v15 = vadd.f32 %v1523_v14, %v1515_v13 }
0x128a   :  { %2139 = vtanh.f32 %v1525_v15 }
0x1290   :  { %v2138_v16 = vpop.eup %2137 }
0x1291   :  { %1421 = vrot.lane.b32.xlu0 %v2138_v16, %s2164_s28  ;;  %v136_v16 = vshrl.u32 %v135_v10, 7 }
0x1294   :  { %v2140_v17 = vpop.eup %2139 }
0x1295   :  { %1528 = vrot.lane.b32.xlu1 %v2140_v17, %s2164_s28 }
0x1303   :  { %v1422_v18 = vpop.permute.xlu0 %1421 }
0x1304   :  { %v2520_v20 = vmul.f32 %v2134_v61, %v1422_v18 }
0x1306   :  { %1426 = vrot.lane.b32.xlu0 %v2520_v20, %s2163_s23 }
0x1307   :  { %v1529_v22 = vpop.permute.xlu1 %1528 }
0x1308   :  { %v2524_v23 = vmul.f32 %v2136_v5, %v1529_v22 }
0x130a   :  { %1533 = vrot.lane.b32.xlu1 %v2524_v23, %s2163_s23  ;;  %1431 = vrot.lane.b32.xlu0 %v1418_v12, %s2165_s29 }
0x130e   :  { %1538 = vrot.lane.b32.xlu1 %v1525_v15, %s2165_s29  ;;  %v134_v15 = vunpack.c.0.s8 %v133_v9 }
0x1310   :  { %v2562_v22 = vsub.s32 %v134_v15, %v136_v16 }
0x1378   :  { %v1427_v25 = vpop.permute.xlu0 %1426 }
0x1379   :  { %1429 = vst.msk [vmem:[#allocation2] sm:$0x3] %vm18_vm0, %v1427_v25  ;;  %v130_v25 = vpack.c.bf16 %v2262_v48, %v2262_v48  ;;  %v575_v48 = vpack.c.bf16 %v2346_v32, %v2346_v32 }
0x137c   :  { %v1534_v28 = vpop.permute.xlu1 %1533  ;;  %v1432_v30 = vpop.permute.xlu0 %1431 }
0x137d   :  { %1536 = vst.msk [vmem:[#allocation4] sm:$0x3] %vm18_vm0, %v1534_v28  ;;  %1434 = vst.msk [vmem:[#allocation3] sm:$0x3] %vm18_vm0, %v1432_v30  ;;  %v250_v28 = vpack.c.bf16 %v2266_v50, %v2266_v50  ;;  %v138_v30 = vrot.slane %v130_v25, %v2562_v22 }
0x137f   :  { %v145_v50 = vrot.slane %v138_v30, %v2562_v22 }
0x1380   :  { %v1539_v31 = vpop.permute.xlu1 %1538  ;;  %v1564_v33 = vld [vmem:[#allocation2] sm:$0x3] }
0x1381   :  { %1541 = vst.msk [vmem:[#allocation5] sm:$0x3] %vm18_vm0, %v1539_v31  ;;  %v1565_v35 = vpack.c.bf16 %v1564_v33, %v1564_v33  ;;  %v359_v31 = vpack.c.bf16 %v2304_v39, %v2304_v39 }
0x1383   :  { %2008 = vmatmul.mubr.msk.bf16.vlgmr.msra.gmra.mrb[28].mxu0 %vm46_vm2, %v1565_v35  ;;  %v258_v35 = vrot.slane %v250_v28, %v2562_v22 }
0x1384   :  { %v1670_v36 = vld [vmem:[#allocation4] sm:$0x3]  ;;  %v1610_v51 = vld [vmem:[#allocation3] sm:$0x3] }
0x1385   :  { %v1671_v37 = vpack.c.bf16 %v1670_v36, %v1670_v36  ;;  %v467_v36 = vpack.c.bf16 %v2308_v41, %v2308_v41  ;;  %v683_v41 = vpack.c.bf16 %v2350_v34, %v2350_v34  ;;  %v1007_v34 = vpack.c.bf16 %v2430_v24, %v2430_v24 }
0x1387   :  { %2016 = vmatmul.mubr.msk.bf16.vlgmr.msra.gmra.mrb[28].mxu1 %vm46_vm2, %v1671_v37  ;;  %v367_v37 = vrot.slane %v359_v31, %v2562_v22  ;;  %v475_v39 = vrot.slane %v467_v36, %v2562_v22 }
0x1388   :  { %v1716_v52 = vld [vmem:[#allocation5] sm:$0x3] }
0x1389   :  { %v374_v32 = vrot.slane %v367_v37, %v2562_v22 }
0x1456   :  { %v1603_v1 = vpop.f32.mrb[28].mxu0 }
0x1457   :  { %v1609_v40 = vadd.f32 %v1837_v38, %v1603_v1  ;;  %v2009_v42 = vpop.f32.mrb[29].mxu0  ;;  %v265_v1 = vrot.slane %v258_v35, %v2562_v22 }
0x1458   :  { %v1606_v3 = vpop.f32.mrb[30].mxu0  ;;  %v791_v42 = vpack.c.bf16 %v2388_v27, %v2388_v27 }
0x1459   :  { %2141 = vtanh.f32 %v1609_v40  ;;  %v2010_v2 = vpop.f32.mrb[31].mxu0  ;;  %v1839_v53 = vmul.f32 -1.442695, %v1609_v40  ;;  %v583_v40 = vrot.slane %v575_v48, %v2562_v22  ;;  %v899_v3 = vpack.c.bf16 %v2392_v29, %v2392_v29 }
0x145a   :  { %v1709_v44 = vpop.f32.mrb[28].mxu1  ;;  %v691_v2 = vrot.slane %v683_v41, %v2562_v22  ;;  %v1114_v29 = vpack.c.bf16 %v2434_v26, %v2434_v26 }
0x145b   :  { %v1715_v45 = vadd.f32 %v1709_v44, %v1669_v43  ;;  %v2017_v0 = vpop.f32.mrb[29].mxu1  ;;  %v482_v43 = vrot.slane %v475_v39, %v2562_v22  ;;  %v799_v44 = vrot.slane %v791_v42, %v2562_v22  ;;  %v590_v27 = vrot.slane %v583_v40, %v2562_v22 }
0x145c   :  { %v1712_v46 = vpop.f32.mrb[30].mxu1  ;;  %v698_v24 = vrot.slane %v691_v2, %v2562_v22 }
0x145d   :  { %2143 = vtanh.f32 %v1715_v45  ;;  %v2018_v47 = vpop.f32.mrb[31].mxu1  ;;  %v1842_v54 = vmul.f32 -1.442695, %v1715_v45  ;;  %v907_v45 = vrot.slane %v899_v3, %v2562_v22  ;;  %v806_v0 = vrot.slane %v799_v44, %v2562_v22 }
0x145e   :  { %2145 = vpow2.f32 %v1839_v53  ;;  %v1015_v46 = vrot.slane %v1007_v34, %v2562_v22  ;;  %v1221_v47 = vpack.c.bf16 %v2472_v19, %v2472_v19  ;;  %v1435_v19 = vpack.c.bf16 %v2520_v20, %v2520_v20 }
0x145f   :  { %2147 = vpow2.f32 %v1842_v54 }
0x1460   :  { %v1229_v26 = vrot.slane %v1221_v47, %v2562_v22 }
0x1462   :  { %v1236_v54 = vrot.slane %v1229_v26, %v2562_v22 }
0x1463   :  { %v2142_v4 = vpop.eup %2141 }
0x1464   :  { %1624 = vrot.lane.b32.xlu0 %v2142_v4, %s2164_s28  ;;  %v914_v4 = vrot.slane %v907_v45, %v2562_v22 }
0x1467   :  { %v2144_v49 = vpop.eup %2143 }
0x1468   :  { %1730 = vrot.lane.b32.xlu1 %v2144_v49, %s2164_s28  ;;  %1619 = vrot.lane.b32.xlu0 %v1610_v51, %s2163_s23  ;;  %v2146_v55 = vpop.eup %2145  ;;  %v1122_v49 = vrot.slane %v1114_v29, %v2562_v22  ;;  %v1022_v51 = vrot.slane %v1015_v46, %v2562_v22 }
0x1469   :  { %v1614_v56 = vadd.f32 1.0, %v2146_v55  ;;  %v2148_v57 = vpop.eup %2147 }
0x146a   :  { %v1720_v58 = vadd.f32 1.0, %v2148_v57  ;;  %v1129_v53 = vrot.slane %v1122_v49, %v2562_v22  ;;  %v1542_v57 = vpack.c.bf16 %v2524_v23, %v2524_v23 }
0x146b   :  { %2149 = vrcp.f32 %v1614_v56  ;;  %v1443_v56 = vrot.slane %v1435_v19, %v2562_v22 }
0x146c   :  { %1725 = vrot.lane.b32.xlu1 %v1716_v52, %s2163_s23  ;;  %2151 = vrcp.f32 %v1720_v58  ;;  %v1328_v52 = vpack.c.bf16 %v2476_v21, %v2476_v21  ;;  %v1550_v58 = vrot.slane %v1542_v57, %v2562_v22 }
0x146d   :  { %v1450_v20 = vrot.slane %v1443_v56, %v2562_v22 }
0x146e   :  { %v1336_v55 = vrot.slane %v1328_v52, %v2562_v22 }
0x1470   :  { %v1343_v21 = vrot.slane %v1336_v55, %v2562_v22 }
0x1475   :  { %v2546_v59 = vpop.eup %2149 }
0x1476   :  { %v2550_v62 = vpop.eup %2151 }
0x14d6   :  { %v1625_v60 = vpop.permute.xlu0 %1624 }
0x14d7   :  { %v1627_v61 = vmul.f32 %v2546_v59, %v1625_v60  ;;  %v1557_v60 = vrot.slane %v1550_v58, %v2562_v22 }
0x14d9   :  { %1629 = vrot.lane.b32.xlu0 %v1627_v61, %s2163_s23 }
0x14da   :  { %v1731_v63 = vpop.permute.xlu1 %1730  ;;  %v1620_v6 = vpop.permute.xlu0 %1619 }
0x14db   :  { %v1733_v5 = vmul.f32 %v2550_v62, %v1731_v63  ;;  %v1622_v7 = vmul.f32 %v2546_v59, %v1620_v6 }
0x14dd   :  { %1735 = vrot.lane.b32.xlu1 %v1733_v5, %s2163_s23 }
0x14de   :  { %v1726_v11 = vpop.permute.xlu1 %1725 }
0x14df   :  { %v1728_v14 = vmul.f32 %v2550_v62, %v1726_v11 }
0x154b   :  { %v1630_v12 = vpop.permute.xlu0 %1629 }
0x154c   :  { %v2555_v13 = vadd.f32 %v1630_v12, %v1622_v7 }
0x154e   :  { %2153 = vtanh.f32 %v2555_v13 }
0x154f   :  { %v1736_v17 = vpop.permute.xlu1 %1735 }
0x1550   :  { %v2559_v18 = vadd.f32 %v1736_v17, %v1728_v14 }
0x1552   :  { %2155 = vtanh.f32 %v2559_v18 }
0x1558   :  { %v2154_v33 = vpop.eup %2153 }
0x1559   :  { %1635 = vrot.lane.b32.xlu0 %v2154_v33, %s2164_s28 }
0x155c   :  { %v2156_v38 = vpop.eup %2155 }
0x155d   :  { %1741 = vrot.lane.b32.xlu1 %v2156_v38, %s2164_s28  ;;  %146 = vrot.lane.b32.xlu0 %v145_v50, %s2163_s23 }
0x1561   :  { %266 = vrot.lane.b32.xlu1 %v265_v1, %s2164_s28  ;;  %375 = vrot.lane.b32.xlu0 %v374_v32, %s2163_s23 }
0x1565   :  { %483 = vrot.lane.b32.xlu1 %v482_v43, %s2164_s28  ;;  %591 = vrot.lane.b32.xlu0 %v590_v27, %s2163_s23 }
0x1569   :  { %699 = vrot.lane.b32.xlu1 %v698_v24, %s2164_s28  ;;  %807 = vrot.lane.b32.xlu0 %v806_v0, %s2163_s23 }
0x156d   :  { %915 = vrot.lane.b32.xlu1 %v914_v4, %s2164_s28  ;;  %1023 = vrot.lane.b32.xlu0 %v1022_v51, %s2163_s23 }
0x1571   :  { %1130 = vrot.lane.b32.xlu1 %v1129_v53, %s2164_s28  ;;  %1237 = vrot.lane.b32.xlu0 %v1236_v54, %s2163_s23 }
0x1575   :  { %1344 = vrot.lane.b32.xlu1 %v1343_v21, %s2164_s28  ;;  %1451 = vrot.lane.b32.xlu0 %v1450_v20, %s2163_s23 }
0x1579   :  { %1558 = vrot.lane.b32.xlu1 %v1557_v60, %s2164_s28 }
0x157d   :  { %1645 = vrot.lane.b32.xlu1 %v2555_v13, %s2165_s29 }
0x15cb   :  { %v1636_v23 = vpop.permute.xlu0 %1635 }
0x15cc   :  { %v1638_v61 = vmul.f32 %v2546_v59, %v1636_v23 }
0x15ce   :  { %v1649_v63 = vpack.c.bf16 %v1638_v61, %v1638_v61  ;;  %1640 = vrot.lane.b32.xlu0 %v1638_v61, %s2163_s23 }
0x15cf   :  { %v1742_v5 = vpop.permute.xlu1 %1741  ;;  %v147_v6 = vpop.permute.xlu0 %146 }
0x15d0   :  { %v1657_v7 = vrot.slane %v1649_v63, %v2562_v22  ;;  %v1744_v8 = vmul.f32 %v2550_v62, %v1742_v5  ;;  %150 = vst.msk [vmem:[%s2722_s4] sm:$0x1] %vm149_vm3, %v147_v6 }
0x15d2   :  { %v1664_v9 = vrot.slane %v1657_v7, %v2562_v22  ;;  %v1755_v10 = vpack.c.bf16 %v1744_v8, %v1744_v8  ;;  %1746 = vrot.lane.b32.xlu1 %v1744_v8, %s2163_s23 }
0x15d3   :  { %v267_v59 = vpop.permute.xlu1 %266  ;;  %v376_v11 = vpop.permute.xlu0 %375 }
0x15d4   :  { %v1763_v12 = vrot.slane %v1755_v10, %v2562_v22  ;;  %1788 = vst.msk [vmem:[%s2722_s4 + $0x7] sm:$0x1] %vm270_vm4, %v267_v59  ;;  %1665 = vrot.lane.b32.xlu0 %v1664_v9, %s2163_s23 }
0x15d5   :  { %1792 = vst.msk [vmem:[%s2722_s4 + $0x1] sm:$0x1] %vm149_vm3, %v376_v11 }
0x15d6   :  { %v1770_v62 = vrot.slane %v1763_v12, %v2562_v22 }
0x15d7   :  { %v484_v13 = vpop.permute.xlu1 %483  ;;  %v592_v14 = vpop.permute.xlu0 %591 }
0x15d8   :  { %1796 = vst.msk [vmem:[%s2722_s4 + $0x6] sm:$0x1] %vm270_vm4, %v484_v13  ;;  %1771 = vrot.lane.b32.xlu1 %v1770_v62, %s2164_s28  ;;  %1751 = vrot.lane.b32.xlu0 %v2559_v18, %s2165_s29 }
0x15d9   :  { %1800 = vst.msk [vmem:[%s2722_s4 + $0x2] sm:$0x1] %vm149_vm3, %v592_v14 }
0x15db   :  { %v700_v15 = vpop.permute.xlu1 %699  ;;  %v808_v16 = vpop.permute.xlu0 %807 }
0x15dc   :  { %1804 = vst.msk [vmem:[%s2722_s4 + $0x5] sm:$0x1] %vm270_vm4, %v700_v15 }
0x15dd   :  { %1808 = vst.msk [vmem:[%s2722_s4 + $0x3] sm:$0x1] %vm149_vm3, %v808_v16 }
0x15df   :  { %v916_v17 = vpop.permute.xlu1 %915  ;;  %v1024_v22 = vpop.permute.xlu0 %1023 }
0x15e0   :  { %1812 = vst.msk [vmem:[%s2722_s4 + $0x4] sm:$0x1] %vm270_vm4, %v916_v17 }
0x15e1   :  { %1816 = vst.msk [vmem:[%s2722_s4 + $0x4] sm:$0x1] %vm149_vm3, %v1024_v22 }
0x15e3   :  { %v1131_v18 = vpop.permute.xlu1 %1130  ;;  %v1238_v25 = vpop.permute.xlu0 %1237 }
0x15e4   :  { %1820 = vst.msk [vmem:[%s2722_s4 + $0x3] sm:$0x1] %vm270_vm4, %v1131_v18 }
0x15e5   :  { %1824 = vst.msk [vmem:[%s2722_s4 + $0x5] sm:$0x1] %vm149_vm3, %v1238_v25 }
0x15e7   :  { %v1345_v28 = vpop.permute.xlu1 %1344  ;;  %v1452_v30 = vpop.permute.xlu0 %1451 }
0x15e8   :  { %1828 = vst.msk [vmem:[%s2722_s4 + $0x2] sm:$0x1] %vm270_vm4, %v1345_v28 }
0x15e9   :  { %1832 = vst.msk [vmem:[%s2722_s4 + $0x6] sm:$0x1] %vm149_vm3, %v1452_v30 }
0x15eb   :  { %v1559_v31 = vpop.permute.xlu1 %1558 }
0x15ec   :  { %1836 = vst.msk [vmem:[%s2722_s4 + $0x1] sm:$0x1] %vm270_vm4, %v1559_v31 }
0x15ef   :  { %v1646_v33 = vpop.permute.xlu1 %1645 }
0x15f0   :  { %1648 = vst.msk [vmem:[#allocation3] sm:$0x3] %vm18_vm0, %v1646_v33 }
0x1640   :  { %v1641_v35 = vpop.permute.xlu0 %1640 }
0x1641   :  { %1643 = vst.msk [vmem:[#allocation2] sm:$0x3] %vm18_vm0, %v1641_v35 }
0x1644   :  { %v1747_v36 = vpop.permute.xlu1 %1746 }
0x1645   :  { %1749 = vst.msk [vmem:[#allocation4] sm:$0x3] %vm18_vm0, %v1747_v36 }
0x1646   :  { %v1666_v37 = vpop.permute.xlu0 %1665 }
0x1647   :  { %1840 = vst.msk [vmem:[%s2722_s4 + $0x7] sm:$0x1] %vm149_vm3, %v1666_v37 }
0x164a   :  { %v1772_v48 = vpop.permute.xlu1 %1771  ;;  %v1752_v50 = vpop.permute.xlu0 %1751 }
0x164b   :  { %1774 = vst.msk [vmem:[%s2722_s4] sm:$0x1] %vm270_vm4, %v1772_v48 }
0x164c   :  { %1754 = vst.msk [vmem:[#allocation5] sm:$0x3] %vm18_vm0, %v1752_v50 }

// kernel: birnn_forward.3
= control target key start
LH: loop header
LB: loop body
LE: loop exit
PB: predicated region body
PF: predicated region fallthrough
CT: control target
= control target key end

     0   :  { %13 = vsyncpa [#allocation7], 0  ;;  %v2419_v1 = vmov 0.0   ;;  %vm2420_vm0 = vmmov 0   ;;  %vm28_vm1 = vcmask 254976   ;;  %vm56_vm2 = vcmask 261120   ;;  %s3005_s0 = inlined_call_operand.vmem [shape: f32[8,2,128], index: 0, kind: input, shape index: {}]   ;;  %s3006_s1 = inlined_call_operand.vmem [shape: f32[8,2,128], index: 1, kind: input, shape index: {}]   ;;  %s3007_s2 = inlined_call_operand.vmem [shape: bf16[32,128], index: 2, kind: input, shape index: {}]   ;;  %s3008_s3 = inlined_call_operand.vmem [shape: bf16[32,128], index: 3, kind: input, shape index: {}]   ;;  %s3009_s4 = inlined_call_operand.vmem [shape: bf16[128,2], index: 4, kind: input, shape index: {}]   ;;  %s3010_s5 = inlined_call_operand.vmem [shape: f32[1,2], index: 5, kind: input, shape index: {}]   ;;  %s3011_s6 = inlined_call_operand.hbm [shape: bf16[8,2,64], index: 6, kind: output, shape index: {0}]   ;;  %s3012_s7 = inlined_call_operand.hbm [shape: f32[2,2], index: 7, kind: output, shape index: {1}]  }
   0x1   :  { %v2472_v0 = vld [vmem:[%s3007_s2] sm:$0xff]   ;;  %2069 = vmatprep.subr.bf16.mxu1 %v2419_v1  ;;  %2101 = vmatprep.subr.bf16.mxu0 %v2419_v1  ;;  %v2480_v2 = vld [vmem:[%s3007_s2 + $0x8] sm:$0xff]   ;;  %29 = vst.msk [vmem:[#allocation2] sm:$0x3] %vm28_vm1, %v2419_v1  ;;  %30 = vst.msk [vmem:[#allocation3] sm:$0x3] %vm28_vm1, %v2419_v1 }
   0x2   :  { %2070 = vmatpush3.bf16.msra.mxu1 %v2472_v0  ;;  %2073 = vmatprep.mubr.msk.bf16.mxu1 %vm2420_vm0, %v2419_v1  ;;  %31 = vst.msk [vmem:[#allocation4] sm:$0x3] %vm28_vm1, %v2419_v1  ;;  %32 = vst.msk [vmem:[#allocation5] sm:$0x3] %vm28_vm1, %v2419_v1  ;;  %v2504_v4 = vld [vmem:[%s3008_s3] sm:$0xff]  }
   0x3   :  { %2071 = vmatprep.subr.bf16.mxu1 %v2419_v1  ;;  %2102 = vmatpush3.bf16.msra.mxu0 %v2472_v0 }
   0x4   :  { %2103 = vmatprep.subr.bf16.mxu0 %v2419_v1  ;;  %2105 = vmatprep.mubr.msk.bf16.mxu0 %vm2420_vm0, %v2419_v1 }
   0x6   :  { %2072 = vmatpush3.bf16.msra.mxu1 %v2480_v2 }
   0x7   :  { %2077 = vmatprep.subr.bf16.mxu1 %v2419_v1  ;;  %2104 = vmatpush3.bf16.msra.mxu0 %v2480_v2 }
   0x8   :  { %2117 = vmatprep.subr.bf16.mxu0 %v2419_v1  ;;  %v42_v3 = vld [vmem:[#allocation2] sm:$0x3] }
   0x9   :  { %14 = vsyncpa [#allocation9], 0  ;;  %v43_v5 = vpack.c.bf16 %v42_v3, %v42_v3  ;;  %v2511_v6 = vld [vmem:[%s3008_s3 + $0x8] sm:$0xff]   ;;  %v163_v7 = vld [vmem:[#allocation4] sm:$0x3]  ;;  %s2421_s11 = smov 64  }
   0xa   :  { %v164_v8 = vpack.c.bf16 %v163_v7, %v163_v7  ;;  %v41_v9 = vld [vmem:[%s3005_s0] sm:$0x3]  ;;  %v101_v20 = vld [vmem:[#allocation3] sm:$0x3]  ;;  %s2422_s12 = smov 32   ;;  %s2423_s15 = smov 96  }
   0xb   :  { %2074 = vmatmul.mubr.msk.bf16.vlgmr.msra.gmra.mrb[0].mxu1 %vm56_vm2, %v43_v5  ;;  %v221_v21 = vld [vmem:[#allocation5] sm:$0x3]  ;;  %v1956_v25 = vld [vmem:[%s3006_s1 + $0xe] sm:$0x3]  ;;  %v1961_v59 = vld [vmem:[%s3005_s0 + $0x2] sm:$0x3] }
   0xc   :  { %2078 = vmatpush3.bf16.msra.mxu1 %v2504_v4  ;;  %2081 = vmatprep.mubr.msk.bf16.mxu1 %vm2420_vm0, %v2419_v1  ;;  %vm280_vm3 = vcmask 516352   ;;  %vm159_vm4 = vcmask 253952   ;;  %vm1804_vm5 = vcmask 523264  }
   0xd   :  { %2079 = vmatprep.subr.bf16.mxu1 %v2419_v1 }
  0x10   :  { %2080 = vmatpush3.bf16.msra.mxu1 %v2511_v6 }
  0x11   :  { %2085 = vmatprep.subr.bf16.mxu1 %v2419_v1 }
  0x13   :  { %2082 = vmatmul.mubr.msk.bf16.vlgmr.msra.gmra.mrb[4].mxu1 %vm56_vm2, %v164_v8 }
  0x14   :  { %2086 = vmatpush3.bf16.msra.mxu1 %v2472_v0  ;;  %2089 = vmatprep.mubr.msk.bf16.mxu1 %vm2420_vm0, %v2419_v1 }
  0x15   :  { %2087 = vmatprep.subr.bf16.mxu1 %v2419_v1 }
  0x18   :  { %2088 = vmatpush3.bf16.msra.mxu1 %v2480_v2 }
  0x19   :  { %2093 = vmatprep.subr.bf16.mxu1 %v2419_v1 }
  0xde   :  { %v94_v10 = vpop.f32.mrb[0].mxu1 }
  0xdf   :  { %v100_v11 = vadd.f32 %v94_v10, %v41_v9  ;;  %v2075_v12 = vpop.f32.mrb[1].mxu1 }
  0xe0   :  { %v97_v13 = vpop.f32.mrb[2].mxu1 }
  0xe1   :  { %2239 = vtanh.f32 %v100_v11  ;;  %v2076_v14 = vpop.f32.mrb[3].mxu1  ;;  %v1955_v22 = vmul.f32 -1.442695, %v100_v11  ;;  %v1964_v11 = vld [vmem:[%s3006_s1 + $0xc] sm:$0x3] }
  0xe3   :  { %2241 = vpow2.f32 %v1955_v22 }
  0xe6   :  { %v214_v15 = vpop.f32.mrb[4].mxu1 }
  0xe7   :  { %v2083_v16 = vpop.f32.mrb[5].mxu1  ;;  %v220_v26 = vadd.f32 %v1956_v25, %v214_v15 }
  0xe8   :  { %v217_v17 = vpop.f32.mrb[6].mxu1 }
  0xe9   :  { %v2084_v18 = vpop.f32.mrb[7].mxu1  ;;  %v1960_v31 = vmul.f32 -1.442695, %v220_v26 }
  0xeb   :  { %v2240_v19 = vpop.eup %2239 }
  0xec   :  { %115 = vrot.lane.b32.xlu0 %v2240_v19, %s2421_s11 }
  0xed   :  { %v2242_v23 = vpop.eup %2241 }
  0xee   :  { %v105_v24 = vadd.f32 1.0, %v2242_v23 }
  0xf0   :  { %110 = vrot.lane.b32.xlu0 %v101_v20, %s2422_s12  ;;  %2243 = vrcp.f32 %v105_v24 }
  0xf1   :  { %2245 = vtanh.f32 %v220_v26 }
  0xf2   :  { %2247 = vpow2.f32 %v1960_v31 }
  0xf4   :  { %230 = vrot.lane.b32.xlu0 %v221_v21, %s2422_s12 }
  0xfa   :  { %v2244_v27 = vpop.eup %2243 }
  0xfb   :  { %v2246_v30 = vpop.eup %2245 }
  0xfc   :  { %v2248_v32 = vpop.eup %2247 }
  0xfd   :  { %v225_v33 = vadd.f32 1.0, %v2248_v32 }
  0xff   :  { %2249 = vrcp.f32 %v225_v33 }
 0x109   :  { %v2250_v38 = vpop.eup %2249 }
 0x15e   :  { %v116_v28 = vpop.permute.xlu0 %115 }
 0x15f   :  { %v118_v29 = vmul.f32 %v2244_v27, %v116_v28 }
 0x161   :  { %120 = vrot.lane.b32.xlu1 %v118_v29, %s2422_s12 }
 0x162   :  { %v111_v34 = vpop.permute.xlu0 %110 }
 0x163   :  { %v113_v35 = vmul.f32 %v2244_v27, %v111_v34 }
 0x165   :  { %235 = vrot.lane.b32.xlu1 %v2246_v30, %s2421_s11 }
 0x166   :  { %v231_v42 = vpop.permute.xlu0 %230 }
 0x167   :  { %v233_v43 = vmul.f32 %v2250_v38, %v231_v42 }
 0x1d3   :  { %v121_v36 = vpop.permute.xlu1 %120 }
 0x1d4   :  { %v123_v37 = vadd.f32 %v121_v36, %v113_v35 }
 0x1d6   :  { %2251 = vtanh.f32 %v123_v37 }
 0x1d7   :  { %v236_v39 = vpop.permute.xlu1 %235 }
 0x1d8   :  { %v238_v40 = vmul.f32 %v2250_v38, %v236_v39 }
 0x1da   :  { %240 = vrot.lane.b32.xlu1 %v238_v40, %s2422_s12 }
 0x1e0   :  { %v2252_v41 = vpop.eup %2251 }
 0x1e1   :  { %126 = vrot.lane.b32.xlu0 %v2252_v41, %s2421_s11 }
 0x24c   :  { %v241_v44 = vpop.permute.xlu1 %240 }
 0x24d   :  { %v243_v45 = vadd.f32 %v241_v44, %v233_v43 }
 0x24f   :  { %2253 = vtanh.f32 %v243_v45 }
 0x253   :  { %v127_v46 = vpop.permute.xlu0 %126 }
 0x254   :  { %v2538_v47 = vmul.f32 %v2244_v27, %v127_v46 }
 0x256   :  { %131 = vrot.lane.b32.xlu1 %v2538_v47, %s2422_s12 }
 0x259   :  { %v2254_v48 = vpop.eup %2253 }
 0x25a   :  { %246 = vrot.lane.b32.xlu0 %v2254_v48, %s2421_s11 }
 0x25e   :  { %136 = vrot.lane.b32.xlu0 %v123_v37, %s2423_s15 }
 0x262   :  { %256 = vrot.lane.b32.xlu0 %v243_v45, %s2423_s15 }
 0x2c8   :  { %v132_v49 = vpop.permute.xlu1 %131 }
 0x2c9   :  { %134 = vst.msk [vmem:[#allocation2] sm:$0x3] %vm28_vm1, %v132_v49 }
 0x2cc   :  { %v247_v50 = vpop.permute.xlu0 %246 }
 0x2cd   :  { %v2546_v51 = vmul.f32 %v2250_v38, %v247_v50 }
 0x2cf   :  { %251 = vrot.lane.b32.xlu1 %v2546_v51, %s2422_s12 }
 0x2d0   :  { %v137_v52 = vpop.permute.xlu0 %136  ;;  %v284_v53 = vld [vmem:[#allocation2] sm:$0x3] }
 0x2d1   :  { %139 = vst.msk [vmem:[#allocation3] sm:$0x3] %vm28_vm1, %v137_v52  ;;  %v285_v54 = vpack.c.bf16 %v284_v53, %v284_v53  ;;  %v1967_v52 = vld [vmem:[%s3005_s0 + $0x4] sm:$0x3] }
 0x2d3   :  { %2090 = vmatmul.mubr.msk.bf16.vlgmr.msra.gmra.mrb[8].mxu1 %vm56_vm2, %v285_v54 }
 0x2d4   :  { %v257_v55 = vpop.permute.xlu0 %256  ;;  %2094 = vmatpush3.bf16.msra.mxu1 %v2504_v4  ;;  %2097 = vmatprep.mubr.msk.bf16.mxu1 %vm2420_vm0, %v2419_v1 }
 0x2d5   :  { %259 = vst.msk [vmem:[#allocation5] sm:$0x3] %vm28_vm1, %v257_v55  ;;  %2095 = vmatprep.subr.bf16.mxu1 %v2419_v1 }
 0x2d8   :  { %2096 = vmatpush3.bf16.msra.mxu1 %v2511_v6  ;;  %v330_v7 = vld [vmem:[#allocation3] sm:$0x3] }
 0x2d9   :  { %2109 = vmatprep.subr.bf16.mxu1 %v2419_v1 }
 0x2dc   :  { %v438_v21 = vld [vmem:[#allocation5] sm:$0x3] }
 0x341   :  { %v252_v56 = vpop.permute.xlu1 %251 }
 0x342   :  { %254 = vst.msk [vmem:[#allocation4] sm:$0x3] %vm28_vm1, %v252_v56 }
 0x349   :  { %v392_v57 = vld [vmem:[#allocation4] sm:$0x3] }
 0x34a   :  { %v393_v58 = vpack.c.bf16 %v392_v57, %v392_v57 }
 0x34c   :  { %2098 = vmatmul.mubr.msk.bf16.vlgmr.msra.gmra.mrb[12].mxu1 %vm56_vm2, %v393_v58 }
 0x34d   :  { %2110 = vmatpush3.bf16.msra.mxu1 %v2504_v4  ;;  %2113 = vmatprep.mubr.msk.bf16.mxu1 %vm2420_vm0, %v2419_v1 }
 0x34e   :  { %2111 = vmatprep.subr.bf16.mxu1 %v2419_v1 }
 0x351   :  { %2112 = vmatpush3.bf16.msra.mxu1 %v2511_v6 }
 0x352   :  { %2125 = vmatprep.subr.bf16.mxu1 %v2419_v1 }
 0x3a6   :  { %v323_v60 = vpop.f32.mrb[8].mxu1 }
 0x3a7   :  { %v329_v61 = vadd.f32 %v1961_v59, %v323_v60  ;;  %v2091_v62 = vpop.f32.mrb[9].mxu1 }
 0x3a8   :  { %v326_v63 = vpop.f32.mrb[10].mxu1 }
 0x3a9   :  { %2255 = vtanh.f32 %v329_v61  ;;  %v2092_v3 = vpop.f32.mrb[11].mxu1  ;;  %v1963_v8 = vmul.f32 -1.442695, %v329_v61  ;;  %v1970_v63 = vld [vmem:[%s3006_s1 + $0xa] sm:$0x3] }
 0x3ab   :  { %2257 = vpow2.f32 %v1963_v8 }
 0x3b3   :  { %v2256_v5 = vpop.eup %2255 }
 0x3b4   :  { %344 = vrot.lane.b32.xlu1 %v2256_v5, %s2421_s11 }
 0x3b5   :  { %v2258_v9 = vpop.eup %2257 }
 0x3b6   :  { %v334_v10 = vadd.f32 1.0, %v2258_v9 }
 0x3b8   :  { %339 = vrot.lane.b32.xlu1 %v330_v7, %s2422_s12  ;;  %2259 = vrcp.f32 %v334_v10 }
 0x3c2   :  { %v2260_v17 = vpop.eup %2259 }
 0x41f   :  { %v431_v12 = vpop.f32.mrb[12].mxu1 }
 0x420   :  { %v437_v13 = vadd.f32 %v1964_v11, %v431_v12  ;;  %v2099_v14 = vpop.f32.mrb[13].mxu1 }
 0x421   :  { %v434_v15 = vpop.f32.mrb[14].mxu1 }
 0x422   :  { %2261 = vtanh.f32 %v437_v13  ;;  %v2100_v16 = vpop.f32.mrb[15].mxu1  ;;  %v1966_v22 = vmul.f32 -1.442695, %v437_v13 }
 0x424   :  { %2263 = vpow2.f32 %v1966_v22 }
 0x426   :  { %v345_v18 = vpop.permute.xlu1 %344 }
 0x427   :  { %v347_v19 = vmul.f32 %v2260_v17, %v345_v18 }
 0x429   :  { %349 = vrot.lane.b32.xlu0 %v347_v19, %s2422_s12 }
 0x42a   :  { %v340_v25 = vpop.permute.xlu1 %339 }
 0x42b   :  { %v342_v26 = vmul.f32 %v2260_v17, %v340_v25 }
 0x42c   :  { %v2262_v20 = vpop.eup %2261 }
 0x42d   :  { %447 = vrot.lane.b32.xlu0 %v438_v21, %s2422_s12  ;;  %452 = vrot.lane.b32.xlu1 %v2262_v20, %s2421_s11 }
 0x42e   :  { %v2264_v23 = vpop.eup %2263 }
 0x42f   :  { %v442_v24 = vadd.f32 1.0, %v2264_v23 }
 0x431   :  { %2265 = vrcp.f32 %v442_v24 }
 0x43b   :  { %v2266_v29 = vpop.eup %2265 }
 0x49b   :  { %v350_v27 = vpop.permute.xlu0 %349 }
 0x49c   :  { %v352_v28 = vadd.f32 %v350_v27, %v342_v26 }
 0x49e   :  { %2267 = vtanh.f32 %v352_v28 }
 0x49f   :  { %v453_v30 = vpop.permute.xlu1 %452  ;;  %v448_v33 = vpop.permute.xlu0 %447 }
 0x4a0   :  { %v455_v31 = vmul.f32 %v2266_v29, %v453_v30  ;;  %v450_v34 = vmul.f32 %v2266_v29, %v448_v33 }
 0x4a2   :  { %457 = vrot.lane.b32.xlu1 %v455_v31, %s2422_s12 }
 0x4a8   :  { %v2268_v32 = vpop.eup %2267 }
 0x4a9   :  { %355 = vrot.lane.b32.xlu0 %v2268_v32, %s2421_s11 }
 0x514   :  { %v458_v35 = vpop.permute.xlu1 %457 }
 0x515   :  { %v460_v36 = vadd.f32 %v458_v35, %v450_v34 }
 0x517   :  { %2269 = vtanh.f32 %v460_v36 }
 0x51b   :  { %v356_v37 = vpop.permute.xlu0 %355 }
 0x51c   :  { %v2580_v38 = vmul.f32 %v2260_v17, %v356_v37 }
 0x51e   :  { %360 = vrot.lane.b32.xlu1 %v2580_v38, %s2422_s12 }
 0x521   :  { %v2270_v39 = vpop.eup %2269 }
 0x522   :  { %463 = vrot.lane.b32.xlu0 %v2270_v39, %s2421_s11 }
 0x526   :  { %365 = vrot.lane.b32.xlu0 %v352_v28, %s2423_s15 }
 0x52a   :  { %473 = vrot.lane.b32.xlu0 %v460_v36, %s2423_s15 }
 0x590   :  { %v361_v40 = vpop.permute.xlu1 %360 }
 0x591   :  { %363 = vst.msk [vmem:[#allocation2] sm:$0x3] %vm28_vm1, %v361_v40 }
 0x594   :  { %v464_v41 = vpop.permute.xlu0 %463 }
 0x595   :  { %v2588_v42 = vmul.f32 %v2266_v29, %v464_v41 }
 0x597   :  { %468 = vrot.lane.b32.xlu1 %v2588_v42, %s2422_s12 }
 0x598   :  { %v366_v43 = vpop.permute.xlu0 %365  ;;  %v500_v44 = vld [vmem:[#allocation2] sm:$0x3] }
 0x599   :  { %368 = vst.msk [vmem:[#allocation3] sm:$0x3] %vm28_vm1, %v366_v43  ;;  %v501_v45 = vpack.c.bf16 %v500_v44, %v500_v44 }
 0x59b   :  { %2106 = vmatmul.mubr.msk.bf16.vlgmr.msra.gmra.mrb[0].mxu0 %vm56_vm2, %v501_v45  ;;  %v1973_v45 = vld [vmem:[%s3005_s0 + $0x6] sm:$0x3] }
 0x59c   :  { %v474_v46 = vpop.permute.xlu0 %473  ;;  %2118 = vmatpush3.bf16.msra.mxu0 %v2472_v0  ;;  %2121 = vmatprep.mubr.msk.bf16.mxu0 %vm2420_vm0, %v2419_v1 }
 0x59d   :  { %476 = vst.msk [vmem:[#allocation5] sm:$0x3] %vm28_vm1, %v474_v46  ;;  %2119 = vmatprep.subr.bf16.mxu0 %v2419_v1 }
 0x5a0   :  { %2120 = vmatpush3.bf16.msra.mxu0 %v2480_v2  ;;  %v546_v59 = vld [vmem:[#allocation3] sm:$0x3] }
 0x5a1   :  { %2133 = vmatprep.subr.bf16.mxu0 %v2419_v1 }
 0x5a4   :  { %v654_v14 = vld [vmem:[#allocation5] sm:$0x3] }
 0x609   :  { %v469_v48 = vpop.permute.xlu1 %468 }
 0x60a   :  { %471 = vst.msk [vmem:[#allocation4] sm:$0x3] %vm28_vm1, %v469_v48 }
 0x611   :  { %v608_v49 = vld [vmem:[#allocation4] sm:$0x3] }
 0x612   :  { %v609_v50 = vpack.c.bf16 %v608_v49, %v608_v49 }
 0x614   :  { %2114 = vmatmul.mubr.msk.bf16.vlgmr.msra.gmra.mrb[16].mxu1 %vm56_vm2, %v609_v50 }
 0x615   :  { %2126 = vmatpush3.bf16.msra.mxu1 %v2504_v4  ;;  %2129 = vmatprep.mubr.msk.bf16.mxu1 %vm2420_vm0, %v2419_v1 }
 0x616   :  { %2127 = vmatprep.subr.bf16.mxu1 %v2419_v1 }
 0x619   :  { %2128 = vmatpush3.bf16.msra.mxu1 %v2511_v6 }
 0x61a   :  { %2141 = vmatprep.subr.bf16.mxu1 %v2419_v1 }
 0x66e   :  { %v539_v53 = vpop.f32.mrb[0].mxu0 }
 0x66f   :  { %v545_v54 = vadd.f32 %v1967_v52, %v539_v53  ;;  %v2107_v55 = vpop.f32.mrb[1].mxu0 }
 0x670   :  { %v542_v56 = vpop.f32.mrb[2].mxu0 }
 0x671   :  { %2271 = vtanh.f32 %v545_v54  ;;  %v2108_v57 = vpop.f32.mrb[3].mxu0  ;;  %v1969_v60 = vmul.f32 -1.442695, %v545_v54 }
 0x673   :  { %2273 = vpow2.f32 %v1969_v60 }
 0x67b   :  { %v2272_v58 = vpop.eup %2271 }
 0x67c   :  { %560 = vrot.lane.b32.xlu1 %v2272_v58, %s2421_s11  ;;  %v1976_v58 = vld [vmem:[%s3006_s1 + $0x8] sm:$0x3] }
 0x67d   :  { %v2274_v61 = vpop.eup %2273 }
 0x67e   :  { %v550_v62 = vadd.f32 1.0, %v2274_v61 }
 0x680   :  { %555 = vrot.lane.b32.xlu1 %v546_v59, %s2422_s12  ;;  %2275 = vrcp.f32 %v550_v62 }
 0x68a   :  { %v2276_v10 = vpop.eup %2275 }
 0x6e7   :  { %v647_v3 = vpop.f32.mrb[16].mxu1 }
 0x6e8   :  { %v653_v5 = vadd.f32 %v1970_v63, %v647_v3  ;;  %v2115_v7 = vpop.f32.mrb[17].mxu1 }
 0x6e9   :  { %v650_v8 = vpop.f32.mrb[18].mxu1 }
 0x6ea   :  { %2277 = vtanh.f32 %v653_v5  ;;  %v2116_v9 = vpop.f32.mrb[19].mxu1  ;;  %v1972_v15 = vmul.f32 -1.442695, %v653_v5 }
 0x6ec   :  { %2279 = vpow2.f32 %v1972_v15 }
 0x6ee   :  { %v561_v11 = vpop.permute.xlu1 %560 }
 0x6ef   :  { %v563_v12 = vmul.f32 %v2276_v10, %v561_v11 }
 0x6f1   :  { %565 = vrot.lane.b32.xlu0 %v563_v12, %s2422_s12 }
 0x6f2   :  { %v556_v18 = vpop.permute.xlu1 %555 }
 0x6f3   :  { %v558_v19 = vmul.f32 %v2276_v10, %v556_v18 }
 0x6f4   :  { %v2278_v13 = vpop.eup %2277 }
 0x6f5   :  { %663 = vrot.lane.b32.xlu0 %v654_v14, %s2422_s12  ;;  %668 = vrot.lane.b32.xlu1 %v2278_v13, %s2421_s11 }
 0x6f6   :  { %v2280_v16 = vpop.eup %2279 }
 0x6f7   :  { %v658_v17 = vadd.f32 1.0, %v2280_v16 }
 0x6f9   :  { %2281 = vrcp.f32 %v658_v17 }
 0x703   :  { %v2282_v22 = vpop.eup %2281 }
 0x763   :  { %v566_v20 = vpop.permute.xlu0 %565 }
 0x764   :  { %v568_v21 = vadd.f32 %v566_v20, %v558_v19 }
 0x766   :  { %2283 = vtanh.f32 %v568_v21 }
 0x767   :  { %v669_v23 = vpop.permute.xlu1 %668  ;;  %v664_v26 = vpop.permute.xlu0 %663 }
 0x768   :  { %v671_v24 = vmul.f32 %v2282_v22, %v669_v23  ;;  %v666_v27 = vmul.f32 %v2282_v22, %v664_v26 }
 0x76a   :  { %673 = vrot.lane.b32.xlu1 %v671_v24, %s2422_s12 }
 0x770   :  { %v2284_v25 = vpop.eup %2283 }
 0x771   :  { %571 = vrot.lane.b32.xlu0 %v2284_v25, %s2421_s11 }
 0x7dc   :  { %v674_v28 = vpop.permute.xlu1 %673 }
 0x7dd   :  { %v676_v29 = vadd.f32 %v674_v28, %v666_v27 }
 0x7df   :  { %2285 = vtanh.f32 %v676_v29 }
 0x7e3   :  { %v572_v30 = vpop.permute.xlu0 %571 }
 0x7e4   :  { %v2622_v31 = vmul.f32 %v2276_v10, %v572_v30 }
 0x7e6   :  { %576 = vrot.lane.b32.xlu1 %v2622_v31, %s2422_s12 }
 0x7e9   :  { %v2286_v32 = vpop.eup %2285 }
 0x7ea   :  { %679 = vrot.lane.b32.xlu0 %v2286_v32, %s2421_s11 }
 0x7ee   :  { %581 = vrot.lane.b32.xlu0 %v568_v21, %s2423_s15 }
 0x7f2   :  { %689 = vrot.lane.b32.xlu0 %v676_v29, %s2423_s15 }
 0x858   :  { %v577_v33 = vpop.permute.xlu1 %576 }
 0x859   :  { %579 = vst.msk [vmem:[#allocation2] sm:$0x3] %vm28_vm1, %v577_v33 }
 0x85c   :  { %v680_v34 = vpop.permute.xlu0 %679 }
 0x85d   :  { %v2630_v35 = vmul.f32 %v2282_v22, %v680_v34 }
 0x85f   :  { %684 = vrot.lane.b32.xlu1 %v2630_v35, %s2422_s12 }
 0x860   :  { %v582_v36 = vpop.permute.xlu0 %581  ;;  %v716_v37 = vld [vmem:[#allocation2] sm:$0x3] }
 0x861   :  { %584 = vst.msk [vmem:[#allocation3] sm:$0x3] %vm28_vm1, %v582_v36  ;;  %v717_v39 = vpack.c.bf16 %v716_v37, %v716_v37 }
 0x863   :  { %2122 = vmatmul.mubr.msk.bf16.vlgmr.msra.gmra.mrb[4].mxu0 %vm56_vm2, %v717_v39 }
 0x864   :  { %v690_v40 = vpop.permute.xlu0 %689  ;;  %2134 = vmatpush3.bf16.msra.mxu0 %v2472_v0  ;;  %2137 = vmatprep.mubr.msk.bf16.mxu0 %vm2420_vm0, %v2419_v1 }
 0x865   :  { %692 = vst.msk [vmem:[#allocation5] sm:$0x3] %vm28_vm1, %v690_v40  ;;  %2135 = vmatprep.subr.bf16.mxu0 %v2419_v1 }
 0x868   :  { %2136 = vmatpush3.bf16.msra.mxu0 %v2480_v2  ;;  %v762_v54 = vld [vmem:[#allocation3] sm:$0x3] }
 0x869   :  { %2149 = vmatprep.subr.bf16.mxu0 %v2419_v1 }
 0x86c   :  { %v870_v9 = vld [vmem:[#allocation5] sm:$0x3] }
 0x8d1   :  { %v685_v41 = vpop.permute.xlu1 %684 }
 0x8d2   :  { %687 = vst.msk [vmem:[#allocation4] sm:$0x3] %vm28_vm1, %v685_v41  ;;  %v1979_v41 = vld [vmem:[%s3005_s0 + $0x8] sm:$0x3] }
 0x8d9   :  { %v824_v43 = vld [vmem:[#allocation4] sm:$0x3] }
 0x8da   :  { %v825_v44 = vpack.c.bf16 %v824_v43, %v824_v43 }
 0x8dc   :  { %2130 = vmatmul.mubr.msk.bf16.vlgmr.msra.gmra.mrb[20].mxu1 %vm56_vm2, %v825_v44 }
 0x8dd   :  { %2142 = vmatpush3.bf16.msra.mxu1 %v2504_v4  ;;  %2145 = vmatprep.mubr.msk.bf16.mxu1 %vm2420_vm0, %v2419_v1 }
 0x8de   :  { %2143 = vmatprep.subr.bf16.mxu1 %v2419_v1 }
 0x8e1   :  { %2144 = vmatpush3.bf16.msra.mxu1 %v2511_v6 }
 0x8e2   :  { %2157 = vmatprep.subr.bf16.mxu1 %v2419_v1 }
 0x936   :  { %v755_v46 = vpop.f32.mrb[4].mxu0 }
 0x937   :  { %v761_v48 = vadd.f32 %v1973_v45, %v755_v46  ;;  %v2123_v49 = vpop.f32.mrb[5].mxu0 }
 0x938   :  { %v758_v50 = vpop.f32.mrb[6].mxu0 }
 0x939   :  { %2287 = vtanh.f32 %v761_v48  ;;  %v2124_v52 = vpop.f32.mrb[7].mxu0  ;;  %v1975_v55 = vmul.f32 -1.442695, %v761_v48 }
 0x93b   :  { %2289 = vpow2.f32 %v1975_v55  ;;  %v1982_v55 = vld [vmem:[%s3006_s1 + $0x6] sm:$0x3] }
 0x943   :  { %v2288_v53 = vpop.eup %2287 }
 0x944   :  { %776 = vrot.lane.b32.xlu1 %v2288_v53, %s2421_s11 }
 0x945   :  { %v2290_v56 = vpop.eup %2289 }
 0x946   :  { %v766_v57 = vadd.f32 1.0, %v2290_v56 }
 0x948   :  { %771 = vrot.lane.b32.xlu1 %v762_v54, %s2422_s12  ;;  %2291 = vrcp.f32 %v766_v57 }
 0x952   :  { %v2292_v3 = vpop.eup %2291 }
 0x9af   :  { %v863_v59 = vpop.f32.mrb[20].mxu1 }
 0x9b0   :  { %v869_v60 = vadd.f32 %v1976_v58, %v863_v59  ;;  %v2131_v61 = vpop.f32.mrb[21].mxu1 }
 0x9b1   :  { %v866_v62 = vpop.f32.mrb[22].mxu1 }
 0x9b2   :  { %2293 = vtanh.f32 %v869_v60  ;;  %v2132_v63 = vpop.f32.mrb[23].mxu1  ;;  %v1978_v10 = vmul.f32 -1.442695, %v869_v60 }
 0x9b4   :  { %2295 = vpow2.f32 %v1978_v10 }
 0x9b6   :  { %v777_v5 = vpop.permute.xlu1 %776 }
 0x9b7   :  { %v779_v7 = vmul.f32 %v2292_v3, %v777_v5 }
 0x9b9   :  { %781 = vrot.lane.b32.xlu0 %v779_v7, %s2422_s12 }
 0x9ba   :  { %v772_v13 = vpop.permute.xlu1 %771 }
 0x9bb   :  { %v774_v14 = vmul.f32 %v2292_v3, %v772_v13 }
 0x9bc   :  { %v2294_v8 = vpop.eup %2293 }
 0x9bd   :  { %879 = vrot.lane.b32.xlu0 %v870_v9, %s2422_s12  ;;  %884 = vrot.lane.b32.xlu1 %v2294_v8, %s2421_s11 }
 0x9be   :  { %v2296_v11 = vpop.eup %2295 }
 0x9bf   :  { %v874_v12 = vadd.f32 1.0, %v2296_v11 }
 0x9c1   :  { %2297 = vrcp.f32 %v874_v12 }
 0x9cb   :  { %v2298_v17 = vpop.eup %2297 }
 0xa2b   :  { %v782_v15 = vpop.permute.xlu0 %781 }
 0xa2c   :  { %v784_v16 = vadd.f32 %v782_v15, %v774_v14 }
 0xa2e   :  { %2299 = vtanh.f32 %v784_v16 }
 0xa2f   :  { %v885_v18 = vpop.permute.xlu1 %884  ;;  %v880_v21 = vpop.permute.xlu0 %879 }
 0xa30   :  { %v887_v19 = vmul.f32 %v2298_v17, %v885_v18  ;;  %v882_v22 = vmul.f32 %v2298_v17, %v880_v21 }
 0xa32   :  { %889 = vrot.lane.b32.xlu1 %v887_v19, %s2422_s12 }
 0xa38   :  { %v2300_v20 = vpop.eup %2299 }
 0xa39   :  { %787 = vrot.lane.b32.xlu0 %v2300_v20, %s2421_s11 }
 0xaa4   :  { %v890_v23 = vpop.permute.xlu1 %889 }
 0xaa5   :  { %v892_v24 = vadd.f32 %v890_v23, %v882_v22 }
 0xaa7   :  { %2301 = vtanh.f32 %v892_v24 }
 0xaab   :  { %v788_v25 = vpop.permute.xlu0 %787 }
 0xaac   :  { %v2664_v26 = vmul.f32 %v2292_v3, %v788_v25 }
 0xaae   :  { %792 = vrot.lane.b32.xlu1 %v2664_v26, %s2422_s12 }
 0xab1   :  { %v2302_v27 = vpop.eup %2301 }
 0xab2   :  { %895 = vrot.lane.b32.xlu0 %v2302_v27, %s2421_s11 }
 0xab6   :  { %797 = vrot.lane.b32.xlu0 %v784_v16, %s2423_s15 }
 0xaba   :  { %905 = vrot.lane.b32.xlu0 %v892_v24, %s2423_s15 }
 0xb20   :  { %v793_v28 = vpop.permute.xlu1 %792 }
 0xb21   :  { %795 = vst.msk [vmem:[#allocation2] sm:$0x3] %vm28_vm1, %v793_v28 }
 0xb24   :  { %v896_v29 = vpop.permute.xlu0 %895 }
 0xb25   :  { %v2672_v30 = vmul.f32 %v2298_v17, %v896_v29 }
 0xb27   :  { %900 = vrot.lane.b32.xlu1 %v2672_v30, %s2422_s12 }
 0xb28   :  { %v798_v32 = vpop.permute.xlu0 %797  ;;  %v932_v33 = vld [vmem:[#allocation2] sm:$0x3] }
 0xb29   :  { %800 = vst.msk [vmem:[#allocation3] sm:$0x3] %vm28_vm1, %v798_v32  ;;  %v933_v34 = vpack.c.bf16 %v932_v33, %v932_v33 }
 0xb2b   :  { %2138 = vmatmul.mubr.msk.bf16.vlgmr.msra.gmra.mrb[8].mxu0 %vm56_vm2, %v933_v34 }
 0xb2c   :  { %v906_v36 = vpop.permute.xlu0 %905  ;;  %2150 = vmatpush3.bf16.msra.mxu0 %v2472_v0  ;;  %2153 = vmatprep.mubr.msk.bf16.mxu0 %vm2420_vm0, %v2419_v1 }
 0xb2d   :  { %908 = vst.msk [vmem:[#allocation5] sm:$0x3] %vm28_vm1, %v906_v36  ;;  %2151 = vmatprep.subr.bf16.mxu0 %v2419_v1 }
 0xb30   :  { %2152 = vmatpush3.bf16.msra.mxu0 %v2480_v2  ;;  %v978_v50 = vld [vmem:[#allocation3] sm:$0x3] }
 0xb31   :  { %2165 = vmatprep.subr.bf16.mxu0 %v2419_v1 }
 0xb34   :  { %v1085_v5 = vld [vmem:[#allocation5] sm:$0x3] }
 0xb99   :  { %v901_v37 = vpop.permute.xlu1 %900 }
 0xb9a   :  { %903 = vst.msk [vmem:[#allocation4] sm:$0x3] %vm28_vm1, %v901_v37 }
 0xba1   :  { %v1039_v39 = vld [vmem:[#allocation4] sm:$0x3] }
 0xba2   :  { %v1040_v40 = vpack.c.bf16 %v1039_v39, %v1039_v39 }
 0xba4   :  { %2146 = vmatmul.mubr.msk.bf16.vlgmr.msra.gmra.mrb[24].mxu1 %vm56_vm2, %v1040_v40 }
 0xba5   :  { %2158 = vmatpush3.bf16.msra.mxu1 %v2504_v4  ;;  %2161 = vmatprep.mubr.msk.bf16.mxu1 %vm2420_vm0, %v2419_v1 }
 0xba6   :  { %2159 = vmatprep.subr.bf16.mxu1 %v2419_v1 }
 0xba9   :  { %2160 = vmatpush3.bf16.msra.mxu1 %v2511_v6 }
 0xbaa   :  { %2173 = vmatprep.subr.bf16.mxu1 %v2419_v1 }
 0xbfe   :  { %v971_v43 = vpop.f32.mrb[8].mxu0 }
 0xbff   :  { %v977_v44 = vadd.f32 %v1979_v41, %v971_v43  ;;  %v2139_v45 = vpop.f32.mrb[9].mxu0 }
 0xc00   :  { %v974_v46 = vpop.f32.mrb[10].mxu0 }
 0xc01   :  { %2303 = vtanh.f32 %v977_v44  ;;  %v2140_v48 = vpop.f32.mrb[11].mxu0  ;;  %v1981_v52 = vmul.f32 -1.442695, %v977_v44 }
 0xc03   :  { %2305 = vpow2.f32 %v1981_v52 }
 0xc0b   :  { %v2304_v49 = vpop.eup %2303 }
 0xc0c   :  { %992 = vrot.lane.b32.xlu1 %v2304_v49, %s2421_s11  ;;  %v1988_v49 = vld [vmem:[%s3006_s1 + $0x4] sm:$0x3] }
 0xc0d   :  { %v2306_v53 = vpop.eup %2305 }
 0xc0e   :  { %v982_v54 = vadd.f32 1.0, %v2306_v53 }
 0xc10   :  { %987 = vrot.lane.b32.xlu1 %v978_v50, %s2422_s12  ;;  %2307 = vrcp.f32 %v982_v54 }
 0xc1a   :  { %v2308_v61 = vpop.eup %2307 }
 0xc77   :  { %v1078_v56 = vpop.f32.mrb[24].mxu1 }
 0xc78   :  { %v1084_v57 = vadd.f32 %v1982_v55, %v1078_v56  ;;  %v2147_v58 = vpop.f32.mrb[25].mxu1 }
 0xc79   :  { %v1081_v59 = vpop.f32.mrb[26].mxu1 }
 0xc7a   :  { %2309 = vtanh.f32 %v1084_v57  ;;  %v2148_v60 = vpop.f32.mrb[27].mxu1  ;;  %v1984_v7 = vmul.f32 -1.442695, %v1084_v57 }
 0xc7c   :  { %2311 = vpow2.f32 %v1984_v7 }
 0xc7e   :  { %v993_v62 = vpop.permute.xlu1 %992 }
 0xc7f   :  { %v995_v63 = vmul.f32 %v2308_v61, %v993_v62 }
 0xc81   :  { %997 = vrot.lane.b32.xlu0 %v995_v63, %s2422_s12 }
 0xc82   :  { %v988_v10 = vpop.permute.xlu1 %987 }
 0xc83   :  { %v990_v11 = vmul.f32 %v2308_v61, %v988_v10 }
 0xc84   :  { %v2310_v3 = vpop.eup %2309 }
 0xc85   :  { %1094 = vrot.lane.b32.xlu0 %v1085_v5, %s2422_s12  ;;  %1099 = vrot.lane.b32.xlu1 %v2310_v3, %s2421_s11 }
 0xc86   :  { %v2312_v8 = vpop.eup %2311 }
 0xc87   :  { %v1089_v9 = vadd.f32 1.0, %v2312_v8 }
 0xc89   :  { %2313 = vrcp.f32 %v1089_v9 }
 0xc93   :  { %v2314_v14 = vpop.eup %2313 }
 0xcf3   :  { %v998_v12 = vpop.permute.xlu0 %997 }
 0xcf4   :  { %v1000_v13 = vadd.f32 %v998_v12, %v990_v11 }
 0xcf6   :  { %2315 = vtanh.f32 %v1000_v13 }
 0xcf7   :  { %v1100_v15 = vpop.permute.xlu1 %1099  ;;  %v1095_v18 = vpop.permute.xlu0 %1094 }
 0xcf8   :  { %v1102_v16 = vmul.f32 %v2314_v14, %v1100_v15  ;;  %v1097_v19 = vmul.f32 %v2314_v14, %v1095_v18 }
 0xcfa   :  { %1104 = vrot.lane.b32.xlu1 %v1102_v16, %s2422_s12 }
 0xd00   :  { %v2316_v17 = vpop.eup %2315 }
 0xd01   :  { %1003 = vrot.lane.b32.xlu0 %v2316_v17, %s2421_s11 }
 0xd6c   :  { %v1105_v20 = vpop.permute.xlu1 %1104 }
 0xd6d   :  { %v1107_v21 = vadd.f32 %v1105_v20, %v1097_v19 }
 0xd6f   :  { %2317 = vtanh.f32 %v1107_v21 }
 0xd73   :  { %v1004_v22 = vpop.permute.xlu0 %1003 }
 0xd74   :  { %v2706_v23 = vmul.f32 %v2308_v61, %v1004_v22 }
 0xd76   :  { %1008 = vrot.lane.b32.xlu1 %v2706_v23, %s2422_s12 }
 0xd79   :  { %v2318_v24 = vpop.eup %2317 }
 0xd7a   :  { %1110 = vrot.lane.b32.xlu0 %v2318_v24, %s2421_s11 }
 0xd7e   :  { %1013 = vrot.lane.b32.xlu0 %v1000_v13, %s2423_s15 }
 0xd82   :  { %1120 = vrot.lane.b32.xlu0 %v1107_v21, %s2423_s15 }
 0xde8   :  { %v1009_v25 = vpop.permute.xlu1 %1008 }
 0xde9   :  { %1011 = vst.msk [vmem:[#allocation2] sm:$0x3] %vm28_vm1, %v1009_v25 }
 0xdec   :  { %v1111_v27 = vpop.permute.xlu0 %1110 }
 0xded   :  { %v2714_v28 = vmul.f32 %v2314_v14, %v1111_v27 }
 0xdef   :  { %1115 = vrot.lane.b32.xlu1 %v2714_v28, %s2422_s12 }
 0xdf0   :  { %v1014_v29 = vpop.permute.xlu0 %1013  ;;  %v1146_v32 = vld [vmem:[#allocation2] sm:$0x3] }
 0xdf1   :  { %1016 = vst.msk [vmem:[#allocation3] sm:$0x3] %vm28_vm1, %v1014_v29  ;;  %v1147_v33 = vpack.c.bf16 %v1146_v32, %v1146_v32  ;;  %v2367_v32 = vld [vmem:[%s3007_s2] sm:$0xff]  }
 0xdf3   :  { %2154 = vmatmul.mubr.msk.bf16.vlgmr.msra.gmra.mrb[12].mxu0 %vm56_vm2, %v1147_v33  ;;  %v2368_v33 = vld [vmem:[%s3007_s2 + $0x8] sm:$0xff]  }
 0xdf4   :  { %v1121_v34 = vpop.permute.xlu0 %1120  ;;  %2166 = vmatpush3.bf16.msra.mxu0 %v2472_v0  ;;  %2169 = vmatprep.mubr.msk.bf16.mxu0 %vm2420_vm0, %v2419_v1  ;;  %v1985_v0 = vld [vmem:[%s3005_s0 + $0xa] sm:$0x3] }
 0xdf5   :  { %1123 = vst.msk [vmem:[#allocation5] sm:$0x3] %vm28_vm1, %v1121_v34  ;;  %2167 = vmatprep.subr.bf16.mxu0 %v2419_v1 }
 0xdf8   :  { %2168 = vmatpush3.bf16.msra.mxu0 %v2480_v2  ;;  %v1192_v45 = vld [vmem:[#allocation3] sm:$0x3] }
 0xdf9   :  { %2181 = vmatprep.subr.bf16.mxu0 %v2419_v1 }
 0xdfc   :  { %v1299_v60 = vld [vmem:[#allocation5] sm:$0x3] }
 0xe61   :  { %v1116_v36 = vpop.permute.xlu1 %1115 }
 0xe62   :  { %1118 = vst.msk [vmem:[#allocation4] sm:$0x3] %vm28_vm1, %v1116_v36 }
 0xe69   :  { %v1253_v37 = vld [vmem:[#allocation4] sm:$0x3] }
 0xe6a   :  { %v1254_v39 = vpack.c.bf16 %v1253_v37, %v1253_v37 }
 0xe6c   :  { %2162 = vmatmul.mubr.msk.bf16.vlgmr.msra.gmra.mrb[28].mxu1 %vm56_vm2, %v1254_v39  ;;  %v2369_v39 = vld [vmem:[%s3008_s3] sm:$0xff]  }
 0xe6d   :  { %2174 = vmatpush3.bf16.msra.mxu1 %v2504_v4  ;;  %2177 = vmatprep.mubr.msk.bf16.mxu1 %vm2420_vm0, %v2419_v1 }
 0xe6e   :  { %2175 = vmatprep.subr.bf16.mxu1 %v2419_v1 }
 0xe71   :  { %2176 = vmatpush3.bf16.msra.mxu1 %v2511_v6 }
 0xe72   :  { %2189 = vmatprep.subr.bf16.mxu1 %v2419_v1 }
 0xec6   :  { %v1185_v2 = vpop.f32.mrb[12].mxu0 }
 0xec7   :  { %v1191_v40 = vadd.f32 %v1985_v0, %v1185_v2  ;;  %v2155_v41 = vpop.f32.mrb[13].mxu0  ;;  %v2370_v0 = vld [vmem:[%s3008_s3 + $0x8] sm:$0xff]  }
 0xec8   :  { %v1188_v43 = vpop.f32.mrb[14].mxu0  ;;  %v1991_v2 = vld [vmem:[%s3005_s0 + $0xc] sm:$0x3] }
 0xec9   :  { %2319 = vtanh.f32 %v1191_v40  ;;  %v2156_v44 = vpop.f32.mrb[15].mxu0  ;;  %v1987_v46 = vmul.f32 -1.442695, %v1191_v40 }
 0xecb   :  { %2321 = vpow2.f32 %v1987_v46 }
 0xed3   :  { %v2320_v4 = vpop.eup %2319 }
 0xed4   :  { %1206 = vrot.lane.b32.xlu1 %v2320_v4, %s2421_s11 }
 0xed5   :  { %v2322_v6 = vpop.eup %2321 }
 0xed6   :  { %v1196_v48 = vadd.f32 1.0, %v2322_v6 }
 0xed8   :  { %1201 = vrot.lane.b32.xlu1 %v1192_v45, %s2422_s12  ;;  %2323 = vrcp.f32 %v1196_v48 }
 0xee2   :  { %v2324_v56 = vpop.eup %2323 }
 0xf3f   :  { %v1292_v50 = vpop.f32.mrb[28].mxu1 }
 0xf40   :  { %v1298_v52 = vadd.f32 %v1988_v49, %v1292_v50  ;;  %v2163_v53 = vpop.f32.mrb[29].mxu1  ;;  %v1994_v50 = vld [vmem:[%s3006_s1 + $0x2] sm:$0x3] }
 0xf41   :  { %v1295_v54 = vpop.f32.mrb[30].mxu1 }
 0xf42   :  { %2325 = vtanh.f32 %v1298_v52  ;;  %v2164_v55 = vpop.f32.mrb[31].mxu1  ;;  %v1990_v61 = vmul.f32 -1.442695, %v1298_v52 }
 0xf44   :  { %2327 = vpow2.f32 %v1990_v61 }
 0xf46   :  { %v1207_v57 = vpop.permute.xlu1 %1206 }
 0xf47   :  { %v1209_v58 = vmul.f32 %v2324_v56, %v1207_v57 }
 0xf49   :  { %1211 = vrot.lane.b32.xlu0 %v1209_v58, %s2422_s12 }
 0xf4a   :  { %v1202_v3 = vpop.permute.xlu1 %1201 }
 0xf4b   :  { %v1204_v5 = vmul.f32 %v2324_v56, %v1202_v3 }
 0xf4c   :  { %v2326_v59 = vpop.eup %2325 }
 0xf4d   :  { %1308 = vrot.lane.b32.xlu0 %v1299_v60, %s2422_s12  ;;  %1313 = vrot.lane.b32.xlu1 %v2326_v59, %s2421_s11 }
 0xf4e   :  { %v2328_v62 = vpop.eup %2327 }
 0xf4f   :  { %v1303_v63 = vadd.f32 1.0, %v2328_v62 }
 0xf51   :  { %2329 = vrcp.f32 %v1303_v63 }
 0xf5b   :  { %v2330_v9 = vpop.eup %2329 }
 0xfbb   :  { %v1212_v7 = vpop.permute.xlu0 %1211 }
 0xfbc   :  { %v1214_v8 = vadd.f32 %v1212_v7, %v1204_v5 }
 0xfbe   :  { %2331 = vtanh.f32 %v1214_v8 }
 0xfbf   :  { %v1314_v10 = vpop.permute.xlu1 %1313  ;;  %v1309_v13 = vpop.permute.xlu0 %1308 }
 0xfc0   :  { %v1316_v11 = vmul.f32 %v2330_v9, %v1314_v10  ;;  %v1311_v14 = vmul.f32 %v2330_v9, %v1309_v13 }
 0xfc2   :  { %1318 = vrot.lane.b32.xlu1 %v1316_v11, %s2422_s12 }
 0xfc8   :  { %v2332_v12 = vpop.eup %2331 }
 0xfc9   :  { %1217 = vrot.lane.b32.xlu0 %v2332_v12, %s2421_s11 }
0x1034   :  { %v1319_v15 = vpop.permute.xlu1 %1318 }
0x1035   :  { %v1321_v16 = vadd.f32 %v1319_v15, %v1311_v14 }
0x1037   :  { %2333 = vtanh.f32 %v1321_v16 }
0x103b   :  { %v1218_v17 = vpop.permute.xlu0 %1217 }
0x103c   :  { %v2748_v18 = vmul.f32 %v2324_v56, %v1218_v17 }
0x103e   :  { %1222 = vrot.lane.b32.xlu1 %v2748_v18, %s2422_s12 }
0x1041   :  { %v2334_v19 = vpop.eup %2333 }
0x1042   :  { %1324 = vrot.lane.b32.xlu0 %v2334_v19, %s2421_s11 }
0x1046   :  { %1227 = vrot.lane.b32.xlu0 %v1214_v8, %s2423_s15 }
0x104a   :  { %1334 = vrot.lane.b32.xlu0 %v1321_v16, %s2423_s15 }
0x10b0   :  { %v1223_v20 = vpop.permute.xlu1 %1222 }
0x10b1   :  { %1225 = vst.msk [vmem:[#allocation2] sm:$0x3] %vm28_vm1, %v1223_v20 }
0x10b4   :  { %v1325_v21 = vpop.permute.xlu0 %1324 }
0x10b5   :  { %v2756_v22 = vmul.f32 %v2330_v9, %v1325_v21 }
0x10b7   :  { %1329 = vrot.lane.b32.xlu1 %v2756_v22, %s2422_s12 }
0x10b8   :  { %v1228_v24 = vpop.permute.xlu0 %1227  ;;  %v1360_v25 = vld [vmem:[#allocation2] sm:$0x3] }
0x10b9   :  { %1230 = vst.msk [vmem:[#allocation3] sm:$0x3] %vm28_vm1, %v1228_v24  ;;  %v1361_v27 = vpack.c.bf16 %v1360_v25, %v1360_v25 }
0x10bb   :  { %2170 = vmatmul.mubr.msk.bf16.vlgmr.msra.gmra.mrb[16].mxu0 %vm56_vm2, %v1361_v27 }
0x10bc   :  { %v1335_v29 = vpop.permute.xlu0 %1334  ;;  %2182 = vmatpush3.bf16.msra.mxu0 %v2367_v32  ;;  %2185 = vmatprep.mubr.msk.bf16.mxu0 %vm2420_vm0, %v2419_v1 }
0x10bd   :  { %1337 = vst.msk [vmem:[#allocation5] sm:$0x3] %vm28_vm1, %v1335_v29  ;;  %2183 = vmatprep.subr.bf16.mxu0 %v2419_v1 }
0x10c0   :  { %2184 = vmatpush3.bf16.msra.mxu0 %v2368_v33  ;;  %v1406_v46 = vld [vmem:[#allocation3] sm:$0x3] }
0x10c1   :  { %2197 = vmatprep.subr.bf16.mxu0 %v2419_v1 }
0x10c4   :  { %v1513_v61 = vld [vmem:[#allocation5] sm:$0x3] }
0x1129   :  { %v1330_v34 = vpop.permute.xlu1 %1329 }
0x112a   :  { %1332 = vst.msk [vmem:[#allocation4] sm:$0x3] %vm28_vm1, %v1330_v34 }
0x1131   :  { %v1467_v36 = vld [vmem:[#allocation4] sm:$0x3] }
0x1132   :  { %v1468_v37 = vpack.c.bf16 %v1467_v36, %v1467_v36 }
0x1134   :  { %2178 = vmatmul.mubr.msk.bf16.vlgmr.msra.gmra.mrb[32].mxu1 %vm56_vm2, %v1468_v37 }
0x1135   :  { %2190 = vmatpush3.bf16.msra.mxu1 %v2369_v39  ;;  %2193 = vmatprep.mubr.msk.bf16.mxu1 %vm2420_vm0, %v2419_v1 }
0x1136   :  { %2191 = vmatprep.subr.bf16.mxu1 %v2419_v1 }
0x1139   :  { %2192 = vmatpush3.bf16.msra.mxu1 %v2370_v0  ;;  %v1997_v0 = vld [vmem:[%s3005_s0 + $0xe] sm:$0x3] }
0x118e   :  { %v1399_v40 = vpop.f32.mrb[16].mxu0 }
0x118f   :  { %v1405_v41 = vadd.f32 %v1991_v2, %v1399_v40  ;;  %v2171_v43 = vpop.f32.mrb[17].mxu0 }
0x1190   :  { %v1402_v44 = vpop.f32.mrb[18].mxu0 }
0x1191   :  { %2335 = vtanh.f32 %v1405_v41  ;;  %v2172_v4 = vpop.f32.mrb[19].mxu0  ;;  %v1993_v6 = vmul.f32 -1.442695, %v1405_v41 }
0x1193   :  { %2337 = vpow2.f32 %v1993_v6 }
0x119b   :  { %v2336_v45 = vpop.eup %2335 }
0x119c   :  { %1420 = vrot.lane.b32.xlu1 %v2336_v45, %s2421_s11 }
0x119d   :  { %v2338_v48 = vpop.eup %2337 }
0x119e   :  { %v1410_v49 = vadd.f32 1.0, %v2338_v48 }
0x11a0   :  { %1415 = vrot.lane.b32.xlu1 %v1406_v46, %s2422_s12  ;;  %2339 = vrcp.f32 %v1410_v49  ;;  %v1679_v49 = vld [vmem:[%s3006_s1] sm:$0x3] }
0x11aa   :  { %v2340_v57 = vpop.eup %2339 }
0x1207   :  { %v1506_v52 = vpop.f32.mrb[32].mxu1 }
0x1208   :  { %v1512_v53 = vadd.f32 %v1994_v50, %v1506_v52  ;;  %v2179_v54 = vpop.f32.mrb[33].mxu1 }
0x1209   :  { %v1509_v55 = vpop.f32.mrb[34].mxu1 }
0x120a   :  { %2341 = vtanh.f32 %v1512_v53  ;;  %v2180_v56 = vpop.f32.mrb[35].mxu1  ;;  %v1996_v62 = vmul.f32 -1.442695, %v1512_v53 }
0x120c   :  { %2343 = vpow2.f32 %v1996_v62 }
0x120e   :  { %v1421_v58 = vpop.permute.xlu1 %1420 }
0x120f   :  { %v1423_v59 = vmul.f32 %v2340_v57, %v1421_v58 }
0x1211   :  { %1425 = vrot.lane.b32.xlu0 %v1423_v59, %s2422_s12 }
0x1212   :  { %v1416_v5 = vpop.permute.xlu1 %1415 }
0x1213   :  { %v1418_v7 = vmul.f32 %v2340_v57, %v1416_v5 }
0x1214   :  { %v2342_v60 = vpop.eup %2341 }
0x1215   :  { %1522 = vrot.lane.b32.xlu0 %v1513_v61, %s2422_s12  ;;  %1527 = vrot.lane.b32.xlu1 %v2342_v60, %s2421_s11 }
0x1216   :  { %v2344_v63 = vpop.eup %2343 }
0x1217   :  { %v1517_v3 = vadd.f32 1.0, %v2344_v63 }
0x1219   :  { %2345 = vrcp.f32 %v1517_v3 }
0x1223   :  { %v2346_v10 = vpop.eup %2345 }
0x1283   :  { %v1426_v8 = vpop.permute.xlu0 %1425 }
0x1284   :  { %v1428_v9 = vadd.f32 %v1426_v8, %v1418_v7 }
0x1286   :  { %2347 = vtanh.f32 %v1428_v9 }
0x1287   :  { %v1528_v11 = vpop.permute.xlu1 %1527  ;;  %v1523_v14 = vpop.permute.xlu0 %1522 }
0x1288   :  { %v1530_v12 = vmul.f32 %v2346_v10, %v1528_v11  ;;  %v1525_v15 = vmul.f32 %v2346_v10, %v1523_v14  ;;  %v145_v11 = vlaneseq }
0x128a   :  { %1532 = vrot.lane.b32.xlu1 %v1530_v12, %s2422_s12 }
0x1290   :  { %v2348_v13 = vpop.eup %2347 }
0x1291   :  { %1431 = vrot.lane.b32.xlu0 %v2348_v13, %s2421_s11 }
0x12fc   :  { %v1533_v16 = vpop.permute.xlu1 %1532 }
0x12fd   :  { %v1535_v17 = vadd.f32 %v1533_v16, %v1525_v15  ;;  %v146_v16 = vshrl.u32 %v145_v11, 7 }
0x12ff   :  { %2349 = vtanh.f32 %v1535_v17 }
0x1303   :  { %v1432_v19 = vpop.permute.xlu0 %1431 }
0x1304   :  { %v2797_v20 = vmul.f32 %v2340_v57, %v1432_v19 }
0x1306   :  { %1436 = vrot.lane.b32.xlu1 %v2797_v20, %s2422_s12 }
0x1309   :  { %v2350_v21 = vpop.eup %2349 }
0x130a   :  { %1538 = vrot.lane.b32.xlu0 %v2350_v21, %s2421_s11  ;;  %v140_v21 = vpack.c.bf16 %v2538_v47, %v2538_v47 }
0x130e   :  { %1441 = vrot.lane.b32.xlu0 %v1428_v9, %s2423_s15  ;;  %v2424_v9 = vmov 1966171168  }
0x1312   :  { %1548 = vrot.lane.b32.xlu0 %v1535_v17, %s2423_s15  ;;  %v260_v17 = vpack.c.bf16 %v2546_v51, %v2546_v51 }
0x1378   :  { %v1437_v24 = vpop.permute.xlu1 %1436 }
0x1379   :  { %1439 = vst.msk [vmem:[#allocation2] sm:$0x3] %vm28_vm1, %v1437_v24 }
0x137c   :  { %v1539_v25 = vpop.permute.xlu0 %1538 }
0x137d   :  { %v2805_v27 = vmul.f32 %v2346_v10, %v1539_v25  ;;  %v143_v10 = vunpack.c.l.s4 %v2424_v9 }
0x137f   :  { %1543 = vrot.lane.b32.xlu1 %v2805_v27, %s2422_s12  ;;  %v144_v15 = vunpack.c.0.s8 %v143_v10  ;;  %v1017_v10 = vpack.c.bf16 %v2706_v23, %v2706_v23 }
0x1380   :  { %v1442_v29 = vpop.permute.xlu0 %1441  ;;  %v1574_v32 = vld [vmem:[#allocation2] sm:$0x3] }
0x1381   :  { %1444 = vst.msk [vmem:[#allocation3] sm:$0x3] %vm28_vm1, %v1442_v29  ;;  %v1575_v33 = vpack.c.bf16 %v1574_v32, %v1574_v32  ;;  %v2833_v19 = vsub.s32 %v144_v15, %v146_v16  ;;  %v1124_v16 = vpack.c.bf16 %v2714_v28, %v2714_v28 }
0x1383   :  { %2186 = vmatmul.mubr.msk.bf16.vlgmr.msra.gmra.mrb[20].mxu0 %vm56_vm2, %v1575_v33  ;;  %v268_v24 = vrot.slane %v260_v17, %v2833_v19  ;;  %v148_v29 = vrot.slane %v140_v21, %v2833_v19  ;;  %v1445_v21 = vpack.c.bf16 %v2797_v20, %v2797_v20 }
0x1384   :  { %v1549_v34 = vpop.permute.xlu0 %1548  ;;  %2213 = vmatprep.mubr.msk.bf16.mxu0 %vm2420_vm0, %v2419_v1 }
0x1385   :  { %1551 = vst.msk [vmem:[#allocation5] sm:$0x3] %vm28_vm1, %v1549_v34  ;;  %v275_v32 = vrot.slane %v268_v24, %v2833_v19  ;;  %v155_v33 = vrot.slane %v148_v29, %v2833_v19  ;;  %v1132_v24 = vrot.slane %v1124_v16, %v2833_v19  ;;  %v1453_v29 = vrot.slane %v1445_v21, %v2833_v19 }
0x1388   :  { %v1620_v45 = vld [vmem:[#allocation3] sm:$0x3] }
0x138c   :  { %v1726_v60 = vld [vmem:[#allocation5] sm:$0x3] }
0x13f1   :  { %v1544_v36 = vpop.permute.xlu1 %1543 }
0x13f2   :  { %1546 = vst.msk [vmem:[#allocation4] sm:$0x3] %vm28_vm1, %v1544_v36 }
0x13f9   :  { %v1680_v37 = vld [vmem:[#allocation4] sm:$0x3] }
0x13fa   :  { %v1681_v39 = vpack.c.bf16 %v1680_v37, %v1680_v37 }
0x13fc   :  { %2194 = vmatmul.mubr.msk.bf16.vlgmr.msra.gmra.mrb[36].mxu1 %vm56_vm2, %v1681_v39 }
0x1456   :  { %v1613_v2 = vpop.f32.mrb[20].mxu0 }
0x1457   :  { %v1619_v40 = vadd.f32 %v1997_v0, %v1613_v2  ;;  %v2187_v41 = vpop.f32.mrb[21].mxu0 }
0x1458   :  { %v1616_v43 = vpop.f32.mrb[22].mxu0 }
0x1459   :  { %2351 = vtanh.f32 %v1619_v40  ;;  %v2188_v44 = vpop.f32.mrb[23].mxu0  ;;  %v1999_v46 = vmul.f32 -1.442695, %v1619_v40 }
0x145b   :  { %2353 = vpow2.f32 %v1999_v46  ;;  %v2233_v46 = vld [vmem:[%s3009_s4 + $0x10] sm:$0xff]  }
0x1463   :  { %v2352_v4 = vpop.eup %2351 }
0x1464   :  { %1634 = vrot.lane.b32.xlu1 %v2352_v4, %s2421_s11  ;;  %v2231_v4 = vld [vmem:[%s3009_s4] sm:$0xff]  }
0x1465   :  { %v2354_v6 = vpop.eup %2353  ;;  %2198 = vmatpush3.bf16.msra.mxu0 %v2231_v4 }
0x1466   :  { %v1624_v48 = vadd.f32 1.0, %v2354_v6  ;;  %2199 = vmatprep.subr.bf16.mxu0 %v2419_v1  ;;  %v2234_v6 = vld [vmem:[%s3009_s4 + $0x18] sm:$0xff]  }
0x1468   :  { %1629 = vrot.lane.b32.xlu1 %v1620_v45, %s2422_s12  ;;  %2355 = vrcp.f32 %v1624_v48  ;;  %v2232_v45 = vld [vmem:[%s3009_s4 + $0x8] sm:$0xff]   ;;  %v2235_v48 = vld [vmem:[%s3009_s4 + $0x20] sm:$0xff]  }
0x1469   :  { %2200 = vmatpush3.bf16.msra.mxu0 %v2232_v45 }
0x146a   :  { %2201 = vmatprep.subr.bf16.mxu0 %v2419_v1 }
0x146d   :  { %2202 = vmatpush3.bf16.msra.mxu0 %v2233_v46 }
0x146e   :  { %2203 = vmatprep.subr.bf16.mxu0 %v2419_v1 }
0x1471   :  { %2204 = vmatpush3.bf16.msra.mxu0 %v2234_v6 }
0x1472   :  { %v2356_v56 = vpop.eup %2355  ;;  %2205 = vmatprep.subr.bf16.mxu0 %v2419_v1 }
0x1475   :  { %2206 = vmatpush3.bf16.msra.mxu0 %v2235_v48 }
0x1476   :  { %2207 = vmatprep.subr.bf16.mxu0 %v2419_v1 }
0x14cf   :  { %v1719_v50 = vpop.f32.mrb[36].mxu1 }
0x14d0   :  { %v1725_v52 = vadd.f32 %v1719_v50, %v1679_v49  ;;  %v2195_v53 = vpop.f32.mrb[37].mxu1  ;;  %v2236_v49 = vld [vmem:[%s3009_s4 + $0x28] sm:$0xff]   ;;  %v2237_v50 = vld [vmem:[%s3009_s4 + $0x30] sm:$0xff]  }
0x14d1   :  { %v1722_v54 = vpop.f32.mrb[38].mxu1  ;;  %2208 = vmatpush3.bf16.msra.mxu0 %v2236_v49  ;;  %v2238_v53 = vld [vmem:[%s3009_s4 + $0x38] sm:$0xff]   ;;  %s2425_s4 = smov [#allocation6]  }
0x14d2   :  { %2357 = vtanh.f32 %v1725_v52  ;;  %v2196_v55 = vpop.f32.mrb[39].mxu1  ;;  %v2001_v61 = vmul.f32 -1.442695, %v1725_v52  ;;  %2209 = vmatprep.subr.bf16.mxu0 %v2419_v1 }
0x14d3   :  { %v369_v55 = vpack.c.bf16 %v2580_v38, %v2580_v38 }
0x14d4   :  { %2359 = vpow2.f32 %v2001_v61  ;;  %v477_v61 = vpack.c.bf16 %v2588_v42, %v2588_v42 }
0x14d5   :  { %2210 = vmatpush3.bf16.msra.mxu0 %v2237_v50 }
0x14d6   :  { %v1635_v57 = vpop.permute.xlu1 %1634  ;;  %2211 = vmatprep.subr.bf16.mxu0 %v2419_v1  ;;  %v585_v1 = vpack.c.bf16 %v2622_v31, %v2622_v31  ;;  %v693_v31 = vpack.c.bf16 %v2630_v35, %v2630_v35  ;;  %v909_v35 = vpack.c.bf16 %v2672_v30, %v2672_v30 }
0x14d7   :  { %v1637_v58 = vmul.f32 %v2356_v56, %v1635_v57 }
0x14d8   :  { %v593_v38 = vrot.slane %v585_v1, %v2833_v19  ;;  %v701_v11 = vrot.slane %v693_v31, %v2833_v19  ;;  %v917_v15 = vrot.slane %v909_v35, %v2833_v19 }
0x14d9   :  { %1639 = vrot.lane.b32.xlu0 %v1637_v58, %s2422_s12  ;;  %2212 = vmatpush3.bf16.msra.mxu0 %v2238_v53 }
0x14da   :  { %v1630_v3 = vpop.permute.xlu1 %1629  ;;  %v600_v42 = vrot.slane %v593_v38, %v2833_v19  ;;  %v708_v23 = vrot.slane %v701_v11, %v2833_v19 }
0x14db   :  { %v1632_v5 = vmul.f32 %v2356_v56, %v1630_v3 }
0x14dc   :  { %v2358_v59 = vpop.eup %2357 }
0x14dd   :  { %1735 = vrot.lane.b32.xlu0 %v1726_v60, %s2422_s12  ;;  %1740 = vrot.lane.b32.xlu1 %v2358_v59, %s2421_s11  ;;  %v377_v59 = vrot.slane %v369_v55, %v2833_v19 }
0x14de   :  { %v2360_v62 = vpop.eup %2359 }
0x14df   :  { %v1730_v63 = vadd.f32 1.0, %v2360_v62  ;;  %v801_v62 = vpack.c.bf16 %v2664_v26, %v2664_v26 }
0x14e1   :  { %2361 = vrcp.f32 %v1730_v63  ;;  %v384_v63 = vrot.slane %v377_v59, %v2833_v19  ;;  %v809_v9 = vrot.slane %v801_v62, %v2833_v19 }
0x14eb   :  { %v2362_v12 = vpop.eup %2361 }
0x154b   :  { %v1640_v7 = vpop.permute.xlu0 %1639 }
0x154c   :  { %v2827_v8 = vadd.f32 %v1640_v7, %v1632_v5  ;;  %v485_v5 = vrot.slane %v477_v61, %v2833_v19 }
0x154e   :  { %2363 = vtanh.f32 %v2827_v8  ;;  %v492_v26 = vrot.slane %v485_v5, %v2833_v19 }
0x154f   :  { %v1741_v13 = vpop.permute.xlu1 %1740  ;;  %v1736_v51 = vpop.permute.xlu0 %1735 }
0x1550   :  { %v1743_v14 = vmul.f32 %v2362_v12, %v1741_v13  ;;  %v1738_v34 = vmul.f32 %v2362_v12, %v1736_v51  ;;  %v1025_v13 = vrot.slane %v1017_v10, %v2833_v19  ;;  %v1460_v51 = vrot.slane %v1453_v29, %v2833_v19 }
0x1552   :  { %1745 = vrot.lane.b32.xlu1 %v1743_v14, %s2422_s12  ;;  %v1231_v14 = vpack.c.bf16 %v2748_v18, %v2748_v18  ;;  %v1032_v30 = vrot.slane %v1025_v13, %v2833_v19  ;;  %v924_v18 = vrot.slane %v917_v15, %v2833_v19 }
0x1554   :  { %v1239_v17 = vrot.slane %v1231_v14, %v2833_v19 }
0x1556   :  { %v1246_v28 = vrot.slane %v1239_v17, %v2833_v19 }
0x1558   :  { %v2364_v25 = vpop.eup %2363 }
0x1559   :  { %1645 = vrot.lane.b32.xlu0 %v2364_v25, %s2421_s11  ;;  %v1338_v25 = vpack.c.bf16 %v2756_v22, %v2756_v22 }
0x155b   :  { %v1346_v20 = vrot.slane %v1338_v25, %v2833_v19 }
0x155d   :  { %276 = vrot.lane.b32.xlu0 %v275_v32, %s2421_s11  ;;  %v1139_v32 = vrot.slane %v1132_v24, %v2833_v19  ;;  %v1353_v22 = vrot.slane %v1346_v20, %v2833_v19 }
0x1561   :  { %156 = vrot.lane.b32.xlu0 %v155_v33, %s2422_s12  ;;  %v1552_v33 = vpack.c.bf16 %v2805_v27, %v2805_v27 }
0x15c4   :  { %v1746_v36 = vpop.permute.xlu1 %1745 }
0x15c5   :  { %v2844_v37 = vadd.f32 %v1746_v36, %v1738_v34  ;;  %v1560_v34 = vrot.slane %v1552_v33, %v2833_v19 }
0x15c7   :  { %2365 = vtanh.f32 %v2844_v37  ;;  %v1567_v36 = vrot.slane %v1560_v34, %v2833_v19 }
0x15cb   :  { %v1646_v47 = vpop.permute.xlu0 %1645 }
0x15cc   :  { %v2847_v39 = vmul.f32 %v2356_v56, %v1646_v47 }
0x15ce   :  { %v1659_v0 = vpack.c.bf16 %v2847_v39, %v2847_v39 }
0x15cf   :  { %v277_v2 = vpop.permute.xlu0 %276 }
0x15d0   :  { %v1667_v40 = vrot.slane %v1659_v0, %v2833_v19  ;;  %281 = vst.msk [vmem:[#allocation6 + $0x7] sm:$0x1] %vm280_vm3, %v277_v2 }
0x15d1   :  { %v2366_v41 = vpop.eup %2365 }
0x15d2   :  { %1751 = vrot.lane.b32.xlu1 %v2366_v41, %s2421_s11  ;;  %v1674_v44 = vrot.slane %v1667_v40, %v2833_v19 }
0x15d3   :  { %v157_v43 = vpop.permute.xlu0 %156 }
0x15d4   :  { %160 = vst.msk [vmem:[#allocation6] sm:$0x1] %vm159_vm4, %v157_v43 }
0x15d6   :  { %1675 = vrot.lane.b32.xlu1 %v1674_v44, %s2422_s12 }
0x1644   :  { %v1752_v52 = vpop.permute.xlu1 %1751 }
0x1645   :  { %v1754_v54 = vmul.f32 %v2362_v12, %v1752_v52  ;;  %v816_v12 = vrot.slane %v809_v9, %v2833_v19 }
0x1647   :  { %v1765_v56 = vpack.c.bf16 %v1754_v54, %v1754_v54 }
0x1648   :  { %v1676_v57 = vpop.permute.xlu1 %1675 }
0x1649   :  { %v1773_v58 = vrot.slane %v1765_v56, %v2833_v19  ;;  %1678 = vst.msk [vmem:[#allocation6 + $0x7] sm:$0x1] %vm159_vm4, %v1676_v57 }
0x164b   :  { %v1780_v60 = vrot.slane %v1773_v58, %v2833_v19 }
0x164d   :  { %1781 = vrot.lane.b32.xlu1 %v1780_v60, %s2421_s11 }
0x1650   :  { %v2002_v3 = vld.sshfl [vmem:[#allocation6 + $0x7] sm:$0x1 pattern:$0x75316420] }
0x1651   :  { %385 = vrot.lane.b32.xlu1 %v384_v63, %s2422_s12  ;;  %v1801_v7 = vrot.slane %v2002_v3, %v2833_v19 }
0x1653   :  { %1802 = vrot.lane.b32.xlu0 %v1801_v7, %s2421_s11 }
0x1655   :  { %601 = vrot.lane.b32.xlu1 %v600_v42, %s2422_s12 }
0x1657   :  { %493 = vrot.lane.b32.xlu0 %v492_v26, %s2421_s11 }
0x1659   :  { %817 = vrot.lane.b32.xlu1 %v816_v12, %s2422_s12 }
0x165b   :  { %709 = vrot.lane.b32.xlu0 %v708_v23, %s2421_s11 }
0x165d   :  { %1033 = vrot.lane.b32.xlu1 %v1032_v30, %s2422_s12 }
0x165f   :  { %925 = vrot.lane.b32.xlu0 %v924_v18, %s2421_s11 }
0x1661   :  { %1247 = vrot.lane.b32.xlu1 %v1246_v28, %s2422_s12 }
0x1663   :  { %1140 = vrot.lane.b32.xlu0 %v1139_v32, %s2421_s11 }
0x1665   :  { %1461 = vrot.lane.b32.xlu1 %v1460_v51, %s2422_s12 }
0x1667   :  { %1354 = vrot.lane.b32.xlu0 %v1353_v22, %s2421_s11 }
0x1669   :  { %1650 = vrot.lane.b32.xlu1 %v2847_v39, %s2422_s12 }
0x166b   :  { %1568 = vrot.lane.b32.xlu0 %v1567_v36, %s2421_s11  ;;  %s1927_s11 = sshll.u32 %s2425_s4, 4  ;;  %s1928_s11 = int_to_ptr.vmem [resolvable:$true] %s1927_s11 }
0x166c   :  { %p2376_p1 = scmp.lt.s32.totalorder %s1928_s11, %s1928_s11 }
0x166d   :  { %1756 = vrot.lane.b32.xlu1 %v1754_v54, %s2422_s12  ;;  %s2371_s12 = scalar_lea.vmem %s1928_s11, 128 }
0x166e   :  { %p2372_p0 = scmp.ne.s32.totalorder %s1928_s11, %s2371_s12  ;;  %p2377_p2 = scmp.lt.s32.totalorder %s2371_s12, %s2371_s12 }
0x166f   :  { %1655 = vrot.lane.b32.xlu0 %v2827_v8, %s2423_s15 }
0x1670   :  { %p2378_p3 = por %p2377_p2, %p2376_p1 }
0x1672   :  { %p2379_p4 = pnand %p2378_p3, %p2372_p0 }
0x1673   :  { %1761 = vrot.lane.b32.xlu0 %v2844_v37, %s2423_s15 }
0x16bf   :  { %v1782_v27 = vpop.permute.xlu1 %1781 }
0x16c0   :  { %1784 = vst.msk [vmem:[#allocation6] sm:$0x1] %vm280_vm3, %v1782_v27 }
0x16c3   :  { %v386_v47 = vpop.permute.xlu1 %385 }
0x16c4   :  { %389 = vst.msk [vmem:[#allocation6 + $0x1] sm:$0x1] %vm159_vm4, %v386_v47 }
0x16c5   :  { %v1803_v19 = vpop.permute.xlu0 %1802 }
0x16c7   :  { %v1785_v0 = vld [vmem:[#allocation6] sm:$0x1]  ;;  %v602_v39 = vpop.permute.xlu1 %601 }
0x16c8   :  { %v1807_v2 = vsel %vm1804_vm5, %v1785_v0, %v1803_v19  ;;  %605 = vst.msk [vmem:[#allocation6 + $0x2] sm:$0x1] %vm159_vm4, %v602_v39 }
0x16c9   :  { %v494_v40 = vpop.permute.xlu0 %493  ;;  %2214 = vmatmul.mubr.bf16.vlgmr.msra.gmra.mrb[24].mxu0 %v1807_v2 }
0x16ca   :  { %497 = vst.msk [vmem:[#allocation6 + $0x6] sm:$0x1] %vm280_vm3, %v494_v40 }
0x16cb   :  { %v818_v8 = vpop.permute.xlu1 %817 }
0x16cc   :  { %821 = vst.msk [vmem:[#allocation6 + $0x3] sm:$0x1] %vm159_vm4, %v818_v8 }
0x16cd   :  { %v710_v37 = vpop.permute.xlu0 %709 }
0x16ce   :  { %713 = vst.msk [vmem:[#allocation6 + $0x5] sm:$0x1] %vm280_vm3, %v710_v37 }
0x16cf   :  { %v1034_v41 = vpop.permute.xlu1 %1033 }
0x16d1   :  { %v926_v43 = vpop.permute.xlu0 %925 }
0x16d2   :  { %929 = vst.msk [vmem:[#allocation6 + $0x4] sm:$0x1] %vm280_vm3, %v926_v43 }
0x16d3   :  { %1036 = vst.msk [vmem:[#allocation6 + $0x4] sm:$0x1] %vm159_vm4, %v1034_v41  ;;  %v1248_v44 = vpop.permute.xlu1 %1247 }
0x16d4   :  { %1250 = vst.msk [vmem:[#allocation6 + $0x5] sm:$0x1] %vm159_vm4, %v1248_v44 }
0x16d5   :  { %v1141_v4 = vpop.permute.xlu0 %1140 }
0x16d6   :  { %1143 = vst.msk [vmem:[#allocation6 + $0x3] sm:$0x1] %vm280_vm3, %v1141_v4 }
0x16d7   :  { %v1462_v45 = vpop.permute.xlu1 %1461 }
0x16d8   :  { %1464 = vst.msk [vmem:[#allocation6 + $0x6] sm:$0x1] %vm159_vm4, %v1462_v45 }
0x16d9   :  { %v1355_v46 = vpop.permute.xlu0 %1354 }
0x16da   :  { %1357 = vst.msk [vmem:[#allocation6 + $0x2] sm:$0x1] %vm280_vm3, %v1355_v46 }
0x16db   :  { %v1651_v6 = vpop.permute.xlu1 %1650 }
0x16dc   :  { %1653 = vst.msk [vmem:[#allocation2] sm:$0x3] %vm28_vm1, %v1651_v6 }
0x16dd   :  { %v1569_v48 = vpop.permute.xlu0 %1568 }
0x16de   :  { %1571 = vst.msk [vmem:[#allocation6 + $0x1] sm:$0x1] %vm280_vm3, %v1569_v48 }
0x16df   :  { %v1757_v49 = vpop.permute.xlu1 %1756 }
0x16e0   :  { %1759 = vst.msk [vmem:[#allocation4] sm:$0x3] %vm28_vm1, %v1757_v49 }
0x16e1   :  { %v1656_v50 = vpop.permute.xlu0 %1655 }
0x16e2   :  { %1658 = vst.msk [vmem:[#allocation3] sm:$0x3] %vm28_vm1, %v1656_v50 }
0x16e5   :  { %v1762_v52 = vpop.permute.xlu0 %1761 }
0x16e6   :  { %1764 = vst.msk [vmem:[#allocation5] sm:$0x3] %vm28_vm1, %v1762_v52 }
0x16e7   :  { %2382 = shalt.err (!%p2379_p4)
}
0x16e8   :  { %s2383_s24 = scalar_lea.hbm %s3011_s6, 128 }
0x16e9   :  { %p2384_p5 = scmp.ne.s32.totalorder %s3011_s6, %s2383_s24  ;;  %p2387_p6 = scmp.lt.u32.totalorder %s2383_s24, %s3011_s6 }
0x16eb   :  { %p2389_p7 = pnand %p2387_p6, %p2384_p5 }
0x16ed   :  { %2392 = shalt.err (!%p2389_p7)
}
0x16ee   :  { %s2426_s28 = smov 16   ;;  %s2427_s29 = smov 1   ;;  %v2003_v53 = vld [vmem:[%s3010_s5] ss:$0 sm:$0xff]  ;;  %vm1920_vm6 = vcmask 9216  }
0x16ef   :  { %1933 = dma.vmem_to_hbm [thread:$0]  %s1928_s11, 128, %s3011_s6, [#allocation7], %s2426_s28, %s2426_s28, %s2427_s29  }
0x16f0   :  { %s2428_s9 = smov [#allocation8]  }
0x16f1   :  { %s1940_s10 = sshll.u32 %s2428_s9, 4  ;;  %s1941_s10 = int_to_ptr.vmem [resolvable:$true] %s1940_s10 }
0x16f2   :  { %s2393_s13 = scalar_lea.vmem %s1941_s10, 32  ;;  %p2398_p9 = scmp.lt.s32.totalorder %s1941_s10, %s1941_s10 }
0x16f3   :  { %p2394_p8 = scmp.ne.s32.totalorder %s1941_s10, %s2393_s13  ;;  %p2399_p10 = scmp.lt.s32.totalorder %s2393_s13, %s2393_s13 }
0x16f5   :  { %p2400_p11 = por %p2399_p10, %p2398_p9 }
0x16f7   :  { %p2401_p12 = pnand %p2400_p11, %p2394_p8 }
0x179c   :  { %v1914_v54 = vpop.f32.mrb[24].mxu0 }
0x179d   :  { %v1915_v55 = vadd.f32 %v2003_v53, %v1914_v54  ;;  %v2215_v56 = vpop.f32.mrb[25].mxu0 }
0x179e   :  { %v1917_v57 = vpop.f32.mrb[26].mxu0 }
0x179f   :  { %v2216_v58 = vpop.f32.mrb[27].mxu0  ;;  %1921 = vst.msk [vmem:[#allocation8] sm:$0x3] %vm1920_vm6, %v1915_v55 }
0x17a0   :  { %2404 = shalt.err (!%p2401_p12)
}
0x17a1   :  { %s2405_s5 = scalar_lea.hbm %s3012_s7, 32 }
0x17a2   :  { %p2406_p13 = scmp.ne.s32.totalorder %s3012_s7, %s2405_s5  ;;  %p2409_p0 = scmp.lt.u32.totalorder %s2405_s5, %s3012_s7 }
0x17a4   :  { %p2411_p1 = pnand %p2409_p0, %p2406_p13 }
0x17a6   :  { %2414 = shalt.err (!%p2411_p1)
}
0x17a7   :  { %1943 = dma.vmem_to_hbm [thread:$0]  %s1941_s10, 32, %s3012_s7, [#allocation9]  }
0x17a8   :  { %2415 = dma.done.wait [#allocation7], 128  }
0x17a9   :  { %2416 = vsyncadd [#allocation7], 4294967168 }
0x17aa   :  { %2417 = dma.done.wait [#allocation9], 32  }
0x17ab   :  { %2418 = vsyncadd [#allocation9], 4294967264 }
0x17ac   :  { %1950 = vsyncpa [#allocation7], 1 }
0x17ad   :  { %1951 = vsyncpa [#allocation9], 1 }

</bundles_post_ra>
